<compile_context>
chip_gen: v7x
topology: tpu7x:2x2x1
jax: 0.10.0
libtpu: 0.0.40
codegen_flags: <defaults>
</compile_context>

<pallas_src>
import functools
import math

import jax
import jax.numpy as jnp
from jax.experimental import pallas as pl
from jax.experimental.pallas import tpu as pltpu


# ----------------------------------------------------------------------------
# Fused forward kernel: embeddings + LN + L encoder layers + pooler + classifier
# ----------------------------------------------------------------------------
def _fused_minilm_kernel(
    ids_ref, mask_ref,
    word_emb_ref, pos_emb_ref, type_emb_ref, emb_g_ref, emb_b_ref,
    wq_ref, bq_ref, wk_ref, bk_ref, wv_ref, bv_ref, wo_ref, bo_ref,
    ln1g_ref, ln1b_ref, w1_ref, b1_ref, w2_ref, b2_ref, ln2g_ref, ln2b_ref,
    pool_w_ref, pool_b_ref, cls_w_ref, cls_b_ref,
    out_ref,
    *, num_layers, num_heads, batch, seq, eps):
  BS = batch * seq
  V, H = word_emb_ref.shape

  def ln(v, g, b):
    mu = jnp.mean(v, axis=-1, keepdims=True)
    var = jnp.mean(jnp.square(v - mu), axis=-1, keepdims=True)
    return (v - mu) * jax.lax.rsqrt(var + eps) * g + b

  def dense(v, w, b):
    # bf16 operands on the MXU, f32 accumulation, f32 bias/epilogue.
    return jnp.dot(v.astype(w.dtype), w, preferred_element_type=jnp.float32) + b

  def erf(z):
    # Abramowitz & Stegun 7.1.26 — erf-GELU (HF BERT) to ~1e-6 in f32, using
    # only exp/abs/where (EUP + VPU, no erf-lowering dependence).
    a1, a2, a3, a4, a5 = (0.254829592, -0.284496736, 1.421413741,
                          -1.453152027, 1.061405429)
    pc = 0.3275911
    az = jnp.abs(z)
    t = 1.0 / (1.0 + pc * az)
    poly = ((((a5 * t + a4) * t + a3) * t + a2) * t + a1) * t
    e = 1.0 - poly * jnp.exp(-az * az)
    return jnp.where(z >= 0, e, -e)

  inv_sqrt2 = jnp.float32(1.0 / math.sqrt(2.0))

  # ---- embeddings, fused in-kernel: one-hot gather on the (idle) MXU ----
  ids = ids_ref[...]                                              # (BS, 1) int32
  iota_v = jax.lax.broadcasted_iota(jnp.int32, (BS, V), 1)
  onehot = (ids == iota_v).astype(jnp.float32)                    # (BS, V)
  word = jnp.dot(onehot, word_emb_ref[...],
                 preferred_element_type=jnp.float32)              # (BS, H)
  pos_type = pos_emb_ref[0:seq, :] + type_emb_ref[0:1, :]         # (S, H), token_type=0
  x = word + jnp.concatenate([pos_type] * batch, axis=0)          # (BS, H)
  x = ln(x, emb_g_ref[...], emb_b_ref[...])                       # embedding LayerNorm

  # ---- HF-style additive attention mask, one (1,S) row per batch (hoisted) ----
  mask_bias = (1.0 - mask_ref[...].astype(jnp.float32)) * jnp.float32(-1e9)
  mask_rows = [mask_bias[b:b + 1, :] for b in range(batch)]       # each (1, S)

  for l in range(num_layers):                                     # static unroll (L=2)
    # ---- multi-head self-attention; heads use per-head weight tiles, Wo folded
    #      into the head loop -> no lane-offset slices / head concat ----
    attn = jnp.zeros((BS, H), jnp.float32)
    for h in range(num_heads):                                    # static unroll (nH=4)
      qh = dense(x, wq_ref[l, h], bq_ref[l, h])                   # (BS, dH), scale pre-folded
      kh = dense(x, wk_ref[l, h], bk_ref[l, h])                   # (BS, dH)
      vh = dense(x, wv_ref[l, h], bv_ref[l, h])                   # (BS, dH)
      ctx_rows = []
      for b in range(batch):                                      # static unroll (B=2)
        r0 = b * seq                                              # sublane-aligned slices
        qb = qh[r0:r0 + seq, :]
        kb = kh[r0:r0 + seq, :]
        vb = vh[r0:r0 + seq, :]
        # q @ k^T expressed as contraction over dim 1 of both operands
        sc = jax.lax.dot_general(qb, kb, (((1,), (1,)), ((), ())),
                                 preferred_element_type=jnp.float32)   # (S, S)
        sc = sc + mask_rows[b]
        sc = sc - jnp.max(sc, axis=-1, keepdims=True)
        p = jnp.exp(sc)
        p = p * pl.reciprocal(jnp.sum(p, axis=-1, keepdims=True), approx=True)
        ctx_rows.append(jnp.dot(p, vb, preferred_element_type=jnp.float32))
      ctx_h = jnp.concatenate(ctx_rows, axis=0)                   # (BS, dH) sublane concat
      attn = attn + jnp.dot(ctx_h.astype(wo_ref.dtype), wo_ref[l, h],
                            preferred_element_type=jnp.float32)   # += ctx_h @ Wo_h
    x = ln(x + attn + bo_ref[l], ln1g_ref[l], ln1b_ref[l])        # residual + LN

    # ---- feed-forward (exact erf-GELU) + residual + LN ----
    hmid = dense(x, w1_ref[l], b1_ref[l])                         # (BS, I)
    hmid = 0.5 * hmid * (1.0 + erf(hmid * inv_sqrt2))
    ffn = dense(hmid, w2_ref[l], b2_ref[l])                       # (BS, H)
    x = ln(x + ffn, ln2g_ref[l], ln2b_ref[l])

  # ---- pooler: tanh(W * CLS + b); dropout(p=0.3) is identity in eval mode ----
  cls_rows = jnp.concatenate(
      [x[b * seq:b * seq + 1, :] for b in range(batch)], axis=0)  # (B, H)
  pooled = jnp.tanh(dense(cls_rows, pool_w_ref[...], pool_b_ref[...]))

  # ---- classifier, lane-padded to 128 (sliced to num_labels outside) ----
  out_ref[...] = dense(pooled, cls_w_ref[...], cls_b_ref[...]).astype(out_ref.dtype)


# ----------------------------------------------------------------------------
# Model config / parameters
# ----------------------------------------------------------------------------
class Config:
    vocab_size = 64
    max_position = 16
    type_vocab = 2
    hidden = 32
    heads = 4
    head_dim = 8          # hidden // heads
    layers = 2
    intermediate = 64
    num_labels = 3
    logit_pad = 128       # lane-dense classifier output, sliced outside
    seq = 8
    batch = 2


def init_params(cfg):
    key = jax.random.PRNGKey(0)

    def nrm(k, shape):
        return 0.02 * jax.random.normal(k, shape, dtype=jnp.float32)

    keys = iter(jax.random.split(key, 64))
    L, H, I = cfg.layers, cfg.hidden, cfg.intermediate
    nH, dH = cfg.heads, cfg.head_dim
    scale = 1.0 / math.sqrt(dH)          # folded into the Q projection (host, once)

    cls_w = nrm(next(keys), (H, cfg.num_labels))
    cls_w_pad = jnp.zeros((H, cfg.logit_pad), jnp.float32)
    cls_w_pad = cls_w_pad.at[:, :cfg.num_labels].set(cls_w).astype(jnp.bfloat16)
    cls_b_pad = jnp.zeros((1, cfg.logit_pad), jnp.float32)

    p = {
        # embeddings (f32 for accuracy; gathered via one-hot MXU matmul in-kernel)
        "word_emb": nrm(next(keys), (cfg.vocab_size, H)),
        "pos_emb": nrm(next(keys), (cfg.max_position, H)),
        "type_emb": nrm(next(keys), (cfg.type_vocab, H)),
        "emb_ln_g": jnp.ones((1, H), jnp.float32),
        "emb_ln_b": jnp.zeros((1, H), jnp.float32),
        # attention weights stored PER HEAD (shuffle-free head handling);
        # 1/sqrt(dH) folded into Wq / bq so the kernel has no score scaling.
        "wq": (nrm(next(keys), (L, nH, H, dH)) * scale).astype(jnp.bfloat16),
        "bq": (jnp.zeros((L, nH, 1, dH), jnp.float32) * scale),
        "wk": nrm(next(keys), (L, nH, H, dH)).astype(jnp.bfloat16),
        "bk": jnp.zeros((L, nH, 1, dH), jnp.float32),
        "wv": nrm(next(keys), (L, nH, H, dH)).astype(jnp.bfloat16),
        "bv": jnp.zeros((L, nH, 1, dH), jnp.float32),
        "wo": nrm(next(keys), (L, nH, dH, H)).astype(jnp.bfloat16),
        "bo": jnp.zeros((L, 1, H), jnp.float32),
        "ln1_g": jnp.ones((L, 1, H), jnp.float32),
        "ln1_b": jnp.zeros((L, 1, H), jnp.float32),
        # feed-forward
        "w1": nrm(next(keys), (L, H, I)).astype(jnp.bfloat16),
        "b1": jnp.zeros((L, 1, I), jnp.float32),
        "w2": nrm(next(keys), (L, I, H)).astype(jnp.bfloat16),
        "b2": jnp.zeros((L, 1, H), jnp.float32),
        "ln2_g": jnp.ones((L, 1, H), jnp.float32),
        "ln2_b": jnp.zeros((L, 1, H), jnp.float32),
        # pooler + classifier
        "pooler_w": nrm(next(keys), (H, H)).astype(jnp.bfloat16),
        "pooler_b": jnp.zeros((1, H), jnp.float32),
        "cls_w_pad": cls_w_pad,
        "cls_b_pad": cls_b_pad,
    }
    return p


# ----------------------------------------------------------------------------
# Forward pass wrapper — a single fused pallas_call, no per-batch grid.
# ----------------------------------------------------------------------------
def multilabel_minilm_forward(params, input_ids, attention_mask, cfg):
    B, S = input_ids.shape
    PAD = cfg.logit_pad

    ids_col = input_ids.reshape(B * S, 1).astype(jnp.int32)      # 64-byte reshape (glue)
    mask = attention_mask.astype(jnp.int32)                      # (B, S)

    def fullspec(shape):
        n = len(shape)
        return pl.BlockSpec(shape, lambda i, n=n: (0,) * n)

    kernel = functools.partial(
        _fused_minilm_kernel,
        num_layers=cfg.layers, num_heads=cfg.heads,
        batch=B, seq=S, eps=1e-12)

    arrays = [
        ids_col, mask,
        params["word_emb"], params["pos_emb"], params["type_emb"],
        params["emb_ln_g"], params["emb_ln_b"],
        params["wq"], params["bq"], params["wk"], params["bk"],
        params["wv"], params["bv"], params["wo"], params["bo"],
        params["ln1_g"], params["ln1_b"],
        params["w1"], params["b1"], params["w2"], params["b2"],
        params["ln2_g"], params["ln2_b"],
        params["pooler_w"], params["pooler_b"],
        params["cls_w_pad"], params["cls_b_pad"],
    ]

    out = pl.pallas_call(
        kernel,
        grid=(1,),                                   # single block, batch folded in
        out_shape=jax.ShapeDtypeStruct((B, PAD), jnp.float32),
        in_specs=[fullspec(a.shape) for a in arrays],
        out_specs=fullspec((B, PAD)),
        compiler_params=pltpu.CompilerParams(
            dimension_semantics=("arbitrary",)),
    )(*arrays)

    return out[:, :cfg.num_labels]                               # (B, num_labels)


# ----------------------------------------------------------------------------
if __name__ == "__main__":
    cfg = Config()
    params = init_params(cfg)

    key = jax.random.PRNGKey(0)
    k_ids, _ = jax.random.split(key)
    input_ids = jax.random.randint(
        k_ids, (cfg.batch, cfg.seq), 0, cfg.vocab_size, dtype=jnp.int32)
    attention_mask = jnp.array(
        [[1, 1, 1, 1, 1, 1, 1, 1],
         [1, 1, 1, 1, 1, 1, 0, 0]], dtype=jnp.int32)             # (B, S)

    fwd = jax.jit(lambda p, ids, m: multilabel_minilm_forward(p, ids, m, cfg))
    logits = jax.block_until_ready(fwd(params, input_ids, attention_mask))

    assert logits.shape == (cfg.batch, cfg.num_labels)
    assert bool(jnp.all(jnp.isfinite(logits)))
    print("KERNEL_OK")
</pallas_src>

<mosaic_0001>
module attributes {stable_mosaic.version = 11 : i64} {
  func.func @_fused_minilm_kernel(%arg0: i32, %arg1: memref<16x1xi32, #tpu.memory_space<vmem>>, %arg2: memref<2x8xi32, #tpu.memory_space<vmem>>, %arg3: memref<64x32xf32, #tpu.memory_space<vmem>>, %arg4: memref<16x32xf32, #tpu.memory_space<vmem>>, %arg5: memref<2x32xf32, #tpu.memory_space<vmem>>, %arg6: memref<1x32xf32, #tpu.memory_space<vmem>>, %arg7: memref<1x32xf32, #tpu.memory_space<vmem>>, %arg8: memref<2x4x32x8xbf16, #tpu.memory_space<vmem>>, %arg9: memref<2x4x1x8xf32, #tpu.memory_space<vmem>>, %arg10: memref<2x4x32x8xbf16, #tpu.memory_space<vmem>>, %arg11: memref<2x4x1x8xf32, #tpu.memory_space<vmem>>, %arg12: memref<2x4x32x8xbf16, #tpu.memory_space<vmem>>, %arg13: memref<2x4x1x8xf32, #tpu.memory_space<vmem>>, %arg14: memref<2x4x8x32xbf16, #tpu.memory_space<vmem>>, %arg15: memref<2x1x32xf32, #tpu.memory_space<vmem>>, %arg16: memref<2x1x32xf32, #tpu.memory_space<vmem>>, %arg17: memref<2x1x32xf32, #tpu.memory_space<vmem>>, %arg18: memref<2x32x64xbf16, #tpu.memory_space<vmem>>, %arg19: memref<2x1x64xf32, #tpu.memory_space<vmem>>, %arg20: memref<2x64x32xbf16, #tpu.memory_space<vmem>>, %arg21: memref<2x1x32xf32, #tpu.memory_space<vmem>>, %arg22: memref<2x1x32xf32, #tpu.memory_space<vmem>>, %arg23: memref<2x1x32xf32, #tpu.memory_space<vmem>>, %arg24: memref<32x32xbf16, #tpu.memory_space<vmem>>, %arg25: memref<1x32xf32, #tpu.memory_space<vmem>>, %arg26: memref<32x128xbf16, #tpu.memory_space<vmem>>, %arg27: memref<1x128xf32, #tpu.memory_space<vmem>>, %arg28: memref<2x128xf32, #tpu.memory_space<vmem>>) attributes {dimension_semantics = [#tpu.dimension_semantics<arbitrary>], iteration_bounds = array<i64: 1>, scalar_prefetch = 0 : i64, scratch_operands = 0 : i64, tpu.core_type = #tpu.core_type<tc>, window_params = [{pipeline_mode = #tpu.pipeline_mode<synchronous>, transform_indices = @transform_0, window_bounds = array<i64: 16, 1>}, {pipeline_mode = #tpu.pipeline_mode<synchronous>, transform_indices = @transform_1, window_bounds = array<i64: 2, 8>}, {pipeline_mode = #tpu.pipeline_mode<synchronous>, transform_indices = @transform_2, window_bounds = array<i64: 64, 32>}, {pipeline_mode = #tpu.pipeline_mode<synchronous>, transform_indices = @transform_3, window_bounds = array<i64: 16, 32>}, {pipeline_mode = #tpu.pipeline_mode<synchronous>, transform_indices = @transform_4, window_bounds = array<i64: 2, 32>}, {pipeline_mode = #tpu.pipeline_mode<synchronous>, transform_indices = @transform_5, window_bounds = array<i64: 1, 32>}, {pipeline_mode = #tpu.pipeline_mode<synchronous>, transform_indices = @transform_6, window_bounds = array<i64: 1, 32>}, {pipeline_mode = #tpu.pipeline_mode<synchronous>, transform_indices = @transform_7, window_bounds = array<i64: 2, 4, 32, 8>}, {pipeline_mode = #tpu.pipeline_mode<synchronous>, transform_indices = @transform_8, window_bounds = array<i64: 2, 4, 1, 8>}, {pipeline_mode = #tpu.pipeline_mode<synchronous>, transform_indices = @transform_9, window_bounds = array<i64: 2, 4, 32, 8>}, {pipeline_mode = #tpu.pipeline_mode<synchronous>, transform_indices = @transform_10, window_bounds = array<i64: 2, 4, 1, 8>}, {pipeline_mode = #tpu.pipeline_mode<synchronous>, transform_indices = @transform_11, window_bounds = array<i64: 2, 4, 32, 8>}, {pipeline_mode = #tpu.pipeline_mode<synchronous>, transform_indices = @transform_12, window_bounds = array<i64: 2, 4, 1, 8>}, {pipeline_mode = #tpu.pipeline_mode<synchronous>, transform_indices = @transform_13, window_bounds = array<i64: 2, 4, 8, 32>}, {pipeline_mode = #tpu.pipeline_mode<synchronous>, transform_indices = @transform_14, window_bounds = array<i64: 2, 1, 32>}, {pipeline_mode = #tpu.pipeline_mode<synchronous>, transform_indices = @transform_15, window_bounds = array<i64: 2, 1, 32>}, {pipeline_mode = #tpu.pipeline_mode<synchronous>, transform_indices = @transform_16, window_bounds = array<i64: 2, 1, 32>}, {pipeline_mode = #tpu.pipeline_mode<synchronous>, transform_indices = @transform_17, window_bounds = array<i64: 2, 32, 64>}, {pipeline_mode = #tpu.pipeline_mode<synchronous>, transform_indices = @transform_18, window_bounds = array<i64: 2, 1, 64>}, {pipeline_mode = #tpu.pipeline_mode<synchronous>, transform_indices = @transform_19, window_bounds = array<i64: 2, 64, 32>}, {pipeline_mode = #tpu.pipeline_mode<synchronous>, transform_indices = @transform_20, window_bounds = array<i64: 2, 1, 32>}, {pipeline_mode = #tpu.pipeline_mode<synchronous>, transform_indices = @transform_21, window_bounds = array<i64: 2, 1, 32>}, {pipeline_mode = #tpu.pipeline_mode<synchronous>, transform_indices = @transform_22, window_bounds = array<i64: 2, 1, 32>}, {pipeline_mode = #tpu.pipeline_mode<synchronous>, transform_indices = @transform_23, window_bounds = array<i64: 32, 32>}, {pipeline_mode = #tpu.pipeline_mode<synchronous>, transform_indices = @transform_24, window_bounds = array<i64: 1, 32>}, {pipeline_mode = #tpu.pipeline_mode<synchronous>, transform_indices = @transform_25, window_bounds = array<i64: 32, 128>}, {pipeline_mode = #tpu.pipeline_mode<synchronous>, transform_indices = @transform_26, window_bounds = array<i64: 1, 128>}, {pipeline_mode = #tpu.pipeline_mode<synchronous>, transform_indices = @transform_27, window_bounds = array<i64: 2, 128>}]} {
    %c0 = arith.constant 0 : index
    %c0_0 = arith.constant 0 : index
    %0 = vector.load %arg1[%c0, %c0_0] : memref<16x1xi32, #tpu.memory_space<vmem>>, vector<16x1xi32>
    %1 = tpu.iota {dimensions = array<i32: 1>} : vector<16x64xi32>
    %2 = vector.broadcast %0 : vector<16x1xi32> to vector<16x64xi32>
    %3 = arith.cmpi eq, %2, %1 : vector<16x64xi32>
    %4 = arith.extui %3 : vector<16x64xi1> to vector<16x64xi32>
    %5 = arith.sitofp %4 : vector<16x64xi32> to vector<16x64xf32>
    %c0_1 = arith.constant 0 : index
    %c0_2 = arith.constant 0 : index
    %6 = vector.load %arg3[%c0_1, %c0_2] : memref<64x32xf32, #tpu.memory_space<vmem>>, vector<64x32xf32>
    %cst = arith.constant dense<0.000000e+00> : vector<16x32xf32>
    %7 = tpu.matmul %5, %6, %cst {dimension_numbers = #tpu.dot_dimension_numbers<[1], [0], [0], [1], [0, 0, 1, 1], [], []>} : vector<16x64xf32>, vector<64x32xf32>, vector<16x32xf32> -> vector<16x32xf32>
    %c0_3 = arith.constant 0 : index
    %c0_4 = arith.constant 0 : index
    %8 = vector.load %arg4[%c0_3, %c0_4] : memref<16x32xf32, #tpu.memory_space<vmem>>, vector<8x32xf32>
    %c0_5 = arith.constant 0 : index
    %c0_6 = arith.constant 0 : index
    %9 = vector.load %arg5[%c0_5, %c0_6] : memref<2x32xf32, #tpu.memory_space<vmem>>, vector<1x32xf32>
    %10 = vector.broadcast %9 : vector<1x32xf32> to vector<8x32xf32>
    %11 = arith.addf %8, %10 : vector<8x32xf32>
    %12 = tpu.concatenate %11, %11 in 0 : vector<8x32xf32>, vector<8x32xf32> -> vector<16x32xf32>
    %13 = arith.addf %7, %12 : vector<16x32xf32>
    %c0_7 = arith.constant 0 : index
    %c0_8 = arith.constant 0 : index
    %14 = vector.load %arg6[%c0_7, %c0_8] : memref<1x32xf32, #tpu.memory_space<vmem>>, vector<1x32xf32>
    %c0_9 = arith.constant 0 : index
    %c0_10 = arith.constant 0 : index
    %15 = vector.load %arg7[%c0_9, %c0_10] : memref<1x32xf32, #tpu.memory_space<vmem>>, vector<1x32xf32>
    %cst_11 = arith.constant dense<0.000000e+00> : vector<16xf32>
    %16 = vector.multi_reduction <add>, %13, %cst_11 [1] : vector<16x32xf32> to vector<16xf32>
    %17 = vector.shape_cast %16 : vector<16xf32> to vector<16x1xf32>
    %cst_12 = arith.constant 3.200000e+01 : f32
    %18 = vector.broadcast %cst_12 : f32 to vector<16x1xf32>
    %19 = arith.divf %17, %18 : vector<16x1xf32>
    %20 = vector.broadcast %19 : vector<16x1xf32> to vector<16x32xf32>
    %21 = arith.subf %13, %20 : vector<16x32xf32>
    %22 = arith.mulf %21, %21 : vector<16x32xf32>
    %cst_13 = arith.constant dense<0.000000e+00> : vector<16xf32>
    %23 = vector.multi_reduction <add>, %22, %cst_13 [1] : vector<16x32xf32> to vector<16xf32>
    %24 = vector.shape_cast %23 : vector<16xf32> to vector<16x1xf32>
    %cst_14 = arith.constant 3.200000e+01 : f32
    %25 = vector.broadcast %cst_14 : f32 to vector<16x1xf32>
    %26 = arith.divf %24, %25 : vector<16x1xf32>
    %27 = vector.broadcast %19 : vector<16x1xf32> to vector<16x32xf32>
    %28 = arith.subf %13, %27 : vector<16x32xf32>
    %cst_15 = arith.constant 9.99999996E-13 : f32
    %29 = vector.broadcast %cst_15 : f32 to vector<16x1xf32>
    %30 = arith.addf %26, %29 : vector<16x1xf32>
    %31 = math.rsqrt %30 : vector<16x1xf32>
    %32 = vector.broadcast %31 : vector<16x1xf32> to vector<16x32xf32>
    %33 = arith.mulf %28, %32 : vector<16x32xf32>
    %34 = vector.broadcast %14 : vector<1x32xf32> to vector<16x32xf32>
    %35 = arith.mulf %33, %34 : vector<16x32xf32>
    %36 = vector.broadcast %15 : vector<1x32xf32> to vector<16x32xf32>
    %37 = arith.addf %35, %36 : vector<16x32xf32>
    %c0_16 = arith.constant 0 : index
    %c0_17 = arith.constant 0 : index
    %38 = vector.load %arg2[%c0_16, %c0_17] : memref<2x8xi32, #tpu.memory_space<vmem>>, vector<2x8xi32>
    %39 = arith.sitofp %38 : vector<2x8xi32> to vector<2x8xf32>
    %cst_18 = arith.constant 1.000000e+00 : f32
    %40 = vector.broadcast %cst_18 : f32 to vector<2x8xf32>
    %41 = arith.subf %40, %39 : vector<2x8xf32>
    %cst_19 = arith.constant -1.000000e+09 : f32
    %42 = vector.broadcast %cst_19 : f32 to vector<2x8xf32>
    %43 = arith.mulf %41, %42 : vector<2x8xf32>
    %44 = vector.extract_strided_slice %43 {offsets = [0, 0], sizes = [1, 8], strides = [1, 1]} : vector<2x8xf32> to vector<1x8xf32>
    %45 = vector.extract_strided_slice %43 {offsets = [1, 0], sizes = [1, 8], strides = [1, 1]} : vector<2x8xf32> to vector<1x8xf32>
    %cst_20 = arith.constant 0.000000e+00 : f32
    %46 = vector.broadcast %cst_20 : f32 to vector<16x32xf32>
    %c0_21 = arith.constant 0 : index
    %c0_22 = arith.constant 0 : index
    %c0_23 = arith.constant 0 : index
    %c0_24 = arith.constant 0 : index
    %47 = vector.load %arg8[%c0_21, %c0_22, %c0_23, %c0_24] : memref<2x4x32x8xbf16, #tpu.memory_space<vmem>>, vector<1x1x32x8xbf16>
    %48 = vector.shape_cast %47 : vector<1x1x32x8xbf16> to vector<32x8xbf16>
    %c0_25 = arith.constant 0 : index
    %c0_26 = arith.constant 0 : index
    %c0_27 = arith.constant 0 : index
    %c0_28 = arith.constant 0 : index
    %49 = vector.load %arg9[%c0_25, %c0_26, %c0_27, %c0_28] : memref<2x4x1x8xf32, #tpu.memory_space<vmem>>, vector<1x1x1x8xf32>
    %50 = vector.shape_cast %49 : vector<1x1x1x8xf32> to vector<1x8xf32>
    %51 = arith.truncf %37 : vector<16x32xf32> to vector<16x32xbf16>
    %cst_29 = arith.constant dense<0.000000e+00> : vector<16x8xf32>
    %52 = tpu.matmul %51, %48, %cst_29 {dimension_numbers = #tpu.dot_dimension_numbers<[1], [0], [0], [1], [0, 0, 1, 1], [], []>} : vector<16x32xbf16>, vector<32x8xbf16>, vector<16x8xf32> -> vector<16x8xf32>
    %53 = vector.broadcast %50 : vector<1x8xf32> to vector<16x8xf32>
    %54 = arith.addf %52, %53 : vector<16x8xf32>
    %c0_30 = arith.constant 0 : index
    %c0_31 = arith.constant 0 : index
    %c0_32 = arith.constant 0 : index
    %c0_33 = arith.constant 0 : index
    %55 = vector.load %arg10[%c0_30, %c0_31, %c0_32, %c0_33] : memref<2x4x32x8xbf16, #tpu.memory_space<vmem>>, vector<1x1x32x8xbf16>
    %56 = vector.shape_cast %55 : vector<1x1x32x8xbf16> to vector<32x8xbf16>
    %c0_34 = arith.constant 0 : index
    %c0_35 = arith.constant 0 : index
    %c0_36 = arith.constant 0 : index
    %c0_37 = arith.constant 0 : index
    %57 = vector.load %arg11[%c0_34, %c0_35, %c0_36, %c0_37] : memref<2x4x1x8xf32, #tpu.memory_space<vmem>>, vector<1x1x1x8xf32>
    %58 = vector.shape_cast %57 : vector<1x1x1x8xf32> to vector<1x8xf32>
    %59 = arith.truncf %37 : vector<16x32xf32> to vector<16x32xbf16>
    %cst_38 = arith.constant dense<0.000000e+00> : vector<16x8xf32>
    %60 = tpu.matmul %59, %56, %cst_38 {dimension_numbers = #tpu.dot_dimension_numbers<[1], [0], [0], [1], [0, 0, 1, 1], [], []>} : vector<16x32xbf16>, vector<32x8xbf16>, vector<16x8xf32> -> vector<16x8xf32>
    %61 = vector.broadcast %58 : vector<1x8xf32> to vector<16x8xf32>
    %62 = arith.addf %60, %61 : vector<16x8xf32>
    %c0_39 = arith.constant 0 : index
    %c0_40 = arith.constant 0 : index
    %c0_41 = arith.constant 0 : index
    %c0_42 = arith.constant 0 : index
    %63 = vector.load %arg12[%c0_39, %c0_40, %c0_41, %c0_42] : memref<2x4x32x8xbf16, #tpu.memory_space<vmem>>, vector<1x1x32x8xbf16>
    %64 = vector.shape_cast %63 : vector<1x1x32x8xbf16> to vector<32x8xbf16>
    %c0_43 = arith.constant 0 : index
    %c0_44 = arith.constant 0 : index
    %c0_45 = arith.constant 0 : index
    %c0_46 = arith.constant 0 : index
    %65 = vector.load %arg13[%c0_43, %c0_44, %c0_45, %c0_46] : memref<2x4x1x8xf32, #tpu.memory_space<vmem>>, vector<1x1x1x8xf32>
    %66 = vector.shape_cast %65 : vector<1x1x1x8xf32> to vector<1x8xf32>
    %67 = arith.truncf %37 : vector<16x32xf32> to vector<16x32xbf16>
    %cst_47 = arith.constant dense<0.000000e+00> : vector<16x8xf32>
    %68 = tpu.matmul %67, %64, %cst_47 {dimension_numbers = #tpu.dot_dimension_numbers<[1], [0], [0], [1], [0, 0, 1, 1], [], []>} : vector<16x32xbf16>, vector<32x8xbf16>, vector<16x8xf32> -> vector<16x8xf32>
    %69 = vector.broadcast %66 : vector<1x8xf32> to vector<16x8xf32>
    %70 = arith.addf %68, %69 : vector<16x8xf32>
    %71 = vector.extract_strided_slice %54 {offsets = [0, 0], sizes = [8, 8], strides = [1, 1]} : vector<16x8xf32> to vector<8x8xf32>
    %72 = vector.extract_strided_slice %62 {offsets = [0, 0], sizes = [8, 8], strides = [1, 1]} : vector<16x8xf32> to vector<8x8xf32>
    %73 = vector.extract_strided_slice %70 {offsets = [0, 0], sizes = [8, 8], strides = [1, 1]} : vector<16x8xf32> to vector<8x8xf32>
    %cst_48 = arith.constant dense<0.000000e+00> : vector<8x8xf32>
    %74 = tpu.matmul %71, %72, %cst_48 {dimension_numbers = #tpu.dot_dimension_numbers<[1], [1], [0], [0], [0, 0, 1, 0], [], []>} : vector<8x8xf32>, vector<8x8xf32>, vector<8x8xf32> -> vector<8x8xf32>
    %75 = vector.broadcast %44 : vector<1x8xf32> to vector<8x8xf32>
    %76 = arith.addf %74, %75 : vector<8x8xf32>
    %cst_49 = arith.constant dense<0xFF800000> : vector<8xf32>
    %77 = vector.multi_reduction <maximumf>, %76, %cst_49 [1] : vector<8x8xf32> to vector<8xf32>
    %78 = vector.shape_cast %77 : vector<8xf32> to vector<8x1xf32>
    %79 = vector.broadcast %78 : vector<8x1xf32> to vector<8x8xf32>
    %80 = arith.subf %76, %79 : vector<8x8xf32>
    %81 = math.exp %80 : vector<8x8xf32>
    %cst_50 = arith.constant dense<0.000000e+00> : vector<8xf32>
    %82 = vector.multi_reduction <add>, %81, %cst_50 [1] : vector<8x8xf32> to vector<8xf32>
    %83 = vector.shape_cast %82 : vector<8xf32> to vector<8x1xf32>
    %84 = tpu.reciprocal %83 {approx = true} : vector<8x1xf32> -> vector<8x1xf32>
    %85 = vector.broadcast %84 : vector<8x1xf32> to vector<8x8xf32>
    %86 = arith.mulf %81, %85 : vector<8x8xf32>
    %cst_51 = arith.constant dense<0.000000e+00> : vector<8x8xf32>
    %87 = tpu.matmul %86, %73, %cst_51 {dimension_numbers = #tpu.dot_dimension_numbers<[1], [0], [0], [1], [0, 0, 1, 1], [], []>} : vector<8x8xf32>, vector<8x8xf32>, vector<8x8xf32> -> vector<8x8xf32>
    %88 = vector.extract_strided_slice %54 {offsets = [8, 0], sizes = [8, 8], strides = [1, 1]} : vector<16x8xf32> to vector<8x8xf32>
    %89 = vector.extract_strided_slice %62 {offsets = [8, 0], sizes = [8, 8], strides = [1, 1]} : vector<16x8xf32> to vector<8x8xf32>
    %90 = vector.extract_strided_slice %70 {offsets = [8, 0], sizes = [8, 8], strides = [1, 1]} : vector<16x8xf32> to vector<8x8xf32>
    %cst_52 = arith.constant dense<0.000000e+00> : vector<8x8xf32>
    %91 = tpu.matmul %88, %89, %cst_52 {dimension_numbers = #tpu.dot_dimension_numbers<[1], [1], [0], [0], [0, 0, 1, 0], [], []>} : vector<8x8xf32>, vector<8x8xf32>, vector<8x8xf32> -> vector<8x8xf32>
    %92 = vector.broadcast %45 : vector<1x8xf32> to vector<8x8xf32>
    %93 = arith.addf %91, %92 : vector<8x8xf32>
    %cst_53 = arith.constant dense<0xFF800000> : vector<8xf32>
    %94 = vector.multi_reduction <maximumf>, %93, %cst_53 [1] : vector<8x8xf32> to vector<8xf32>
    %95 = vector.shape_cast %94 : vector<8xf32> to vector<8x1xf32>
    %96 = vector.broadcast %95 : vector<8x1xf32> to vector<8x8xf32>
    %97 = arith.subf %93, %96 : vector<8x8xf32>
    %98 = math.exp %97 : vector<8x8xf32>
    %cst_54 = arith.constant dense<0.000000e+00> : vector<8xf32>
    %99 = vector.multi_reduction <add>, %98, %cst_54 [1] : vector<8x8xf32> to vector<8xf32>
    %100 = vector.shape_cast %99 : vector<8xf32> to vector<8x1xf32>
    %101 = tpu.reciprocal %100 {approx = true} : vector<8x1xf32> -> vector<8x1xf32>
    %102 = vector.broadcast %101 : vector<8x1xf32> to vector<8x8xf32>
    %103 = arith.mulf %98, %102 : vector<8x8xf32>
    %cst_55 = arith.constant dense<0.000000e+00> : vector<8x8xf32>
    %104 = tpu.matmul %103, %90, %cst_55 {dimension_numbers = #tpu.dot_dimension_numbers<[1], [0], [0], [1], [0, 0, 1, 1], [], []>} : vector<8x8xf32>, vector<8x8xf32>, vector<8x8xf32> -> vector<8x8xf32>
    %105 = tpu.concatenate %87, %104 in 0 : vector<8x8xf32>, vector<8x8xf32> -> vector<16x8xf32>
    %106 = arith.truncf %105 : vector<16x8xf32> to vector<16x8xbf16>
    %c0_56 = arith.constant 0 : index
    %c0_57 = arith.constant 0 : index
    %c0_58 = arith.constant 0 : index
    %c0_59 = arith.constant 0 : index
    %107 = vector.load %arg14[%c0_56, %c0_57, %c0_58, %c0_59] : memref<2x4x8x32xbf16, #tpu.memory_space<vmem>>, vector<1x1x8x32xbf16>
    %108 = vector.shape_cast %107 : vector<1x1x8x32xbf16> to vector<8x32xbf16>
    %cst_60 = arith.constant dense<0.000000e+00> : vector<16x32xf32>
    %109 = tpu.matmul %106, %108, %cst_60 {dimension_numbers = #tpu.dot_dimension_numbers<[1], [0], [0], [1], [0, 0, 1, 1], [], []>} : vector<16x8xbf16>, vector<8x32xbf16>, vector<16x32xf32> -> vector<16x32xf32>
    %110 = arith.addf %46, %109 : vector<16x32xf32>
    %c0_61 = arith.constant 0 : index
    %c1 = arith.constant 1 : index
    %c0_62 = arith.constant 0 : index
    %c0_63 = arith.constant 0 : index
    %111 = vector.load %arg8[%c0_61, %c1, %c0_62, %c0_63] : memref<2x4x32x8xbf16, #tpu.memory_space<vmem>>, vector<1x1x32x8xbf16>
    %112 = vector.shape_cast %111 : vector<1x1x32x8xbf16> to vector<32x8xbf16>
    %c0_64 = arith.constant 0 : index
    %c1_65 = arith.constant 1 : index
    %c0_66 = arith.constant 0 : index
    %c0_67 = arith.constant 0 : index
    %113 = vector.load %arg9[%c0_64, %c1_65, %c0_66, %c0_67] : memref<2x4x1x8xf32, #tpu.memory_space<vmem>>, vector<1x1x1x8xf32>
    %114 = vector.shape_cast %113 : vector<1x1x1x8xf32> to vector<1x8xf32>
    %115 = arith.truncf %37 : vector<16x32xf32> to vector<16x32xbf16>
    %cst_68 = arith.constant dense<0.000000e+00> : vector<16x8xf32>
    %116 = tpu.matmul %115, %112, %cst_68 {dimension_numbers = #tpu.dot_dimension_numbers<[1], [0], [0], [1], [0, 0, 1, 1], [], []>} : vector<16x32xbf16>, vector<32x8xbf16>, vector<16x8xf32> -> vector<16x8xf32>
    %117 = vector.broadcast %114 : vector<1x8xf32> to vector<16x8xf32>
    %118 = arith.addf %116, %117 : vector<16x8xf32>
    %c0_69 = arith.constant 0 : index
    %c1_70 = arith.constant 1 : index
    %c0_71 = arith.constant 0 : index
    %c0_72 = arith.constant 0 : index
    %119 = vector.load %arg10[%c0_69, %c1_70, %c0_71, %c0_72] : memref<2x4x32x8xbf16, #tpu.memory_space<vmem>>, vector<1x1x32x8xbf16>
    %120 = vector.shape_cast %119 : vector<1x1x32x8xbf16> to vector<32x8xbf16>
    %c0_73 = arith.constant 0 : index
    %c1_74 = arith.constant 1 : index
    %c0_75 = arith.constant 0 : index
    %c0_76 = arith.constant 0 : index
    %121 = vector.load %arg11[%c0_73, %c1_74, %c0_75, %c0_76] : memref<2x4x1x8xf32, #tpu.memory_space<vmem>>, vector<1x1x1x8xf32>
    %122 = vector.shape_cast %121 : vector<1x1x1x8xf32> to vector<1x8xf32>
    %123 = arith.truncf %37 : vector<16x32xf32> to vector<16x32xbf16>
    %cst_77 = arith.constant dense<0.000000e+00> : vector<16x8xf32>
    %124 = tpu.matmul %123, %120, %cst_77 {dimension_numbers = #tpu.dot_dimension_numbers<[1], [0], [0], [1], [0, 0, 1, 1], [], []>} : vector<16x32xbf16>, vector<32x8xbf16>, vector<16x8xf32> -> vector<16x8xf32>
    %125 = vector.broadcast %122 : vector<1x8xf32> to vector<16x8xf32>
    %126 = arith.addf %124, %125 : vector<16x8xf32>
    %c0_78 = arith.constant 0 : index
    %c1_79 = arith.constant 1 : index
    %c0_80 = arith.constant 0 : index
    %c0_81 = arith.constant 0 : index
    %127 = vector.load %arg12[%c0_78, %c1_79, %c0_80, %c0_81] : memref<2x4x32x8xbf16, #tpu.memory_space<vmem>>, vector<1x1x32x8xbf16>
    %128 = vector.shape_cast %127 : vector<1x1x32x8xbf16> to vector<32x8xbf16>
    %c0_82 = arith.constant 0 : index
    %c1_83 = arith.constant 1 : index
    %c0_84 = arith.constant 0 : index
    %c0_85 = arith.constant 0 : index
    %129 = vector.load %arg13[%c0_82, %c1_83, %c0_84, %c0_85] : memref<2x4x1x8xf32, #tpu.memory_space<vmem>>, vector<1x1x1x8xf32>
    %130 = vector.shape_cast %129 : vector<1x1x1x8xf32> to vector<1x8xf32>
    %131 = arith.truncf %37 : vector<16x32xf32> to vector<16x32xbf16>
    %cst_86 = arith.constant dense<0.000000e+00> : vector<16x8xf32>
    %132 = tpu.matmul %131, %128, %cst_86 {dimension_numbers = #tpu.dot_dimension_numbers<[1], [0], [0], [1], [0, 0, 1, 1], [], []>} : vector<16x32xbf16>, vector<32x8xbf16>, vector<16x8xf32> -> vector<16x8xf32>
    %133 = vector.broadcast %130 : vector<1x8xf32> to vector<16x8xf32>
    %134 = arith.addf %132, %133 : vector<16x8xf32>
    %135 = vector.extract_strided_slice %118 {offsets = [0, 0], sizes = [8, 8], strides = [1, 1]} : vector<16x8xf32> to vector<8x8xf32>
    %136 = vector.extract_strided_slice %126 {offsets = [0, 0], sizes = [8, 8], strides = [1, 1]} : vector<16x8xf32> to vector<8x8xf32>
    %137 = vector.extract_strided_slice %134 {offsets = [0, 0], sizes = [8, 8], strides = [1, 1]} : vector<16x8xf32> to vector<8x8xf32>
    %cst_87 = arith.constant dense<0.000000e+00> : vector<8x8xf32>
    %138 = tpu.matmul %135, %136, %cst_87 {dimension_numbers = #tpu.dot_dimension_numbers<[1], [1], [0], [0], [0, 0, 1, 0], [], []>} : vector<8x8xf32>, vector<8x8xf32>, vector<8x8xf32> -> vector<8x8xf32>
    %139 = vector.broadcast %44 : vector<1x8xf32> to vector<8x8xf32>
    %140 = arith.addf %138, %139 : vector<8x8xf32>
    %cst_88 = arith.constant dense<0xFF800000> : vector<8xf32>
    %141 = vector.multi_reduction <maximumf>, %140, %cst_88 [1] : vector<8x8xf32> to vector<8xf32>
    %142 = vector.shape_cast %141 : vector<8xf32> to vector<8x1xf32>
    %143 = vector.broadcast %142 : vector<8x1xf32> to vector<8x8xf32>
    %144 = arith.subf %140, %143 : vector<8x8xf32>
    %145 = math.exp %144 : vector<8x8xf32>
    %cst_89 = arith.constant dense<0.000000e+00> : vector<8xf32>
    %146 = vector.multi_reduction <add>, %145, %cst_89 [1] : vector<8x8xf32> to vector<8xf32>
    %147 = vector.shape_cast %146 : vector<8xf32> to vector<8x1xf32>
    %148 = tpu.reciprocal %147 {approx = true} : vector<8x1xf32> -> vector<8x1xf32>
    %149 = vector.broadcast %148 : vector<8x1xf32> to vector<8x8xf32>
    %150 = arith.mulf %145, %149 : vector<8x8xf32>
    %cst_90 = arith.constant dense<0.000000e+00> : vector<8x8xf32>
    %151 = tpu.matmul %150, %137, %cst_90 {dimension_numbers = #tpu.dot_dimension_numbers<[1], [0], [0], [1], [0, 0, 1, 1], [], []>} : vector<8x8xf32>, vector<8x8xf32>, vector<8x8xf32> -> vector<8x8xf32>
    %152 = vector.extract_strided_slice %118 {offsets = [8, 0], sizes = [8, 8], strides = [1, 1]} : vector<16x8xf32> to vector<8x8xf32>
    %153 = vector.extract_strided_slice %126 {offsets = [8, 0], sizes = [8, 8], strides = [1, 1]} : vector<16x8xf32> to vector<8x8xf32>
    %154 = vector.extract_strided_slice %134 {offsets = [8, 0], sizes = [8, 8], strides = [1, 1]} : vector<16x8xf32> to vector<8x8xf32>
    %cst_91 = arith.constant dense<0.000000e+00> : vector<8x8xf32>
    %155 = tpu.matmul %152, %153, %cst_91 {dimension_numbers = #tpu.dot_dimension_numbers<[1], [1], [0], [0], [0, 0, 1, 0], [], []>} : vector<8x8xf32>, vector<8x8xf32>, vector<8x8xf32> -> vector<8x8xf32>
    %156 = vector.broadcast %45 : vector<1x8xf32> to vector<8x8xf32>
    %157 = arith.addf %155, %156 : vector<8x8xf32>
    %cst_92 = arith.constant dense<0xFF800000> : vector<8xf32>
    %158 = vector.multi_reduction <maximumf>, %157, %cst_92 [1] : vector<8x8xf32> to vector<8xf32>
    %159 = vector.shape_cast %158 : vector<8xf32> to vector<8x1xf32>
    %160 = vector.broadcast %159 : vector<8x1xf32> to vector<8x8xf32>
    %161 = arith.subf %157, %160 : vector<8x8xf32>
    %162 = math.exp %161 : vector<8x8xf32>
    %cst_93 = arith.constant dense<0.000000e+00> : vector<8xf32>
    %163 = vector.multi_reduction <add>, %162, %cst_93 [1] : vector<8x8xf32> to vector<8xf32>
    %164 = vector.shape_cast %163 : vector<8xf32> to vector<8x1xf32>
    %165 = tpu.reciprocal %164 {approx = true} : vector<8x1xf32> -> vector<8x1xf32>
    %166 = vector.broadcast %165 : vector<8x1xf32> to vector<8x8xf32>
    %167 = arith.mulf %162, %166 : vector<8x8xf32>
    %cst_94 = arith.constant dense<0.000000e+00> : vector<8x8xf32>
    %168 = tpu.matmul %167, %154, %cst_94 {dimension_numbers = #tpu.dot_dimension_numbers<[1], [0], [0], [1], [0, 0, 1, 1], [], []>} : vector<8x8xf32>, vector<8x8xf32>, vector<8x8xf32> -> vector<8x8xf32>
    %169 = tpu.concatenate %151, %168 in 0 : vector<8x8xf32>, vector<8x8xf32> -> vector<16x8xf32>
    %170 = arith.truncf %169 : vector<16x8xf32> to vector<16x8xbf16>
    %c0_95 = arith.constant 0 : index
    %c1_96 = arith.constant 1 : index
    %c0_97 = arith.constant 0 : index
    %c0_98 = arith.constant 0 : index
    %171 = vector.load %arg14[%c0_95, %c1_96, %c0_97, %c0_98] : memref<2x4x8x32xbf16, #tpu.memory_space<vmem>>, vector<1x1x8x32xbf16>
    %172 = vector.shape_cast %171 : vector<1x1x8x32xbf16> to vector<8x32xbf16>
    %cst_99 = arith.constant dense<0.000000e+00> : vector<16x32xf32>
    %173 = tpu.matmul %170, %172, %cst_99 {dimension_numbers = #tpu.dot_dimension_numbers<[1], [0], [0], [1], [0, 0, 1, 1], [], []>} : vector<16x8xbf16>, vector<8x32xbf16>, vector<16x32xf32> -> vector<16x32xf32>
    %174 = arith.addf %110, %173 : vector<16x32xf32>
    %c0_100 = arith.constant 0 : index
    %c2 = arith.constant 2 : index
    %c0_101 = arith.constant 0 : index
    %c0_102 = arith.constant 0 : index
    %175 = vector.load %arg8[%c0_100, %c2, %c0_101, %c0_102] : memref<2x4x32x8xbf16, #tpu.memory_space<vmem>>, vector<1x1x32x8xbf16>
    %176 = vector.shape_cast %175 : vector<1x1x32x8xbf16> to vector<32x8xbf16>
    %c0_103 = arith.constant 0 : index
    %c2_104 = arith.constant 2 : index
    %c0_105 = arith.constant 0 : index
    %c0_106 = arith.constant 0 : index
    %177 = vector.load %arg9[%c0_103, %c2_104, %c0_105, %c0_106] : memref<2x4x1x8xf32, #tpu.memory_space<vmem>>, vector<1x1x1x8xf32>
    %178 = vector.shape_cast %177 : vector<1x1x1x8xf32> to vector<1x8xf32>
    %179 = arith.truncf %37 : vector<16x32xf32> to vector<16x32xbf16>
    %cst_107 = arith.constant dense<0.000000e+00> : vector<16x8xf32>
    %180 = tpu.matmul %179, %176, %cst_107 {dimension_numbers = #tpu.dot_dimension_numbers<[1], [0], [0], [1], [0, 0, 1, 1], [], []>} : vector<16x32xbf16>, vector<32x8xbf16>, vector<16x8xf32> -> vector<16x8xf32>
    %181 = vector.broadcast %178 : vector<1x8xf32> to vector<16x8xf32>
    %182 = arith.addf %180, %181 : vector<16x8xf32>
    %c0_108 = arith.constant 0 : index
    %c2_109 = arith.constant 2 : index
    %c0_110 = arith.constant 0 : index
    %c0_111 = arith.constant 0 : index
    %183 = vector.load %arg10[%c0_108, %c2_109, %c0_110, %c0_111] : memref<2x4x32x8xbf16, #tpu.memory_space<vmem>>, vector<1x1x32x8xbf16>
    %184 = vector.shape_cast %183 : vector<1x1x32x8xbf16> to vector<32x8xbf16>
    %c0_112 = arith.constant 0 : index
    %c2_113 = arith.constant 2 : index
    %c0_114 = arith.constant 0 : index
    %c0_115 = arith.constant 0 : index
    %185 = vector.load %arg11[%c0_112, %c2_113, %c0_114, %c0_115] : memref<2x4x1x8xf32, #tpu.memory_space<vmem>>, vector<1x1x1x8xf32>
    %186 = vector.shape_cast %185 : vector<1x1x1x8xf32> to vector<1x8xf32>
    %187 = arith.truncf %37 : vector<16x32xf32> to vector<16x32xbf16>
    %cst_116 = arith.constant dense<0.000000e+00> : vector<16x8xf32>
    %188 = tpu.matmul %187, %184, %cst_116 {dimension_numbers = #tpu.dot_dimension_numbers<[1], [0], [0], [1], [0, 0, 1, 1], [], []>} : vector<16x32xbf16>, vector<32x8xbf16>, vector<16x8xf32> -> vector<16x8xf32>
    %189 = vector.broadcast %186 : vector<1x8xf32> to vector<16x8xf32>
    %190 = arith.addf %188, %189 : vector<16x8xf32>
    %c0_117 = arith.constant 0 : index
    %c2_118 = arith.constant 2 : index
    %c0_119 = arith.constant 0 : index
    %c0_120 = arith.constant 0 : index
    %191 = vector.load %arg12[%c0_117, %c2_118, %c0_119, %c0_120] : memref<2x4x32x8xbf16, #tpu.memory_space<vmem>>, vector<1x1x32x8xbf16>
    %192 = vector.shape_cast %191 : vector<1x1x32x8xbf16> to vector<32x8xbf16>
    %c0_121 = arith.constant 0 : index
    %c2_122 = arith.constant 2 : index
    %c0_123 = arith.constant 0 : index
    %c0_124 = arith.constant 0 : index
    %193 = vector.load %arg13[%c0_121, %c2_122, %c0_123, %c0_124] : memref<2x4x1x8xf32, #tpu.memory_space<vmem>>, vector<1x1x1x8xf32>
    %194 = vector.shape_cast %193 : vector<1x1x1x8xf32> to vector<1x8xf32>
    %195 = arith.truncf %37 : vector<16x32xf32> to vector<16x32xbf16>
    %cst_125 = arith.constant dense<0.000000e+00> : vector<16x8xf32>
    %196 = tpu.matmul %195, %192, %cst_125 {dimension_numbers = #tpu.dot_dimension_numbers<[1], [0], [0], [1], [0, 0, 1, 1], [], []>} : vector<16x32xbf16>, vector<32x8xbf16>, vector<16x8xf32> -> vector<16x8xf32>
    %197 = vector.broadcast %194 : vector<1x8xf32> to vector<16x8xf32>
    %198 = arith.addf %196, %197 : vector<16x8xf32>
    %199 = vector.extract_strided_slice %182 {offsets = [0, 0], sizes = [8, 8], strides = [1, 1]} : vector<16x8xf32> to vector<8x8xf32>
    %200 = vector.extract_strided_slice %190 {offsets = [0, 0], sizes = [8, 8], strides = [1, 1]} : vector<16x8xf32> to vector<8x8xf32>
    %201 = vector.extract_strided_slice %198 {offsets = [0, 0], sizes = [8, 8], strides = [1, 1]} : vector<16x8xf32> to vector<8x8xf32>
    %cst_126 = arith.constant dense<0.000000e+00> : vector<8x8xf32>
    %202 = tpu.matmul %199, %200, %cst_126 {dimension_numbers = #tpu.dot_dimension_numbers<[1], [1], [0], [0], [0, 0, 1, 0], [], []>} : vector<8x8xf32>, vector<8x8xf32>, vector<8x8xf32> -> vector<8x8xf32>
    %203 = vector.broadcast %44 : vector<1x8xf32> to vector<8x8xf32>
    %204 = arith.addf %202, %203 : vector<8x8xf32>
    %cst_127 = arith.constant dense<0xFF800000> : vector<8xf32>
    %205 = vector.multi_reduction <maximumf>, %204, %cst_127 [1] : vector<8x8xf32> to vector<8xf32>
    %206 = vector.shape_cast %205 : vector<8xf32> to vector<8x1xf32>
    %207 = vector.broadcast %206 : vector<8x1xf32> to vector<8x8xf32>
    %208 = arith.subf %204, %207 : vector<8x8xf32>
    %209 = math.exp %208 : vector<8x8xf32>
    %cst_128 = arith.constant dense<0.000000e+00> : vector<8xf32>
    %210 = vector.multi_reduction <add>, %209, %cst_128 [1] : vector<8x8xf32> to vector<8xf32>
    %211 = vector.shape_cast %210 : vector<8xf32> to vector<8x1xf32>
    %212 = tpu.reciprocal %211 {approx = true} : vector<8x1xf32> -> vector<8x1xf32>
    %213 = vector.broadcast %212 : vector<8x1xf32> to vector<8x8xf32>
    %214 = arith.mulf %209, %213 : vector<8x8xf32>
    %cst_129 = arith.constant dense<0.000000e+00> : vector<8x8xf32>
    %215 = tpu.matmul %214, %201, %cst_129 {dimension_numbers = #tpu.dot_dimension_numbers<[1], [0], [0], [1], [0, 0, 1, 1], [], []>} : vector<8x8xf32>, vector<8x8xf32>, vector<8x8xf32> -> vector<8x8xf32>
    %216 = vector.extract_strided_slice %182 {offsets = [8, 0], sizes = [8, 8], strides = [1, 1]} : vector<16x8xf32> to vector<8x8xf32>
    %217 = vector.extract_strided_slice %190 {offsets = [8, 0], sizes = [8, 8], strides = [1, 1]} : vector<16x8xf32> to vector<8x8xf32>
    %218 = vector.extract_strided_slice %198 {offsets = [8, 0], sizes = [8, 8], strides = [1, 1]} : vector<16x8xf32> to vector<8x8xf32>
    %cst_130 = arith.constant dense<0.000000e+00> : vector<8x8xf32>
    %219 = tpu.matmul %216, %217, %cst_130 {dimension_numbers = #tpu.dot_dimension_numbers<[1], [1], [0], [0], [0, 0, 1, 0], [], []>} : vector<8x8xf32>, vector<8x8xf32>, vector<8x8xf32> -> vector<8x8xf32>
    %220 = vector.broadcast %45 : vector<1x8xf32> to vector<8x8xf32>
    %221 = arith.addf %219, %220 : vector<8x8xf32>
    %cst_131 = arith.constant dense<0xFF800000> : vector<8xf32>
    %222 = vector.multi_reduction <maximumf>, %221, %cst_131 [1] : vector<8x8xf32> to vector<8xf32>
    %223 = vector.shape_cast %222 : vector<8xf32> to vector<8x1xf32>
    %224 = vector.broadcast %223 : vector<8x1xf32> to vector<8x8xf32>
    %225 = arith.subf %221, %224 : vector<8x8xf32>
    %226 = math.exp %225 : vector<8x8xf32>
    %cst_132 = arith.constant dense<0.000000e+00> : vector<8xf32>
    %227 = vector.multi_reduction <add>, %226, %cst_132 [1] : vector<8x8xf32> to vector<8xf32>
    %228 = vector.shape_cast %227 : vector<8xf32> to vector<8x1xf32>
    %229 = tpu.reciprocal %228 {approx = true} : vector<8x1xf32> -> vector<8x1xf32>
    %230 = vector.broadcast %229 : vector<8x1xf32> to vector<8x8xf32>
    %231 = arith.mulf %226, %230 : vector<8x8xf32>
    %cst_133 = arith.constant dense<0.000000e+00> : vector<8x8xf32>
    %232 = tpu.matmul %231, %218, %cst_133 {dimension_numbers = #tpu.dot_dimension_numbers<[1], [0], [0], [1], [0, 0, 1, 1], [], []>} : vector<8x8xf32>, vector<8x8xf32>, vector<8x8xf32> -> vector<8x8xf32>
    %233 = tpu.concatenate %215, %232 in 0 : vector<8x8xf32>, vector<8x8xf32> -> vector<16x8xf32>
    %234 = arith.truncf %233 : vector<16x8xf32> to vector<16x8xbf16>
    %c0_134 = arith.constant 0 : index
    %c2_135 = arith.constant 2 : index
    %c0_136 = arith.constant 0 : index
    %c0_137 = arith.constant 0 : index
    %235 = vector.load %arg14[%c0_134, %c2_135, %c0_136, %c0_137] : memref<2x4x8x32xbf16, #tpu.memory_space<vmem>>, vector<1x1x8x32xbf16>
    %236 = vector.shape_cast %235 : vector<1x1x8x32xbf16> to vector<8x32xbf16>
    %cst_138 = arith.constant dense<0.000000e+00> : vector<16x32xf32>
    %237 = tpu.matmul %234, %236, %cst_138 {dimension_numbers = #tpu.dot_dimension_numbers<[1], [0], [0], [1], [0, 0, 1, 1], [], []>} : vector<16x8xbf16>, vector<8x32xbf16>, vector<16x32xf32> -> vector<16x32xf32>
    %238 = arith.addf %174, %237 : vector<16x32xf32>
    %c0_139 = arith.constant 0 : index
    %c3 = arith.constant 3 : index
    %c0_140 = arith.constant 0 : index
    %c0_141 = arith.constant 0 : index
    %239 = vector.load %arg8[%c0_139, %c3, %c0_140, %c0_141] : memref<2x4x32x8xbf16, #tpu.memory_space<vmem>>, vector<1x1x32x8xbf16>
    %240 = vector.shape_cast %239 : vector<1x1x32x8xbf16> to vector<32x8xbf16>
    %c0_142 = arith.constant 0 : index
    %c3_143 = arith.constant 3 : index
    %c0_144 = arith.constant 0 : index
    %c0_145 = arith.constant 0 : index
    %241 = vector.load %arg9[%c0_142, %c3_143, %c0_144, %c0_145] : memref<2x4x1x8xf32, #tpu.memory_space<vmem>>, vector<1x1x1x8xf32>
    %242 = vector.shape_cast %241 : vector<1x1x1x8xf32> to vector<1x8xf32>
    %243 = arith.truncf %37 : vector<16x32xf32> to vector<16x32xbf16>
    %cst_146 = arith.constant dense<0.000000e+00> : vector<16x8xf32>
    %244 = tpu.matmul %243, %240, %cst_146 {dimension_numbers = #tpu.dot_dimension_numbers<[1], [0], [0], [1], [0, 0, 1, 1], [], []>} : vector<16x32xbf16>, vector<32x8xbf16>, vector<16x8xf32> -> vector<16x8xf32>
    %245 = vector.broadcast %242 : vector<1x8xf32> to vector<16x8xf32>
    %246 = arith.addf %244, %245 : vector<16x8xf32>
    %c0_147 = arith.constant 0 : index
    %c3_148 = arith.constant 3 : index
    %c0_149 = arith.constant 0 : index
    %c0_150 = arith.constant 0 : index
    %247 = vector.load %arg10[%c0_147, %c3_148, %c0_149, %c0_150] : memref<2x4x32x8xbf16, #tpu.memory_space<vmem>>, vector<1x1x32x8xbf16>
    %248 = vector.shape_cast %247 : vector<1x1x32x8xbf16> to vector<32x8xbf16>
    %c0_151 = arith.constant 0 : index
    %c3_152 = arith.constant 3 : index
    %c0_153 = arith.constant 0 : index
    %c0_154 = arith.constant 0 : index
    %249 = vector.load %arg11[%c0_151, %c3_152, %c0_153, %c0_154] : memref<2x4x1x8xf32, #tpu.memory_space<vmem>>, vector<1x1x1x8xf32>
    %250 = vector.shape_cast %249 : vector<1x1x1x8xf32> to vector<1x8xf32>
    %251 = arith.truncf %37 : vector<16x32xf32> to vector<16x32xbf16>
    %cst_155 = arith.constant dense<0.000000e+00> : vector<16x8xf32>
    %252 = tpu.matmul %251, %248, %cst_155 {dimension_numbers = #tpu.dot_dimension_numbers<[1], [0], [0], [1], [0, 0, 1, 1], [], []>} : vector<16x32xbf16>, vector<32x8xbf16>, vector<16x8xf32> -> vector<16x8xf32>
    %253 = vector.broadcast %250 : vector<1x8xf32> to vector<16x8xf32>
    %254 = arith.addf %252, %253 : vector<16x8xf32>
    %c0_156 = arith.constant 0 : index
    %c3_157 = arith.constant 3 : index
    %c0_158 = arith.constant 0 : index
    %c0_159 = arith.constant 0 : index
    %255 = vector.load %arg12[%c0_156, %c3_157, %c0_158, %c0_159] : memref<2x4x32x8xbf16, #tpu.memory_space<vmem>>, vector<1x1x32x8xbf16>
    %256 = vector.shape_cast %255 : vector<1x1x32x8xbf16> to vector<32x8xbf16>
    %c0_160 = arith.constant 0 : index
    %c3_161 = arith.constant 3 : index
    %c0_162 = arith.constant 0 : index
    %c0_163 = arith.constant 0 : index
    %257 = vector.load %arg13[%c0_160, %c3_161, %c0_162, %c0_163] : memref<2x4x1x8xf32, #tpu.memory_space<vmem>>, vector<1x1x1x8xf32>
    %258 = vector.shape_cast %257 : vector<1x1x1x8xf32> to vector<1x8xf32>
    %259 = arith.truncf %37 : vector<16x32xf32> to vector<16x32xbf16>
    %cst_164 = arith.constant dense<0.000000e+00> : vector<16x8xf32>
    %260 = tpu.matmul %259, %256, %cst_164 {dimension_numbers = #tpu.dot_dimension_numbers<[1], [0], [0], [1], [0, 0, 1, 1], [], []>} : vector<16x32xbf16>, vector<32x8xbf16>, vector<16x8xf32> -> vector<16x8xf32>
    %261 = vector.broadcast %258 : vector<1x8xf32> to vector<16x8xf32>
    %262 = arith.addf %260, %261 : vector<16x8xf32>
    %263 = vector.extract_strided_slice %246 {offsets = [0, 0], sizes = [8, 8], strides = [1, 1]} : vector<16x8xf32> to vector<8x8xf32>
    %264 = vector.extract_strided_slice %254 {offsets = [0, 0], sizes = [8, 8], strides = [1, 1]} : vector<16x8xf32> to vector<8x8xf32>
    %265 = vector.extract_strided_slice %262 {offsets = [0, 0], sizes = [8, 8], strides = [1, 1]} : vector<16x8xf32> to vector<8x8xf32>
    %cst_165 = arith.constant dense<0.000000e+00> : vector<8x8xf32>
    %266 = tpu.matmul %263, %264, %cst_165 {dimension_numbers = #tpu.dot_dimension_numbers<[1], [1], [0], [0], [0, 0, 1, 0], [], []>} : vector<8x8xf32>, vector<8x8xf32>, vector<8x8xf32> -> vector<8x8xf32>
    %267 = vector.broadcast %44 : vector<1x8xf32> to vector<8x8xf32>
    %268 = arith.addf %266, %267 : vector<8x8xf32>
    %cst_166 = arith.constant dense<0xFF800000> : vector<8xf32>
    %269 = vector.multi_reduction <maximumf>, %268, %cst_166 [1] : vector<8x8xf32> to vector<8xf32>
    %270 = vector.shape_cast %269 : vector<8xf32> to vector<8x1xf32>
    %271 = vector.broadcast %270 : vector<8x1xf32> to vector<8x8xf32>
    %272 = arith.subf %268, %271 : vector<8x8xf32>
    %273 = math.exp %272 : vector<8x8xf32>
    %cst_167 = arith.constant dense<0.000000e+00> : vector<8xf32>
    %274 = vector.multi_reduction <add>, %273, %cst_167 [1] : vector<8x8xf32> to vector<8xf32>
    %275 = vector.shape_cast %274 : vector<8xf32> to vector<8x1xf32>
    %276 = tpu.reciprocal %275 {approx = true} : vector<8x1xf32> -> vector<8x1xf32>
    %277 = vector.broadcast %276 : vector<8x1xf32> to vector<8x8xf32>
    %278 = arith.mulf %273, %277 : vector<8x8xf32>
    %cst_168 = arith.constant dense<0.000000e+00> : vector<8x8xf32>
    %279 = tpu.matmul %278, %265, %cst_168 {dimension_numbers = #tpu.dot_dimension_numbers<[1], [0], [0], [1], [0, 0, 1, 1], [], []>} : vector<8x8xf32>, vector<8x8xf32>, vector<8x8xf32> -> vector<8x8xf32>
    %280 = vector.extract_strided_slice %246 {offsets = [8, 0], sizes = [8, 8], strides = [1, 1]} : vector<16x8xf32> to vector<8x8xf32>
    %281 = vector.extract_strided_slice %254 {offsets = [8, 0], sizes = [8, 8], strides = [1, 1]} : vector<16x8xf32> to vector<8x8xf32>
    %282 = vector.extract_strided_slice %262 {offsets = [8, 0], sizes = [8, 8], strides = [1, 1]} : vector<16x8xf32> to vector<8x8xf32>
    %cst_169 = arith.constant dense<0.000000e+00> : vector<8x8xf32>
    %283 = tpu.matmul %280, %281, %cst_169 {dimension_numbers = #tpu.dot_dimension_numbers<[1], [1], [0], [0], [0, 0, 1, 0], [], []>} : vector<8x8xf32>, vector<8x8xf32>, vector<8x8xf32> -> vector<8x8xf32>
    %284 = vector.broadcast %45 : vector<1x8xf32> to vector<8x8xf32>
    %285 = arith.addf %283, %284 : vector<8x8xf32>
    %cst_170 = arith.constant dense<0xFF800000> : vector<8xf32>
    %286 = vector.multi_reduction <maximumf>, %285, %cst_170 [1] : vector<8x8xf32> to vector<8xf32>
    %287 = vector.shape_cast %286 : vector<8xf32> to vector<8x1xf32>
    %288 = vector.broadcast %287 : vector<8x1xf32> to vector<8x8xf32>
    %289 = arith.subf %285, %288 : vector<8x8xf32>
    %290 = math.exp %289 : vector<8x8xf32>
    %cst_171 = arith.constant dense<0.000000e+00> : vector<8xf32>
    %291 = vector.multi_reduction <add>, %290, %cst_171 [1] : vector<8x8xf32> to vector<8xf32>
    %292 = vector.shape_cast %291 : vector<8xf32> to vector<8x1xf32>
    %293 = tpu.reciprocal %292 {approx = true} : vector<8x1xf32> -> vector<8x1xf32>
    %294 = vector.broadcast %293 : vector<8x1xf32> to vector<8x8xf32>
    %295 = arith.mulf %290, %294 : vector<8x8xf32>
    %cst_172 = arith.constant dense<0.000000e+00> : vector<8x8xf32>
    %296 = tpu.matmul %295, %282, %cst_172 {dimension_numbers = #tpu.dot_dimension_numbers<[1], [0], [0], [1], [0, 0, 1, 1], [], []>} : vector<8x8xf32>, vector<8x8xf32>, vector<8x8xf32> -> vector<8x8xf32>
    %297 = tpu.concatenate %279, %296 in 0 : vector<8x8xf32>, vector<8x8xf32> -> vector<16x8xf32>
    %298 = arith.truncf %297 : vector<16x8xf32> to vector<16x8xbf16>
    %c0_173 = arith.constant 0 : index
    %c3_174 = arith.constant 3 : index
    %c0_175 = arith.constant 0 : index
    %c0_176 = arith.constant 0 : index
    %299 = vector.load %arg14[%c0_173, %c3_174, %c0_175, %c0_176] : memref<2x4x8x32xbf16, #tpu.memory_space<vmem>>, vector<1x1x8x32xbf16>
    %300 = vector.shape_cast %299 : vector<1x1x8x32xbf16> to vector<8x32xbf16>
    %cst_177 = arith.constant dense<0.000000e+00> : vector<16x32xf32>
    %301 = tpu.matmul %298, %300, %cst_177 {dimension_numbers = #tpu.dot_dimension_numbers<[1], [0], [0], [1], [0, 0, 1, 1], [], []>} : vector<16x8xbf16>, vector<8x32xbf16>, vector<16x32xf32> -> vector<16x32xf32>
    %302 = arith.addf %238, %301 : vector<16x32xf32>
    %303 = arith.addf %37, %302 : vector<16x32xf32>
    %c0_178 = arith.constant 0 : index
    %c0_179 = arith.constant 0 : index
    %c0_180 = arith.constant 0 : index
    %304 = vector.load %arg15[%c0_178, %c0_179, %c0_180] : memref<2x1x32xf32, #tpu.memory_space<vmem>>, vector<1x1x32xf32>
    %305 = vector.shape_cast %304 : vector<1x1x32xf32> to vector<1x32xf32>
    %306 = vector.broadcast %305 : vector<1x32xf32> to vector<16x32xf32>
    %307 = arith.addf %303, %306 : vector<16x32xf32>
    %c0_181 = arith.constant 0 : index
    %c0_182 = arith.constant 0 : index
    %c0_183 = arith.constant 0 : index
    %308 = vector.load %arg16[%c0_181, %c0_182, %c0_183] : memref<2x1x32xf32, #tpu.memory_space<vmem>>, vector<1x1x32xf32>
    %309 = vector.shape_cast %308 : vector<1x1x32xf32> to vector<1x32xf32>
    %c0_184 = arith.constant 0 : index
    %c0_185 = arith.constant 0 : index
    %c0_186 = arith.constant 0 : index
    %310 = vector.load %arg17[%c0_184, %c0_185, %c0_186] : memref<2x1x32xf32, #tpu.memory_space<vmem>>, vector<1x1x32xf32>
    %311 = vector.shape_cast %310 : vector<1x1x32xf32> to vector<1x32xf32>
    %cst_187 = arith.constant dense<0.000000e+00> : vector<16xf32>
    %312 = vector.multi_reduction <add>, %307, %cst_187 [1] : vector<16x32xf32> to vector<16xf32>
    %313 = vector.shape_cast %312 : vector<16xf32> to vector<16x1xf32>
    %cst_188 = arith.constant 3.200000e+01 : f32
    %314 = vector.broadcast %cst_188 : f32 to vector<16x1xf32>
    %315 = arith.divf %313, %314 : vector<16x1xf32>
    %316 = vector.broadcast %315 : vector<16x1xf32> to vector<16x32xf32>
    %317 = arith.subf %307, %316 : vector<16x32xf32>
    %318 = arith.mulf %317, %317 : vector<16x32xf32>
    %cst_189 = arith.constant dense<0.000000e+00> : vector<16xf32>
    %319 = vector.multi_reduction <add>, %318, %cst_189 [1] : vector<16x32xf32> to vector<16xf32>
    %320 = vector.shape_cast %319 : vector<16xf32> to vector<16x1xf32>
    %cst_190 = arith.constant 3.200000e+01 : f32
    %321 = vector.broadcast %cst_190 : f32 to vector<16x1xf32>
    %322 = arith.divf %320, %321 : vector<16x1xf32>
    %323 = vector.broadcast %315 : vector<16x1xf32> to vector<16x32xf32>
    %324 = arith.subf %307, %323 : vector<16x32xf32>
    %cst_191 = arith.constant 9.99999996E-13 : f32
    %325 = vector.broadcast %cst_191 : f32 to vector<16x1xf32>
    %326 = arith.addf %322, %325 : vector<16x1xf32>
    %327 = math.rsqrt %326 : vector<16x1xf32>
    %328 = vector.broadcast %327 : vector<16x1xf32> to vector<16x32xf32>
    %329 = arith.mulf %324, %328 : vector<16x32xf32>
    %330 = vector.broadcast %309 : vector<1x32xf32> to vector<16x32xf32>
    %331 = arith.mulf %329, %330 : vector<16x32xf32>
    %332 = vector.broadcast %311 : vector<1x32xf32> to vector<16x32xf32>
    %333 = arith.addf %331, %332 : vector<16x32xf32>
    %c0_192 = arith.constant 0 : index
    %c0_193 = arith.constant 0 : index
    %c0_194 = arith.constant 0 : index
    %334 = vector.load %arg18[%c0_192, %c0_193, %c0_194] : memref<2x32x64xbf16, #tpu.memory_space<vmem>>, vector<1x32x64xbf16>
    %335 = vector.shape_cast %334 : vector<1x32x64xbf16> to vector<32x64xbf16>
    %c0_195 = arith.constant 0 : index
    %c0_196 = arith.constant 0 : index
    %c0_197 = arith.constant 0 : index
    %336 = vector.load %arg19[%c0_195, %c0_196, %c0_197] : memref<2x1x64xf32, #tpu.memory_space<vmem>>, vector<1x1x64xf32>
    %337 = vector.shape_cast %336 : vector<1x1x64xf32> to vector<1x64xf32>
    %338 = arith.truncf %333 : vector<16x32xf32> to vector<16x32xbf16>
    %cst_198 = arith.constant dense<0.000000e+00> : vector<16x64xf32>
    %339 = tpu.matmul %338, %335, %cst_198 {dimension_numbers = #tpu.dot_dimension_numbers<[1], [0], [0], [1], [0, 0, 1, 1], [], []>} : vector<16x32xbf16>, vector<32x64xbf16>, vector<16x64xf32> -> vector<16x64xf32>
    %340 = vector.broadcast %337 : vector<1x64xf32> to vector<16x64xf32>
    %341 = arith.addf %339, %340 : vector<16x64xf32>
    %cst_199 = arith.constant 5.000000e-01 : f32
    %342 = vector.broadcast %cst_199 : f32 to vector<16x64xf32>
    %343 = arith.mulf %342, %341 : vector<16x64xf32>
    %cst_200 = arith.constant 0.707106769 : f32
    %344 = vector.broadcast %cst_200 : f32 to vector<16x64xf32>
    %345 = arith.mulf %341, %344 : vector<16x64xf32>
    %346 = math.absf %345 : vector<16x64xf32>
    %cst_201 = arith.constant 0.327591091 : f32
    %347 = vector.broadcast %cst_201 : f32 to vector<16x64xf32>
    %348 = arith.mulf %347, %346 : vector<16x64xf32>
    %cst_202 = arith.constant 1.000000e+00 : f32
    %349 = vector.broadcast %cst_202 : f32 to vector<16x64xf32>
    %350 = arith.addf %349, %348 : vector<16x64xf32>
    %cst_203 = arith.constant 1.000000e+00 : f32
    %351 = vector.broadcast %cst_203 : f32 to vector<16x64xf32>
    %352 = arith.divf %351, %350 : vector<16x64xf32>
    %cst_204 = arith.constant 1.06140542 : f32
    %353 = vector.broadcast %cst_204 : f32 to vector<16x64xf32>
    %354 = arith.mulf %353, %352 : vector<16x64xf32>
    %cst_205 = arith.constant -1.45315206 : f32
    %355 = vector.broadcast %cst_205 : f32 to vector<16x64xf32>
    %356 = arith.addf %354, %355 : vector<16x64xf32>
    %357 = arith.mulf %356, %352 : vector<16x64xf32>
    %cst_206 = arith.constant 1.42141378 : f32
    %358 = vector.broadcast %cst_206 : f32 to vector<16x64xf32>
    %359 = arith.addf %357, %358 : vector<16x64xf32>
    %360 = arith.mulf %359, %352 : vector<16x64xf32>
    %cst_207 = arith.constant -0.284496725 : f32
    %361 = vector.broadcast %cst_207 : f32 to vector<16x64xf32>
    %362 = arith.addf %360, %361 : vector<16x64xf32>
    %363 = arith.mulf %362, %352 : vector<16x64xf32>
    %cst_208 = arith.constant 0.254829586 : f32
    %364 = vector.broadcast %cst_208 : f32 to vector<16x64xf32>
    %365 = arith.addf %363, %364 : vector<16x64xf32>
    %366 = arith.mulf %365, %352 : vector<16x64xf32>
    %cst_209 = arith.constant 0.000000e+00 : f32
    %367 = vector.broadcast %cst_209 : f32 to vector<16x64xf32>
    %368 = arith.subf %367, %346 : vector<16x64xf32>
    %369 = arith.mulf %368, %346 : vector<16x64xf32>
    %370 = math.exp %369 : vector<16x64xf32>
    %371 = arith.mulf %366, %370 : vector<16x64xf32>
    %cst_210 = arith.constant 1.000000e+00 : f32
    %372 = vector.broadcast %cst_210 : f32 to vector<16x64xf32>
    %373 = arith.subf %372, %371 : vector<16x64xf32>
    %cst_211 = arith.constant 0.000000e+00 : f32
    %374 = vector.broadcast %cst_211 : f32 to vector<16x64xf32>
    %375 = arith.cmpf oge, %345, %374 : vector<16x64xf32>
    %cst_212 = arith.constant 0.000000e+00 : f32
    %376 = vector.broadcast %cst_212 : f32 to vector<16x64xf32>
    %377 = arith.subf %376, %373 : vector<16x64xf32>
    %378 = arith.select %375, %373, %377 : vector<16x64xi1>, vector<16x64xf32>
    %cst_213 = arith.constant 1.000000e+00 : f32
    %379 = vector.broadcast %cst_213 : f32 to vector<16x64xf32>
    %380 = arith.addf %379, %378 : vector<16x64xf32>
    %381 = arith.mulf %343, %380 : vector<16x64xf32>
    %c0_214 = arith.constant 0 : index
    %c0_215 = arith.constant 0 : index
    %c0_216 = arith.constant 0 : index
    %382 = vector.load %arg20[%c0_214, %c0_215, %c0_216] : memref<2x64x32xbf16, #tpu.memory_space<vmem>>, vector<1x64x32xbf16>
    %383 = vector.shape_cast %382 : vector<1x64x32xbf16> to vector<64x32xbf16>
    %c0_217 = arith.constant 0 : index
    %c0_218 = arith.constant 0 : index
    %c0_219 = arith.constant 0 : index
    %384 = vector.load %arg21[%c0_217, %c0_218, %c0_219] : memref<2x1x32xf32, #tpu.memory_space<vmem>>, vector<1x1x32xf32>
    %385 = vector.shape_cast %384 : vector<1x1x32xf32> to vector<1x32xf32>
    %386 = arith.truncf %381 : vector<16x64xf32> to vector<16x64xbf16>
    %cst_220 = arith.constant dense<0.000000e+00> : vector<16x32xf32>
    %387 = tpu.matmul %386, %383, %cst_220 {dimension_numbers = #tpu.dot_dimension_numbers<[1], [0], [0], [1], [0, 0, 1, 1], [], []>} : vector<16x64xbf16>, vector<64x32xbf16>, vector<16x32xf32> -> vector<16x32xf32>
    %388 = vector.broadcast %385 : vector<1x32xf32> to vector<16x32xf32>
    %389 = arith.addf %387, %388 : vector<16x32xf32>
    %390 = arith.addf %333, %389 : vector<16x32xf32>
    %c0_221 = arith.constant 0 : index
    %c0_222 = arith.constant 0 : index
    %c0_223 = arith.constant 0 : index
    %391 = vector.load %arg22[%c0_221, %c0_222, %c0_223] : memref<2x1x32xf32, #tpu.memory_space<vmem>>, vector<1x1x32xf32>
    %392 = vector.shape_cast %391 : vector<1x1x32xf32> to vector<1x32xf32>
    %c0_224 = arith.constant 0 : index
    %c0_225 = arith.constant 0 : index
    %c0_226 = arith.constant 0 : index
    %393 = vector.load %arg23[%c0_224, %c0_225, %c0_226] : memref<2x1x32xf32, #tpu.memory_space<vmem>>, vector<1x1x32xf32>
    %394 = vector.shape_cast %393 : vector<1x1x32xf32> to vector<1x32xf32>
    %cst_227 = arith.constant dense<0.000000e+00> : vector<16xf32>
    %395 = vector.multi_reduction <add>, %390, %cst_227 [1] : vector<16x32xf32> to vector<16xf32>
    %396 = vector.shape_cast %395 : vector<16xf32> to vector<16x1xf32>
    %cst_228 = arith.constant 3.200000e+01 : f32
    %397 = vector.broadcast %cst_228 : f32 to vector<16x1xf32>
    %398 = arith.divf %396, %397 : vector<16x1xf32>
    %399 = vector.broadcast %398 : vector<16x1xf32> to vector<16x32xf32>
    %400 = arith.subf %390, %399 : vector<16x32xf32>
    %401 = arith.mulf %400, %400 : vector<16x32xf32>
    %cst_229 = arith.constant dense<0.000000e+00> : vector<16xf32>
    %402 = vector.multi_reduction <add>, %401, %cst_229 [1] : vector<16x32xf32> to vector<16xf32>
    %403 = vector.shape_cast %402 : vector<16xf32> to vector<16x1xf32>
    %cst_230 = arith.constant 3.200000e+01 : f32
    %404 = vector.broadcast %cst_230 : f32 to vector<16x1xf32>
    %405 = arith.divf %403, %404 : vector<16x1xf32>
    %406 = vector.broadcast %398 : vector<16x1xf32> to vector<16x32xf32>
    %407 = arith.subf %390, %406 : vector<16x32xf32>
    %cst_231 = arith.constant 9.99999996E-13 : f32
    %408 = vector.broadcast %cst_231 : f32 to vector<16x1xf32>
    %409 = arith.addf %405, %408 : vector<16x1xf32>
    %410 = math.rsqrt %409 : vector<16x1xf32>
    %411 = vector.broadcast %410 : vector<16x1xf32> to vector<16x32xf32>
    %412 = arith.mulf %407, %411 : vector<16x32xf32>
    %413 = vector.broadcast %392 : vector<1x32xf32> to vector<16x32xf32>
    %414 = arith.mulf %412, %413 : vector<16x32xf32>
    %415 = vector.broadcast %394 : vector<1x32xf32> to vector<16x32xf32>
    %416 = arith.addf %414, %415 : vector<16x32xf32>
    %cst_232 = arith.constant 0.000000e+00 : f32
    %417 = vector.broadcast %cst_232 : f32 to vector<16x32xf32>
    %c1_233 = arith.constant 1 : index
    %c0_234 = arith.constant 0 : index
    %c0_235 = arith.constant 0 : index
    %c0_236 = arith.constant 0 : index
    %418 = vector.load %arg8[%c1_233, %c0_234, %c0_235, %c0_236] : memref<2x4x32x8xbf16, #tpu.memory_space<vmem>>, vector<1x1x32x8xbf16>
    %419 = vector.shape_cast %418 : vector<1x1x32x8xbf16> to vector<32x8xbf16>
    %c1_237 = arith.constant 1 : index
    %c0_238 = arith.constant 0 : index
    %c0_239 = arith.constant 0 : index
    %c0_240 = arith.constant 0 : index
    %420 = vector.load %arg9[%c1_237, %c0_238, %c0_239, %c0_240] : memref<2x4x1x8xf32, #tpu.memory_space<vmem>>, vector<1x1x1x8xf32>
    %421 = vector.shape_cast %420 : vector<1x1x1x8xf32> to vector<1x8xf32>
    %422 = arith.truncf %416 : vector<16x32xf32> to vector<16x32xbf16>
    %cst_241 = arith.constant dense<0.000000e+00> : vector<16x8xf32>
    %423 = tpu.matmul %422, %419, %cst_241 {dimension_numbers = #tpu.dot_dimension_numbers<[1], [0], [0], [1], [0, 0, 1, 1], [], []>} : vector<16x32xbf16>, vector<32x8xbf16>, vector<16x8xf32> -> vector<16x8xf32>
    %424 = vector.broadcast %421 : vector<1x8xf32> to vector<16x8xf32>
    %425 = arith.addf %423, %424 : vector<16x8xf32>
    %c1_242 = arith.constant 1 : index
    %c0_243 = arith.constant 0 : index
    %c0_244 = arith.constant 0 : index
    %c0_245 = arith.constant 0 : index
    %426 = vector.load %arg10[%c1_242, %c0_243, %c0_244, %c0_245] : memref<2x4x32x8xbf16, #tpu.memory_space<vmem>>, vector<1x1x32x8xbf16>
    %427 = vector.shape_cast %426 : vector<1x1x32x8xbf16> to vector<32x8xbf16>
    %c1_246 = arith.constant 1 : index
    %c0_247 = arith.constant 0 : index
    %c0_248 = arith.constant 0 : index
    %c0_249 = arith.constant 0 : index
    %428 = vector.load %arg11[%c1_246, %c0_247, %c0_248, %c0_249] : memref<2x4x1x8xf32, #tpu.memory_space<vmem>>, vector<1x1x1x8xf32>
    %429 = vector.shape_cast %428 : vector<1x1x1x8xf32> to vector<1x8xf32>
    %430 = arith.truncf %416 : vector<16x32xf32> to vector<16x32xbf16>
    %cst_250 = arith.constant dense<0.000000e+00> : vector<16x8xf32>
    %431 = tpu.matmul %430, %427, %cst_250 {dimension_numbers = #tpu.dot_dimension_numbers<[1], [0], [0], [1], [0, 0, 1, 1], [], []>} : vector<16x32xbf16>, vector<32x8xbf16>, vector<16x8xf32> -> vector<16x8xf32>
    %432 = vector.broadcast %429 : vector<1x8xf32> to vector<16x8xf32>
    %433 = arith.addf %431, %432 : vector<16x8xf32>
    %c1_251 = arith.constant 1 : index
    %c0_252 = arith.constant 0 : index
    %c0_253 = arith.constant 0 : index
    %c0_254 = arith.constant 0 : index
    %434 = vector.load %arg12[%c1_251, %c0_252, %c0_253, %c0_254] : memref<2x4x32x8xbf16, #tpu.memory_space<vmem>>, vector<1x1x32x8xbf16>
    %435 = vector.shape_cast %434 : vector<1x1x32x8xbf16> to vector<32x8xbf16>
    %c1_255 = arith.constant 1 : index
    %c0_256 = arith.constant 0 : index
    %c0_257 = arith.constant 0 : index
    %c0_258 = arith.constant 0 : index
    %436 = vector.load %arg13[%c1_255, %c0_256, %c0_257, %c0_258] : memref<2x4x1x8xf32, #tpu.memory_space<vmem>>, vector<1x1x1x8xf32>
    %437 = vector.shape_cast %436 : vector<1x1x1x8xf32> to vector<1x8xf32>
    %438 = arith.truncf %416 : vector<16x32xf32> to vector<16x32xbf16>
    %cst_259 = arith.constant dense<0.000000e+00> : vector<16x8xf32>
    %439 = tpu.matmul %438, %435, %cst_259 {dimension_numbers = #tpu.dot_dimension_numbers<[1], [0], [0], [1], [0, 0, 1, 1], [], []>} : vector<16x32xbf16>, vector<32x8xbf16>, vector<16x8xf32> -> vector<16x8xf32>
    %440 = vector.broadcast %437 : vector<1x8xf32> to vector<16x8xf32>
    %441 = arith.addf %439, %440 : vector<16x8xf32>
    %442 = vector.extract_strided_slice %425 {offsets = [0, 0], sizes = [8, 8], strides = [1, 1]} : vector<16x8xf32> to vector<8x8xf32>
    %443 = vector.extract_strided_slice %433 {offsets = [0, 0], sizes = [8, 8], strides = [1, 1]} : vector<16x8xf32> to vector<8x8xf32>
    %444 = vector.extract_strided_slice %441 {offsets = [0, 0], sizes = [8, 8], strides = [1, 1]} : vector<16x8xf32> to vector<8x8xf32>
    %cst_260 = arith.constant dense<0.000000e+00> : vector<8x8xf32>
    %445 = tpu.matmul %442, %443, %cst_260 {dimension_numbers = #tpu.dot_dimension_numbers<[1], [1], [0], [0], [0, 0, 1, 0], [], []>} : vector<8x8xf32>, vector<8x8xf32>, vector<8x8xf32> -> vector<8x8xf32>
    %446 = vector.broadcast %44 : vector<1x8xf32> to vector<8x8xf32>
    %447 = arith.addf %445, %446 : vector<8x8xf32>
    %cst_261 = arith.constant dense<0xFF800000> : vector<8xf32>
    %448 = vector.multi_reduction <maximumf>, %447, %cst_261 [1] : vector<8x8xf32> to vector<8xf32>
    %449 = vector.shape_cast %448 : vector<8xf32> to vector<8x1xf32>
    %450 = vector.broadcast %449 : vector<8x1xf32> to vector<8x8xf32>
    %451 = arith.subf %447, %450 : vector<8x8xf32>
    %452 = math.exp %451 : vector<8x8xf32>
    %cst_262 = arith.constant dense<0.000000e+00> : vector<8xf32>
    %453 = vector.multi_reduction <add>, %452, %cst_262 [1] : vector<8x8xf32> to vector<8xf32>
    %454 = vector.shape_cast %453 : vector<8xf32> to vector<8x1xf32>
    %455 = tpu.reciprocal %454 {approx = true} : vector<8x1xf32> -> vector<8x1xf32>
    %456 = vector.broadcast %455 : vector<8x1xf32> to vector<8x8xf32>
    %457 = arith.mulf %452, %456 : vector<8x8xf32>
    %cst_263 = arith.constant dense<0.000000e+00> : vector<8x8xf32>
    %458 = tpu.matmul %457, %444, %cst_263 {dimension_numbers = #tpu.dot_dimension_numbers<[1], [0], [0], [1], [0, 0, 1, 1], [], []>} : vector<8x8xf32>, vector<8x8xf32>, vector<8x8xf32> -> vector<8x8xf32>
    %459 = vector.extract_strided_slice %425 {offsets = [8, 0], sizes = [8, 8], strides = [1, 1]} : vector<16x8xf32> to vector<8x8xf32>
    %460 = vector.extract_strided_slice %433 {offsets = [8, 0], sizes = [8, 8], strides = [1, 1]} : vector<16x8xf32> to vector<8x8xf32>
    %461 = vector.extract_strided_slice %441 {offsets = [8, 0], sizes = [8, 8], strides = [1, 1]} : vector<16x8xf32> to vector<8x8xf32>
    %cst_264 = arith.constant dense<0.000000e+00> : vector<8x8xf32>
    %462 = tpu.matmul %459, %460, %cst_264 {dimension_numbers = #tpu.dot_dimension_numbers<[1], [1], [0], [0], [0, 0, 1, 0], [], []>} : vector<8x8xf32>, vector<8x8xf32>, vector<8x8xf32> -> vector<8x8xf32>
    %463 = vector.broadcast %45 : vector<1x8xf32> to vector<8x8xf32>
    %464 = arith.addf %462, %463 : vector<8x8xf32>
    %cst_265 = arith.constant dense<0xFF800000> : vector<8xf32>
    %465 = vector.multi_reduction <maximumf>, %464, %cst_265 [1] : vector<8x8xf32> to vector<8xf32>
    %466 = vector.shape_cast %465 : vector<8xf32> to vector<8x1xf32>
    %467 = vector.broadcast %466 : vector<8x1xf32> to vector<8x8xf32>
    %468 = arith.subf %464, %467 : vector<8x8xf32>
    %469 = math.exp %468 : vector<8x8xf32>
    %cst_266 = arith.constant dense<0.000000e+00> : vector<8xf32>
    %470 = vector.multi_reduction <add>, %469, %cst_266 [1] : vector<8x8xf32> to vector<8xf32>
    %471 = vector.shape_cast %470 : vector<8xf32> to vector<8x1xf32>
    %472 = tpu.reciprocal %471 {approx = true} : vector<8x1xf32> -> vector<8x1xf32>
    %473 = vector.broadcast %472 : vector<8x1xf32> to vector<8x8xf32>
    %474 = arith.mulf %469, %473 : vector<8x8xf32>
    %cst_267 = arith.constant dense<0.000000e+00> : vector<8x8xf32>
    %475 = tpu.matmul %474, %461, %cst_267 {dimension_numbers = #tpu.dot_dimension_numbers<[1], [0], [0], [1], [0, 0, 1, 1], [], []>} : vector<8x8xf32>, vector<8x8xf32>, vector<8x8xf32> -> vector<8x8xf32>
    %476 = tpu.concatenate %458, %475 in 0 : vector<8x8xf32>, vector<8x8xf32> -> vector<16x8xf32>
    %477 = arith.truncf %476 : vector<16x8xf32> to vector<16x8xbf16>
    %c1_268 = arith.constant 1 : index
    %c0_269 = arith.constant 0 : index
    %c0_270 = arith.constant 0 : index
    %c0_271 = arith.constant 0 : index
    %478 = vector.load %arg14[%c1_268, %c0_269, %c0_270, %c0_271] : memref<2x4x8x32xbf16, #tpu.memory_space<vmem>>, vector<1x1x8x32xbf16>
    %479 = vector.shape_cast %478 : vector<1x1x8x32xbf16> to vector<8x32xbf16>
    %cst_272 = arith.constant dense<0.000000e+00> : vector<16x32xf32>
    %480 = tpu.matmul %477, %479, %cst_272 {dimension_numbers = #tpu.dot_dimension_numbers<[1], [0], [0], [1], [0, 0, 1, 1], [], []>} : vector<16x8xbf16>, vector<8x32xbf16>, vector<16x32xf32> -> vector<16x32xf32>
    %481 = arith.addf %417, %480 : vector<16x32xf32>
    %c1_273 = arith.constant 1 : index
    %c1_274 = arith.constant 1 : index
    %c0_275 = arith.constant 0 : index
    %c0_276 = arith.constant 0 : index
    %482 = vector.load %arg8[%c1_273, %c1_274, %c0_275, %c0_276] : memref<2x4x32x8xbf16, #tpu.memory_space<vmem>>, vector<1x1x32x8xbf16>
    %483 = vector.shape_cast %482 : vector<1x1x32x8xbf16> to vector<32x8xbf16>
    %c1_277 = arith.constant 1 : index
    %c1_278 = arith.constant 1 : index
    %c0_279 = arith.constant 0 : index
    %c0_280 = arith.constant 0 : index
    %484 = vector.load %arg9[%c1_277, %c1_278, %c0_279, %c0_280] : memref<2x4x1x8xf32, #tpu.memory_space<vmem>>, vector<1x1x1x8xf32>
    %485 = vector.shape_cast %484 : vector<1x1x1x8xf32> to vector<1x8xf32>
    %486 = arith.truncf %416 : vector<16x32xf32> to vector<16x32xbf16>
    %cst_281 = arith.constant dense<0.000000e+00> : vector<16x8xf32>
    %487 = tpu.matmul %486, %483, %cst_281 {dimension_numbers = #tpu.dot_dimension_numbers<[1], [0], [0], [1], [0, 0, 1, 1], [], []>} : vector<16x32xbf16>, vector<32x8xbf16>, vector<16x8xf32> -> vector<16x8xf32>
    %488 = vector.broadcast %485 : vector<1x8xf32> to vector<16x8xf32>
    %489 = arith.addf %487, %488 : vector<16x8xf32>
    %c1_282 = arith.constant 1 : index
    %c1_283 = arith.constant 1 : index
    %c0_284 = arith.constant 0 : index
    %c0_285 = arith.constant 0 : index
    %490 = vector.load %arg10[%c1_282, %c1_283, %c0_284, %c0_285] : memref<2x4x32x8xbf16, #tpu.memory_space<vmem>>, vector<1x1x32x8xbf16>
    %491 = vector.shape_cast %490 : vector<1x1x32x8xbf16> to vector<32x8xbf16>
    %c1_286 = arith.constant 1 : index
    %c1_287 = arith.constant 1 : index
    %c0_288 = arith.constant 0 : index
    %c0_289 = arith.constant 0 : index
    %492 = vector.load %arg11[%c1_286, %c1_287, %c0_288, %c0_289] : memref<2x4x1x8xf32, #tpu.memory_space<vmem>>, vector<1x1x1x8xf32>
    %493 = vector.shape_cast %492 : vector<1x1x1x8xf32> to vector<1x8xf32>
    %494 = arith.truncf %416 : vector<16x32xf32> to vector<16x32xbf16>
    %cst_290 = arith.constant dense<0.000000e+00> : vector<16x8xf32>
    %495 = tpu.matmul %494, %491, %cst_290 {dimension_numbers = #tpu.dot_dimension_numbers<[1], [0], [0], [1], [0, 0, 1, 1], [], []>} : vector<16x32xbf16>, vector<32x8xbf16>, vector<16x8xf32> -> vector<16x8xf32>
    %496 = vector.broadcast %493 : vector<1x8xf32> to vector<16x8xf32>
    %497 = arith.addf %495, %496 : vector<16x8xf32>
    %c1_291 = arith.constant 1 : index
    %c1_292 = arith.constant 1 : index
    %c0_293 = arith.constant 0 : index
    %c0_294 = arith.constant 0 : index
    %498 = vector.load %arg12[%c1_291, %c1_292, %c0_293, %c0_294] : memref<2x4x32x8xbf16, #tpu.memory_space<vmem>>, vector<1x1x32x8xbf16>
    %499 = vector.shape_cast %498 : vector<1x1x32x8xbf16> to vector<32x8xbf16>
    %c1_295 = arith.constant 1 : index
    %c1_296 = arith.constant 1 : index
    %c0_297 = arith.constant 0 : index
    %c0_298 = arith.constant 0 : index
    %500 = vector.load %arg13[%c1_295, %c1_296, %c0_297, %c0_298] : memref<2x4x1x8xf32, #tpu.memory_space<vmem>>, vector<1x1x1x8xf32>
    %501 = vector.shape_cast %500 : vector<1x1x1x8xf32> to vector<1x8xf32>
    %502 = arith.truncf %416 : vector<16x32xf32> to vector<16x32xbf16>
    %cst_299 = arith.constant dense<0.000000e+00> : vector<16x8xf32>
    %503 = tpu.matmul %502, %499, %cst_299 {dimension_numbers = #tpu.dot_dimension_numbers<[1], [0], [0], [1], [0, 0, 1, 1], [], []>} : vector<16x32xbf16>, vector<32x8xbf16>, vector<16x8xf32> -> vector<16x8xf32>
    %504 = vector.broadcast %501 : vector<1x8xf32> to vector<16x8xf32>
    %505 = arith.addf %503, %504 : vector<16x8xf32>
    %506 = vector.extract_strided_slice %489 {offsets = [0, 0], sizes = [8, 8], strides = [1, 1]} : vector<16x8xf32> to vector<8x8xf32>
    %507 = vector.extract_strided_slice %497 {offsets = [0, 0], sizes = [8, 8], strides = [1, 1]} : vector<16x8xf32> to vector<8x8xf32>
    %508 = vector.extract_strided_slice %505 {offsets = [0, 0], sizes = [8, 8], strides = [1, 1]} : vector<16x8xf32> to vector<8x8xf32>
    %cst_300 = arith.constant dense<0.000000e+00> : vector<8x8xf32>
    %509 = tpu.matmul %506, %507, %cst_300 {dimension_numbers = #tpu.dot_dimension_numbers<[1], [1], [0], [0], [0, 0, 1, 0], [], []>} : vector<8x8xf32>, vector<8x8xf32>, vector<8x8xf32> -> vector<8x8xf32>
    %510 = vector.broadcast %44 : vector<1x8xf32> to vector<8x8xf32>
    %511 = arith.addf %509, %510 : vector<8x8xf32>
    %cst_301 = arith.constant dense<0xFF800000> : vector<8xf32>
    %512 = vector.multi_reduction <maximumf>, %511, %cst_301 [1] : vector<8x8xf32> to vector<8xf32>
    %513 = vector.shape_cast %512 : vector<8xf32> to vector<8x1xf32>
    %514 = vector.broadcast %513 : vector<8x1xf32> to vector<8x8xf32>
    %515 = arith.subf %511, %514 : vector<8x8xf32>
    %516 = math.exp %515 : vector<8x8xf32>
    %cst_302 = arith.constant dense<0.000000e+00> : vector<8xf32>
    %517 = vector.multi_reduction <add>, %516, %cst_302 [1] : vector<8x8xf32> to vector<8xf32>
    %518 = vector.shape_cast %517 : vector<8xf32> to vector<8x1xf32>
    %519 = tpu.reciprocal %518 {approx = true} : vector<8x1xf32> -> vector<8x1xf32>
    %520 = vector.broadcast %519 : vector<8x1xf32> to vector<8x8xf32>
    %521 = arith.mulf %516, %520 : vector<8x8xf32>
    %cst_303 = arith.constant dense<0.000000e+00> : vector<8x8xf32>
    %522 = tpu.matmul %521, %508, %cst_303 {dimension_numbers = #tpu.dot_dimension_numbers<[1], [0], [0], [1], [0, 0, 1, 1], [], []>} : vector<8x8xf32>, vector<8x8xf32>, vector<8x8xf32> -> vector<8x8xf32>
    %523 = vector.extract_strided_slice %489 {offsets = [8, 0], sizes = [8, 8], strides = [1, 1]} : vector<16x8xf32> to vector<8x8xf32>
    %524 = vector.extract_strided_slice %497 {offsets = [8, 0], sizes = [8, 8], strides = [1, 1]} : vector<16x8xf32> to vector<8x8xf32>
    %525 = vector.extract_strided_slice %505 {offsets = [8, 0], sizes = [8, 8], strides = [1, 1]} : vector<16x8xf32> to vector<8x8xf32>
    %cst_304 = arith.constant dense<0.000000e+00> : vector<8x8xf32>
    %526 = tpu.matmul %523, %524, %cst_304 {dimension_numbers = #tpu.dot_dimension_numbers<[1], [1], [0], [0], [0, 0, 1, 0], [], []>} : vector<8x8xf32>, vector<8x8xf32>, vector<8x8xf32> -> vector<8x8xf32>
    %527 = vector.broadcast %45 : vector<1x8xf32> to vector<8x8xf32>
    %528 = arith.addf %526, %527 : vector<8x8xf32>
    %cst_305 = arith.constant dense<0xFF800000> : vector<8xf32>
    %529 = vector.multi_reduction <maximumf>, %528, %cst_305 [1] : vector<8x8xf32> to vector<8xf32>
    %530 = vector.shape_cast %529 : vector<8xf32> to vector<8x1xf32>
    %531 = vector.broadcast %530 : vector<8x1xf32> to vector<8x8xf32>
    %532 = arith.subf %528, %531 : vector<8x8xf32>
    %533 = math.exp %532 : vector<8x8xf32>
    %cst_306 = arith.constant dense<0.000000e+00> : vector<8xf32>
    %534 = vector.multi_reduction <add>, %533, %cst_306 [1] : vector<8x8xf32> to vector<8xf32>
    %535 = vector.shape_cast %534 : vector<8xf32> to vector<8x1xf32>
    %536 = tpu.reciprocal %535 {approx = true} : vector<8x1xf32> -> vector<8x1xf32>
    %537 = vector.broadcast %536 : vector<8x1xf32> to vector<8x8xf32>
    %538 = arith.mulf %533, %537 : vector<8x8xf32>
    %cst_307 = arith.constant dense<0.000000e+00> : vector<8x8xf32>
    %539 = tpu.matmul %538, %525, %cst_307 {dimension_numbers = #tpu.dot_dimension_numbers<[1], [0], [0], [1], [0, 0, 1, 1], [], []>} : vector<8x8xf32>, vector<8x8xf32>, vector<8x8xf32> -> vector<8x8xf32>
    %540 = tpu.concatenate %522, %539 in 0 : vector<8x8xf32>, vector<8x8xf32> -> vector<16x8xf32>
    %541 = arith.truncf %540 : vector<16x8xf32> to vector<16x8xbf16>
    %c1_308 = arith.constant 1 : index
    %c1_309 = arith.constant 1 : index
    %c0_310 = arith.constant 0 : index
    %c0_311 = arith.constant 0 : index
    %542 = vector.load %arg14[%c1_308, %c1_309, %c0_310, %c0_311] : memref<2x4x8x32xbf16, #tpu.memory_space<vmem>>, vector<1x1x8x32xbf16>
    %543 = vector.shape_cast %542 : vector<1x1x8x32xbf16> to vector<8x32xbf16>
    %cst_312 = arith.constant dense<0.000000e+00> : vector<16x32xf32>
    %544 = tpu.matmul %541, %543, %cst_312 {dimension_numbers = #tpu.dot_dimension_numbers<[1], [0], [0], [1], [0, 0, 1, 1], [], []>} : vector<16x8xbf16>, vector<8x32xbf16>, vector<16x32xf32> -> vector<16x32xf32>
    %545 = arith.addf %481, %544 : vector<16x32xf32>
    %c1_313 = arith.constant 1 : index
    %c2_314 = arith.constant 2 : index
    %c0_315 = arith.constant 0 : index
    %c0_316 = arith.constant 0 : index
    %546 = vector.load %arg8[%c1_313, %c2_314, %c0_315, %c0_316] : memref<2x4x32x8xbf16, #tpu.memory_space<vmem>>, vector<1x1x32x8xbf16>
    %547 = vector.shape_cast %546 : vector<1x1x32x8xbf16> to vector<32x8xbf16>
    %c1_317 = arith.constant 1 : index
    %c2_318 = arith.constant 2 : index
    %c0_319 = arith.constant 0 : index
    %c0_320 = arith.constant 0 : index
    %548 = vector.load %arg9[%c1_317, %c2_318, %c0_319, %c0_320] : memref<2x4x1x8xf32, #tpu.memory_space<vmem>>, vector<1x1x1x8xf32>
    %549 = vector.shape_cast %548 : vector<1x1x1x8xf32> to vector<1x8xf32>
    %550 = arith.truncf %416 : vector<16x32xf32> to vector<16x32xbf16>
    %cst_321 = arith.constant dense<0.000000e+00> : vector<16x8xf32>
    %551 = tpu.matmul %550, %547, %cst_321 {dimension_numbers = #tpu.dot_dimension_numbers<[1], [0], [0], [1], [0, 0, 1, 1], [], []>} : vector<16x32xbf16>, vector<32x8xbf16>, vector<16x8xf32> -> vector<16x8xf32>
    %552 = vector.broadcast %549 : vector<1x8xf32> to vector<16x8xf32>
    %553 = arith.addf %551, %552 : vector<16x8xf32>
    %c1_322 = arith.constant 1 : index
    %c2_323 = arith.constant 2 : index
    %c0_324 = arith.constant 0 : index
    %c0_325 = arith.constant 0 : index
    %554 = vector.load %arg10[%c1_322, %c2_323, %c0_324, %c0_325] : memref<2x4x32x8xbf16, #tpu.memory_space<vmem>>, vector<1x1x32x8xbf16>
    %555 = vector.shape_cast %554 : vector<1x1x32x8xbf16> to vector<32x8xbf16>
    %c1_326 = arith.constant 1 : index
    %c2_327 = arith.constant 2 : index
    %c0_328 = arith.constant 0 : index
    %c0_329 = arith.constant 0 : index
    %556 = vector.load %arg11[%c1_326, %c2_327, %c0_328, %c0_329] : memref<2x4x1x8xf32, #tpu.memory_space<vmem>>, vector<1x1x1x8xf32>
    %557 = vector.shape_cast %556 : vector<1x1x1x8xf32> to vector<1x8xf32>
    %558 = arith.truncf %416 : vector<16x32xf32> to vector<16x32xbf16>
    %cst_330 = arith.constant dense<0.000000e+00> : vector<16x8xf32>
    %559 = tpu.matmul %558, %555, %cst_330 {dimension_numbers = #tpu.dot_dimension_numbers<[1], [0], [0], [1], [0, 0, 1, 1], [], []>} : vector<16x32xbf16>, vector<32x8xbf16>, vector<16x8xf32> -> vector<16x8xf32>
    %560 = vector.broadcast %557 : vector<1x8xf32> to vector<16x8xf32>
    %561 = arith.addf %559, %560 : vector<16x8xf32>
    %c1_331 = arith.constant 1 : index
    %c2_332 = arith.constant 2 : index
    %c0_333 = arith.constant 0 : index
    %c0_334 = arith.constant 0 : index
    %562 = vector.load %arg12[%c1_331, %c2_332, %c0_333, %c0_334] : memref<2x4x32x8xbf16, #tpu.memory_space<vmem>>, vector<1x1x32x8xbf16>
    %563 = vector.shape_cast %562 : vector<1x1x32x8xbf16> to vector<32x8xbf16>
    %c1_335 = arith.constant 1 : index
    %c2_336 = arith.constant 2 : index
    %c0_337 = arith.constant 0 : index
    %c0_338 = arith.constant 0 : index
    %564 = vector.load %arg13[%c1_335, %c2_336, %c0_337, %c0_338] : memref<2x4x1x8xf32, #tpu.memory_space<vmem>>, vector<1x1x1x8xf32>
    %565 = vector.shape_cast %564 : vector<1x1x1x8xf32> to vector<1x8xf32>
    %566 = arith.truncf %416 : vector<16x32xf32> to vector<16x32xbf16>
    %cst_339 = arith.constant dense<0.000000e+00> : vector<16x8xf32>
    %567 = tpu.matmul %566, %563, %cst_339 {dimension_numbers = #tpu.dot_dimension_numbers<[1], [0], [0], [1], [0, 0, 1, 1], [], []>} : vector<16x32xbf16>, vector<32x8xbf16>, vector<16x8xf32> -> vector<16x8xf32>
    %568 = vector.broadcast %565 : vector<1x8xf32> to vector<16x8xf32>
    %569 = arith.addf %567, %568 : vector<16x8xf32>
    %570 = vector.extract_strided_slice %553 {offsets = [0, 0], sizes = [8, 8], strides = [1, 1]} : vector<16x8xf32> to vector<8x8xf32>
    %571 = vector.extract_strided_slice %561 {offsets = [0, 0], sizes = [8, 8], strides = [1, 1]} : vector<16x8xf32> to vector<8x8xf32>
    %572 = vector.extract_strided_slice %569 {offsets = [0, 0], sizes = [8, 8], strides = [1, 1]} : vector<16x8xf32> to vector<8x8xf32>
    %cst_340 = arith.constant dense<0.000000e+00> : vector<8x8xf32>
    %573 = tpu.matmul %570, %571, %cst_340 {dimension_numbers = #tpu.dot_dimension_numbers<[1], [1], [0], [0], [0, 0, 1, 0], [], []>} : vector<8x8xf32>, vector<8x8xf32>, vector<8x8xf32> -> vector<8x8xf32>
    %574 = vector.broadcast %44 : vector<1x8xf32> to vector<8x8xf32>
    %575 = arith.addf %573, %574 : vector<8x8xf32>
    %cst_341 = arith.constant dense<0xFF800000> : vector<8xf32>
    %576 = vector.multi_reduction <maximumf>, %575, %cst_341 [1] : vector<8x8xf32> to vector<8xf32>
    %577 = vector.shape_cast %576 : vector<8xf32> to vector<8x1xf32>
    %578 = vector.broadcast %577 : vector<8x1xf32> to vector<8x8xf32>
    %579 = arith.subf %575, %578 : vector<8x8xf32>
    %580 = math.exp %579 : vector<8x8xf32>
    %cst_342 = arith.constant dense<0.000000e+00> : vector<8xf32>
    %581 = vector.multi_reduction <add>, %580, %cst_342 [1] : vector<8x8xf32> to vector<8xf32>
    %582 = vector.shape_cast %581 : vector<8xf32> to vector<8x1xf32>
    %583 = tpu.reciprocal %582 {approx = true} : vector<8x1xf32> -> vector<8x1xf32>
    %584 = vector.broadcast %583 : vector<8x1xf32> to vector<8x8xf32>
    %585 = arith.mulf %580, %584 : vector<8x8xf32>
    %cst_343 = arith.constant dense<0.000000e+00> : vector<8x8xf32>
    %586 = tpu.matmul %585, %572, %cst_343 {dimension_numbers = #tpu.dot_dimension_numbers<[1], [0], [0], [1], [0, 0, 1, 1], [], []>} : vector<8x8xf32>, vector<8x8xf32>, vector<8x8xf32> -> vector<8x8xf32>
    %587 = vector.extract_strided_slice %553 {offsets = [8, 0], sizes = [8, 8], strides = [1, 1]} : vector<16x8xf32> to vector<8x8xf32>
    %588 = vector.extract_strided_slice %561 {offsets = [8, 0], sizes = [8, 8], strides = [1, 1]} : vector<16x8xf32> to vector<8x8xf32>
    %589 = vector.extract_strided_slice %569 {offsets = [8, 0], sizes = [8, 8], strides = [1, 1]} : vector<16x8xf32> to vector<8x8xf32>
    %cst_344 = arith.constant dense<0.000000e+00> : vector<8x8xf32>
    %590 = tpu.matmul %587, %588, %cst_344 {dimension_numbers = #tpu.dot_dimension_numbers<[1], [1], [0], [0], [0, 0, 1, 0], [], []>} : vector<8x8xf32>, vector<8x8xf32>, vector<8x8xf32> -> vector<8x8xf32>
    %591 = vector.broadcast %45 : vector<1x8xf32> to vector<8x8xf32>
    %592 = arith.addf %590, %591 : vector<8x8xf32>
    %cst_345 = arith.constant dense<0xFF800000> : vector<8xf32>
    %593 = vector.multi_reduction <maximumf>, %592, %cst_345 [1] : vector<8x8xf32> to vector<8xf32>
    %594 = vector.shape_cast %593 : vector<8xf32> to vector<8x1xf32>
    %595 = vector.broadcast %594 : vector<8x1xf32> to vector<8x8xf32>
    %596 = arith.subf %592, %595 : vector<8x8xf32>
    %597 = math.exp %596 : vector<8x8xf32>
    %cst_346 = arith.constant dense<0.000000e+00> : vector<8xf32>
    %598 = vector.multi_reduction <add>, %597, %cst_346 [1] : vector<8x8xf32> to vector<8xf32>
    %599 = vector.shape_cast %598 : vector<8xf32> to vector<8x1xf32>
    %600 = tpu.reciprocal %599 {approx = true} : vector<8x1xf32> -> vector<8x1xf32>
    %601 = vector.broadcast %600 : vector<8x1xf32> to vector<8x8xf32>
    %602 = arith.mulf %597, %601 : vector<8x8xf32>
    %cst_347 = arith.constant dense<0.000000e+00> : vector<8x8xf32>
    %603 = tpu.matmul %602, %589, %cst_347 {dimension_numbers = #tpu.dot_dimension_numbers<[1], [0], [0], [1], [0, 0, 1, 1], [], []>} : vector<8x8xf32>, vector<8x8xf32>, vector<8x8xf32> -> vector<8x8xf32>
    %604 = tpu.concatenate %586, %603 in 0 : vector<8x8xf32>, vector<8x8xf32> -> vector<16x8xf32>
    %605 = arith.truncf %604 : vector<16x8xf32> to vector<16x8xbf16>
    %c1_348 = arith.constant 1 : index
    %c2_349 = arith.constant 2 : index
    %c0_350 = arith.constant 0 : index
    %c0_351 = arith.constant 0 : index
    %606 = vector.load %arg14[%c1_348, %c2_349, %c0_350, %c0_351] : memref<2x4x8x32xbf16, #tpu.memory_space<vmem>>, vector<1x1x8x32xbf16>
    %607 = vector.shape_cast %606 : vector<1x1x8x32xbf16> to vector<8x32xbf16>
    %cst_352 = arith.constant dense<0.000000e+00> : vector<16x32xf32>
    %608 = tpu.matmul %605, %607, %cst_352 {dimension_numbers = #tpu.dot_dimension_numbers<[1], [0], [0], [1], [0, 0, 1, 1], [], []>} : vector<16x8xbf16>, vector<8x32xbf16>, vector<16x32xf32> -> vector<16x32xf32>
    %609 = arith.addf %545, %608 : vector<16x32xf32>
    %c1_353 = arith.constant 1 : index
    %c3_354 = arith.constant 3 : index
    %c0_355 = arith.constant 0 : index
    %c0_356 = arith.constant 0 : index
    %610 = vector.load %arg8[%c1_353, %c3_354, %c0_355, %c0_356] : memref<2x4x32x8xbf16, #tpu.memory_space<vmem>>, vector<1x1x32x8xbf16>
    %611 = vector.shape_cast %610 : vector<1x1x32x8xbf16> to vector<32x8xbf16>
    %c1_357 = arith.constant 1 : index
    %c3_358 = arith.constant 3 : index
    %c0_359 = arith.constant 0 : index
    %c0_360 = arith.constant 0 : index
    %612 = vector.load %arg9[%c1_357, %c3_358, %c0_359, %c0_360] : memref<2x4x1x8xf32, #tpu.memory_space<vmem>>, vector<1x1x1x8xf32>
    %613 = vector.shape_cast %612 : vector<1x1x1x8xf32> to vector<1x8xf32>
    %614 = arith.truncf %416 : vector<16x32xf32> to vector<16x32xbf16>
    %cst_361 = arith.constant dense<0.000000e+00> : vector<16x8xf32>
    %615 = tpu.matmul %614, %611, %cst_361 {dimension_numbers = #tpu.dot_dimension_numbers<[1], [0], [0], [1], [0, 0, 1, 1], [], []>} : vector<16x32xbf16>, vector<32x8xbf16>, vector<16x8xf32> -> vector<16x8xf32>
    %616 = vector.broadcast %613 : vector<1x8xf32> to vector<16x8xf32>
    %617 = arith.addf %615, %616 : vector<16x8xf32>
    %c1_362 = arith.constant 1 : index
    %c3_363 = arith.constant 3 : index
    %c0_364 = arith.constant 0 : index
    %c0_365 = arith.constant 0 : index
    %618 = vector.load %arg10[%c1_362, %c3_363, %c0_364, %c0_365] : memref<2x4x32x8xbf16, #tpu.memory_space<vmem>>, vector<1x1x32x8xbf16>
    %619 = vector.shape_cast %618 : vector<1x1x32x8xbf16> to vector<32x8xbf16>
    %c1_366 = arith.constant 1 : index
    %c3_367 = arith.constant 3 : index
    %c0_368 = arith.constant 0 : index
    %c0_369 = arith.constant 0 : index
    %620 = vector.load %arg11[%c1_366, %c3_367, %c0_368, %c0_369] : memref<2x4x1x8xf32, #tpu.memory_space<vmem>>, vector<1x1x1x8xf32>
    %621 = vector.shape_cast %620 : vector<1x1x1x8xf32> to vector<1x8xf32>
    %622 = arith.truncf %416 : vector<16x32xf32> to vector<16x32xbf16>
    %cst_370 = arith.constant dense<0.000000e+00> : vector<16x8xf32>
    %623 = tpu.matmul %622, %619, %cst_370 {dimension_numbers = #tpu.dot_dimension_numbers<[1], [0], [0], [1], [0, 0, 1, 1], [], []>} : vector<16x32xbf16>, vector<32x8xbf16>, vector<16x8xf32> -> vector<16x8xf32>
    %624 = vector.broadcast %621 : vector<1x8xf32> to vector<16x8xf32>
    %625 = arith.addf %623, %624 : vector<16x8xf32>
    %c1_371 = arith.constant 1 : index
    %c3_372 = arith.constant 3 : index
    %c0_373 = arith.constant 0 : index
    %c0_374 = arith.constant 0 : index
    %626 = vector.load %arg12[%c1_371, %c3_372, %c0_373, %c0_374] : memref<2x4x32x8xbf16, #tpu.memory_space<vmem>>, vector<1x1x32x8xbf16>
    %627 = vector.shape_cast %626 : vector<1x1x32x8xbf16> to vector<32x8xbf16>
    %c1_375 = arith.constant 1 : index
    %c3_376 = arith.constant 3 : index
    %c0_377 = arith.constant 0 : index
    %c0_378 = arith.constant 0 : index
    %628 = vector.load %arg13[%c1_375, %c3_376, %c0_377, %c0_378] : memref<2x4x1x8xf32, #tpu.memory_space<vmem>>, vector<1x1x1x8xf32>
    %629 = vector.shape_cast %628 : vector<1x1x1x8xf32> to vector<1x8xf32>
    %630 = arith.truncf %416 : vector<16x32xf32> to vector<16x32xbf16>
    %cst_379 = arith.constant dense<0.000000e+00> : vector<16x8xf32>
    %631 = tpu.matmul %630, %627, %cst_379 {dimension_numbers = #tpu.dot_dimension_numbers<[1], [0], [0], [1], [0, 0, 1, 1], [], []>} : vector<16x32xbf16>, vector<32x8xbf16>, vector<16x8xf32> -> vector<16x8xf32>
    %632 = vector.broadcast %629 : vector<1x8xf32> to vector<16x8xf32>
    %633 = arith.addf %631, %632 : vector<16x8xf32>
    %634 = vector.extract_strided_slice %617 {offsets = [0, 0], sizes = [8, 8], strides = [1, 1]} : vector<16x8xf32> to vector<8x8xf32>
    %635 = vector.extract_strided_slice %625 {offsets = [0, 0], sizes = [8, 8], strides = [1, 1]} : vector<16x8xf32> to vector<8x8xf32>
    %636 = vector.extract_strided_slice %633 {offsets = [0, 0], sizes = [8, 8], strides = [1, 1]} : vector<16x8xf32> to vector<8x8xf32>
    %cst_380 = arith.constant dense<0.000000e+00> : vector<8x8xf32>
    %637 = tpu.matmul %634, %635, %cst_380 {dimension_numbers = #tpu.dot_dimension_numbers<[1], [1], [0], [0], [0, 0, 1, 0], [], []>} : vector<8x8xf32>, vector<8x8xf32>, vector<8x8xf32> -> vector<8x8xf32>
    %638 = vector.broadcast %44 : vector<1x8xf32> to vector<8x8xf32>
    %639 = arith.addf %637, %638 : vector<8x8xf32>
    %cst_381 = arith.constant dense<0xFF800000> : vector<8xf32>
    %640 = vector.multi_reduction <maximumf>, %639, %cst_381 [1] : vector<8x8xf32> to vector<8xf32>
    %641 = vector.shape_cast %640 : vector<8xf32> to vector<8x1xf32>
    %642 = vector.broadcast %641 : vector<8x1xf32> to vector<8x8xf32>
    %643 = arith.subf %639, %642 : vector<8x8xf32>
    %644 = math.exp %643 : vector<8x8xf32>
    %cst_382 = arith.constant dense<0.000000e+00> : vector<8xf32>
    %645 = vector.multi_reduction <add>, %644, %cst_382 [1] : vector<8x8xf32> to vector<8xf32>
    %646 = vector.shape_cast %645 : vector<8xf32> to vector<8x1xf32>
    %647 = tpu.reciprocal %646 {approx = true} : vector<8x1xf32> -> vector<8x1xf32>
    %648 = vector.broadcast %647 : vector<8x1xf32> to vector<8x8xf32>
    %649 = arith.mulf %644, %648 : vector<8x8xf32>
    %cst_383 = arith.constant dense<0.000000e+00> : vector<8x8xf32>
    %650 = tpu.matmul %649, %636, %cst_383 {dimension_numbers = #tpu.dot_dimension_numbers<[1], [0], [0], [1], [0, 0, 1, 1], [], []>} : vector<8x8xf32>, vector<8x8xf32>, vector<8x8xf32> -> vector<8x8xf32>
    %651 = vector.extract_strided_slice %617 {offsets = [8, 0], sizes = [8, 8], strides = [1, 1]} : vector<16x8xf32> to vector<8x8xf32>
    %652 = vector.extract_strided_slice %625 {offsets = [8, 0], sizes = [8, 8], strides = [1, 1]} : vector<16x8xf32> to vector<8x8xf32>
    %653 = vector.extract_strided_slice %633 {offsets = [8, 0], sizes = [8, 8], strides = [1, 1]} : vector<16x8xf32> to vector<8x8xf32>
    %cst_384 = arith.constant dense<0.000000e+00> : vector<8x8xf32>
    %654 = tpu.matmul %651, %652, %cst_384 {dimension_numbers = #tpu.dot_dimension_numbers<[1], [1], [0], [0], [0, 0, 1, 0], [], []>} : vector<8x8xf32>, vector<8x8xf32>, vector<8x8xf32> -> vector<8x8xf32>
    %655 = vector.broadcast %45 : vector<1x8xf32> to vector<8x8xf32>
    %656 = arith.addf %654, %655 : vector<8x8xf32>
    %cst_385 = arith.constant dense<0xFF800000> : vector<8xf32>
    %657 = vector.multi_reduction <maximumf>, %656, %cst_385 [1] : vector<8x8xf32> to vector<8xf32>
    %658 = vector.shape_cast %657 : vector<8xf32> to vector<8x1xf32>
    %659 = vector.broadcast %658 : vector<8x1xf32> to vector<8x8xf32>
    %660 = arith.subf %656, %659 : vector<8x8xf32>
    %661 = math.exp %660 : vector<8x8xf32>
    %cst_386 = arith.constant dense<0.000000e+00> : vector<8xf32>
    %662 = vector.multi_reduction <add>, %661, %cst_386 [1] : vector<8x8xf32> to vector<8xf32>
    %663 = vector.shape_cast %662 : vector<8xf32> to vector<8x1xf32>
    %664 = tpu.reciprocal %663 {approx = true} : vector<8x1xf32> -> vector<8x1xf32>
    %665 = vector.broadcast %664 : vector<8x1xf32> to vector<8x8xf32>
    %666 = arith.mulf %661, %665 : vector<8x8xf32>
    %cst_387 = arith.constant dense<0.000000e+00> : vector<8x8xf32>
    %667 = tpu.matmul %666, %653, %cst_387 {dimension_numbers = #tpu.dot_dimension_numbers<[1], [0], [0], [1], [0, 0, 1, 1], [], []>} : vector<8x8xf32>, vector<8x8xf32>, vector<8x8xf32> -> vector<8x8xf32>
    %668 = tpu.concatenate %650, %667 in 0 : vector<8x8xf32>, vector<8x8xf32> -> vector<16x8xf32>
    %669 = arith.truncf %668 : vector<16x8xf32> to vector<16x8xbf16>
    %c1_388 = arith.constant 1 : index
    %c3_389 = arith.constant 3 : index
    %c0_390 = arith.constant 0 : index
    %c0_391 = arith.constant 0 : index
    %670 = vector.load %arg14[%c1_388, %c3_389, %c0_390, %c0_391] : memref<2x4x8x32xbf16, #tpu.memory_space<vmem>>, vector<1x1x8x32xbf16>
    %671 = vector.shape_cast %670 : vector<1x1x8x32xbf16> to vector<8x32xbf16>
    %cst_392 = arith.constant dense<0.000000e+00> : vector<16x32xf32>
    %672 = tpu.matmul %669, %671, %cst_392 {dimension_numbers = #tpu.dot_dimension_numbers<[1], [0], [0], [1], [0, 0, 1, 1], [], []>} : vector<16x8xbf16>, vector<8x32xbf16>, vector<16x32xf32> -> vector<16x32xf32>
    %673 = arith.addf %609, %672 : vector<16x32xf32>
    %674 = arith.addf %416, %673 : vector<16x32xf32>
    %c1_393 = arith.constant 1 : index
    %c0_394 = arith.constant 0 : index
    %c0_395 = arith.constant 0 : index
    %675 = vector.load %arg15[%c1_393, %c0_394, %c0_395] : memref<2x1x32xf32, #tpu.memory_space<vmem>>, vector<1x1x32xf32>
    %676 = vector.shape_cast %675 : vector<1x1x32xf32> to vector<1x32xf32>
    %677 = vector.broadcast %676 : vector<1x32xf32> to vector<16x32xf32>
    %678 = arith.addf %674, %677 : vector<16x32xf32>
    %c1_396 = arith.constant 1 : index
    %c0_397 = arith.constant 0 : index
    %c0_398 = arith.constant 0 : index
    %679 = vector.load %arg16[%c1_396, %c0_397, %c0_398] : memref<2x1x32xf32, #tpu.memory_space<vmem>>, vector<1x1x32xf32>
    %680 = vector.shape_cast %679 : vector<1x1x32xf32> to vector<1x32xf32>
    %c1_399 = arith.constant 1 : index
    %c0_400 = arith.constant 0 : index
    %c0_401 = arith.constant 0 : index
    %681 = vector.load %arg17[%c1_399, %c0_400, %c0_401] : memref<2x1x32xf32, #tpu.memory_space<vmem>>, vector<1x1x32xf32>
    %682 = vector.shape_cast %681 : vector<1x1x32xf32> to vector<1x32xf32>
    %cst_402 = arith.constant dense<0.000000e+00> : vector<16xf32>
    %683 = vector.multi_reduction <add>, %678, %cst_402 [1] : vector<16x32xf32> to vector<16xf32>
    %684 = vector.shape_cast %683 : vector<16xf32> to vector<16x1xf32>
    %cst_403 = arith.constant 3.200000e+01 : f32
    %685 = vector.broadcast %cst_403 : f32 to vector<16x1xf32>
    %686 = arith.divf %684, %685 : vector<16x1xf32>
    %687 = vector.broadcast %686 : vector<16x1xf32> to vector<16x32xf32>
    %688 = arith.subf %678, %687 : vector<16x32xf32>
    %689 = arith.mulf %688, %688 : vector<16x32xf32>
    %cst_404 = arith.constant dense<0.000000e+00> : vector<16xf32>
    %690 = vector.multi_reduction <add>, %689, %cst_404 [1] : vector<16x32xf32> to vector<16xf32>
    %691 = vector.shape_cast %690 : vector<16xf32> to vector<16x1xf32>
    %cst_405 = arith.constant 3.200000e+01 : f32
    %692 = vector.broadcast %cst_405 : f32 to vector<16x1xf32>
    %693 = arith.divf %691, %692 : vector<16x1xf32>
    %694 = vector.broadcast %686 : vector<16x1xf32> to vector<16x32xf32>
    %695 = arith.subf %678, %694 : vector<16x32xf32>
    %cst_406 = arith.constant 9.99999996E-13 : f32
    %696 = vector.broadcast %cst_406 : f32 to vector<16x1xf32>
    %697 = arith.addf %693, %696 : vector<16x1xf32>
    %698 = math.rsqrt %697 : vector<16x1xf32>
    %699 = vector.broadcast %698 : vector<16x1xf32> to vector<16x32xf32>
    %700 = arith.mulf %695, %699 : vector<16x32xf32>
    %701 = vector.broadcast %680 : vector<1x32xf32> to vector<16x32xf32>
    %702 = arith.mulf %700, %701 : vector<16x32xf32>
    %703 = vector.broadcast %682 : vector<1x32xf32> to vector<16x32xf32>
    %704 = arith.addf %702, %703 : vector<16x32xf32>
    %c1_407 = arith.constant 1 : index
    %c0_408 = arith.constant 0 : index
    %c0_409 = arith.constant 0 : index
    %705 = vector.load %arg18[%c1_407, %c0_408, %c0_409] : memref<2x32x64xbf16, #tpu.memory_space<vmem>>, vector<1x32x64xbf16>
    %706 = vector.shape_cast %705 : vector<1x32x64xbf16> to vector<32x64xbf16>
    %c1_410 = arith.constant 1 : index
    %c0_411 = arith.constant 0 : index
    %c0_412 = arith.constant 0 : index
    %707 = vector.load %arg19[%c1_410, %c0_411, %c0_412] : memref<2x1x64xf32, #tpu.memory_space<vmem>>, vector<1x1x64xf32>
    %708 = vector.shape_cast %707 : vector<1x1x64xf32> to vector<1x64xf32>
    %709 = arith.truncf %704 : vector<16x32xf32> to vector<16x32xbf16>
    %cst_413 = arith.constant dense<0.000000e+00> : vector<16x64xf32>
    %710 = tpu.matmul %709, %706, %cst_413 {dimension_numbers = #tpu.dot_dimension_numbers<[1], [0], [0], [1], [0, 0, 1, 1], [], []>} : vector<16x32xbf16>, vector<32x64xbf16>, vector<16x64xf32> -> vector<16x64xf32>
    %711 = vector.broadcast %708 : vector<1x64xf32> to vector<16x64xf32>
    %712 = arith.addf %710, %711 : vector<16x64xf32>
    %cst_414 = arith.constant 5.000000e-01 : f32
    %713 = vector.broadcast %cst_414 : f32 to vector<16x64xf32>
    %714 = arith.mulf %713, %712 : vector<16x64xf32>
    %cst_415 = arith.constant 0.707106769 : f32
    %715 = vector.broadcast %cst_415 : f32 to vector<16x64xf32>
    %716 = arith.mulf %712, %715 : vector<16x64xf32>
    %717 = math.absf %716 : vector<16x64xf32>
    %cst_416 = arith.constant 0.327591091 : f32
    %718 = vector.broadcast %cst_416 : f32 to vector<16x64xf32>
    %719 = arith.mulf %718, %717 : vector<16x64xf32>
    %cst_417 = arith.constant 1.000000e+00 : f32
    %720 = vector.broadcast %cst_417 : f32 to vector<16x64xf32>
    %721 = arith.addf %720, %719 : vector<16x64xf32>
    %cst_418 = arith.constant 1.000000e+00 : f32
    %722 = vector.broadcast %cst_418 : f32 to vector<16x64xf32>
    %723 = arith.divf %722, %721 : vector<16x64xf32>
    %cst_419 = arith.constant 1.06140542 : f32
    %724 = vector.broadcast %cst_419 : f32 to vector<16x64xf32>
    %725 = arith.mulf %724, %723 : vector<16x64xf32>
    %cst_420 = arith.constant -1.45315206 : f32
    %726 = vector.broadcast %cst_420 : f32 to vector<16x64xf32>
    %727 = arith.addf %725, %726 : vector<16x64xf32>
    %728 = arith.mulf %727, %723 : vector<16x64xf32>
    %cst_421 = arith.constant 1.42141378 : f32
    %729 = vector.broadcast %cst_421 : f32 to vector<16x64xf32>
    %730 = arith.addf %728, %729 : vector<16x64xf32>
    %731 = arith.mulf %730, %723 : vector<16x64xf32>
    %cst_422 = arith.constant -0.284496725 : f32
    %732 = vector.broadcast %cst_422 : f32 to vector<16x64xf32>
    %733 = arith.addf %731, %732 : vector<16x64xf32>
    %734 = arith.mulf %733, %723 : vector<16x64xf32>
    %cst_423 = arith.constant 0.254829586 : f32
    %735 = vector.broadcast %cst_423 : f32 to vector<16x64xf32>
    %736 = arith.addf %734, %735 : vector<16x64xf32>
    %737 = arith.mulf %736, %723 : vector<16x64xf32>
    %cst_424 = arith.constant 0.000000e+00 : f32
    %738 = vector.broadcast %cst_424 : f32 to vector<16x64xf32>
    %739 = arith.subf %738, %717 : vector<16x64xf32>
    %740 = arith.mulf %739, %717 : vector<16x64xf32>
    %741 = math.exp %740 : vector<16x64xf32>
    %742 = arith.mulf %737, %741 : vector<16x64xf32>
    %cst_425 = arith.constant 1.000000e+00 : f32
    %743 = vector.broadcast %cst_425 : f32 to vector<16x64xf32>
    %744 = arith.subf %743, %742 : vector<16x64xf32>
    %cst_426 = arith.constant 0.000000e+00 : f32
    %745 = vector.broadcast %cst_426 : f32 to vector<16x64xf32>
    %746 = arith.cmpf oge, %716, %745 : vector<16x64xf32>
    %cst_427 = arith.constant 0.000000e+00 : f32
    %747 = vector.broadcast %cst_427 : f32 to vector<16x64xf32>
    %748 = arith.subf %747, %744 : vector<16x64xf32>
    %749 = arith.select %746, %744, %748 : vector<16x64xi1>, vector<16x64xf32>
    %cst_428 = arith.constant 1.000000e+00 : f32
    %750 = vector.broadcast %cst_428 : f32 to vector<16x64xf32>
    %751 = arith.addf %750, %749 : vector<16x64xf32>
    %752 = arith.mulf %714, %751 : vector<16x64xf32>
    %c1_429 = arith.constant 1 : index
    %c0_430 = arith.constant 0 : index
    %c0_431 = arith.constant 0 : index
    %753 = vector.load %arg20[%c1_429, %c0_430, %c0_431] : memref<2x64x32xbf16, #tpu.memory_space<vmem>>, vector<1x64x32xbf16>
    %754 = vector.shape_cast %753 : vector<1x64x32xbf16> to vector<64x32xbf16>
    %c1_432 = arith.constant 1 : index
    %c0_433 = arith.constant 0 : index
    %c0_434 = arith.constant 0 : index
    %755 = vector.load %arg21[%c1_432, %c0_433, %c0_434] : memref<2x1x32xf32, #tpu.memory_space<vmem>>, vector<1x1x32xf32>
    %756 = vector.shape_cast %755 : vector<1x1x32xf32> to vector<1x32xf32>
    %757 = arith.truncf %752 : vector<16x64xf32> to vector<16x64xbf16>
    %cst_435 = arith.constant dense<0.000000e+00> : vector<16x32xf32>
    %758 = tpu.matmul %757, %754, %cst_435 {dimension_numbers = #tpu.dot_dimension_numbers<[1], [0], [0], [1], [0, 0, 1, 1], [], []>} : vector<16x64xbf16>, vector<64x32xbf16>, vector<16x32xf32> -> vector<16x32xf32>
    %759 = vector.broadcast %756 : vector<1x32xf32> to vector<16x32xf32>
    %760 = arith.addf %758, %759 : vector<16x32xf32>
    %761 = arith.addf %704, %760 : vector<16x32xf32>
    %c1_436 = arith.constant 1 : index
    %c0_437 = arith.constant 0 : index
    %c0_438 = arith.constant 0 : index
    %762 = vector.load %arg22[%c1_436, %c0_437, %c0_438] : memref<2x1x32xf32, #tpu.memory_space<vmem>>, vector<1x1x32xf32>
    %763 = vector.shape_cast %762 : vector<1x1x32xf32> to vector<1x32xf32>
    %c1_439 = arith.constant 1 : index
    %c0_440 = arith.constant 0 : index
    %c0_441 = arith.constant 0 : index
    %764 = vector.load %arg23[%c1_439, %c0_440, %c0_441] : memref<2x1x32xf32, #tpu.memory_space<vmem>>, vector<1x1x32xf32>
    %765 = vector.shape_cast %764 : vector<1x1x32xf32> to vector<1x32xf32>
    %cst_442 = arith.constant dense<0.000000e+00> : vector<16xf32>
    %766 = vector.multi_reduction <add>, %761, %cst_442 [1] : vector<16x32xf32> to vector<16xf32>
    %767 = vector.shape_cast %766 : vector<16xf32> to vector<16x1xf32>
    %cst_443 = arith.constant 3.200000e+01 : f32
    %768 = vector.broadcast %cst_443 : f32 to vector<16x1xf32>
    %769 = arith.divf %767, %768 : vector<16x1xf32>
    %770 = vector.broadcast %769 : vector<16x1xf32> to vector<16x32xf32>
    %771 = arith.subf %761, %770 : vector<16x32xf32>
    %772 = arith.mulf %771, %771 : vector<16x32xf32>
    %cst_444 = arith.constant dense<0.000000e+00> : vector<16xf32>
    %773 = vector.multi_reduction <add>, %772, %cst_444 [1] : vector<16x32xf32> to vector<16xf32>
    %774 = vector.shape_cast %773 : vector<16xf32> to vector<16x1xf32>
    %cst_445 = arith.constant 3.200000e+01 : f32
    %775 = vector.broadcast %cst_445 : f32 to vector<16x1xf32>
    %776 = arith.divf %774, %775 : vector<16x1xf32>
    %777 = vector.broadcast %769 : vector<16x1xf32> to vector<16x32xf32>
    %778 = arith.subf %761, %777 : vector<16x32xf32>
    %cst_446 = arith.constant 9.99999996E-13 : f32
    %779 = vector.broadcast %cst_446 : f32 to vector<16x1xf32>
    %780 = arith.addf %776, %779 : vector<16x1xf32>
    %781 = math.rsqrt %780 : vector<16x1xf32>
    %782 = vector.broadcast %781 : vector<16x1xf32> to vector<16x32xf32>
    %783 = arith.mulf %778, %782 : vector<16x32xf32>
    %784 = vector.broadcast %763 : vector<1x32xf32> to vector<16x32xf32>
    %785 = arith.mulf %783, %784 : vector<16x32xf32>
    %786 = vector.broadcast %765 : vector<1x32xf32> to vector<16x32xf32>
    %787 = arith.addf %785, %786 : vector<16x32xf32>
    %788 = vector.extract_strided_slice %787 {offsets = [0, 0], sizes = [1, 32], strides = [1, 1]} : vector<16x32xf32> to vector<1x32xf32>
    %789 = vector.extract_strided_slice %787 {offsets = [8, 0], sizes = [1, 32], strides = [1, 1]} : vector<16x32xf32> to vector<1x32xf32>
    %790 = tpu.concatenate %788, %789 in 0 : vector<1x32xf32>, vector<1x32xf32> -> vector<2x32xf32>
    %c0_447 = arith.constant 0 : index
    %c0_448 = arith.constant 0 : index
    %791 = vector.load %arg24[%c0_447, %c0_448] : memref<32x32xbf16, #tpu.memory_space<vmem>>, vector<32x32xbf16>
    %c0_449 = arith.constant 0 : index
    %c0_450 = arith.constant 0 : index
    %792 = vector.load %arg25[%c0_449, %c0_450] : memref<1x32xf32, #tpu.memory_space<vmem>>, vector<1x32xf32>
    %793 = arith.truncf %790 : vector<2x32xf32> to vector<2x32xbf16>
    %cst_451 = arith.constant dense<0.000000e+00> : vector<2x32xf32>
    %794 = tpu.matmul %793, %791, %cst_451 {dimension_numbers = #tpu.dot_dimension_numbers<[1], [0], [0], [1], [0, 0, 1, 1], [], []>} : vector<2x32xbf16>, vector<32x32xbf16>, vector<2x32xf32> -> vector<2x32xf32>
    %795 = vector.broadcast %792 : vector<1x32xf32> to vector<2x32xf32>
    %796 = arith.addf %794, %795 : vector<2x32xf32>
    %797 = math.tanh %796 : vector<2x32xf32>
    %c0_452 = arith.constant 0 : index
    %c0_453 = arith.constant 0 : index
    %798 = vector.load %arg26[%c0_452, %c0_453] : memref<32x128xbf16, #tpu.memory_space<vmem>>, vector<32x128xbf16>
    %c0_454 = arith.constant 0 : index
    %c0_455 = arith.constant 0 : index
    %799 = vector.load %arg27[%c0_454, %c0_455] : memref<1x128xf32, #tpu.memory_space<vmem>>, vector<1x128xf32>
    %800 = arith.truncf %797 : vector<2x32xf32> to vector<2x32xbf16>
    %cst_456 = arith.constant dense<0.000000e+00> : vector<2x128xf32>
    %801 = tpu.matmul %800, %798, %cst_456 {dimension_numbers = #tpu.dot_dimension_numbers<[1], [0], [0], [1], [0, 0, 1, 1], [], []>} : vector<2x32xbf16>, vector<32x128xbf16>, vector<2x128xf32> -> vector<2x128xf32>
    %802 = vector.broadcast %799 : vector<1x128xf32> to vector<2x128xf32>
    %803 = arith.addf %801, %802 : vector<2x128xf32>
    %c0_457 = arith.constant 0 : index
    %c0_458 = arith.constant 0 : index
    %804 = vector.load %arg28[%c0_457, %c0_458] : memref<2x128xf32, #tpu.memory_space<vmem>>, vector<2x128xf32>
    tpu.vector_store %arg28[%c0_457, %c0_458], %803 {strides = array<i32>} : memref<2x128xf32, #tpu.memory_space<vmem>>, vector<2x128xf32>,
    return
  }
  func.func @transform_0(%arg0: i32) -> (i32, i32) {
    %c0_i32 = arith.constant 0 : i32
    %c0_i32_0 = arith.constant 0 : i32
    %c0_i32_1 = arith.constant 0 : i32
    return %c0_i32, %c0_i32_0 : i32, i32
  }
  func.func @transform_1(%arg0: i32) -> (i32, i32) {
    %c0_i32 = arith.constant 0 : i32
    %c0_i32_0 = arith.constant 0 : i32
    %c0_i32_1 = arith.constant 0 : i32
    return %c0_i32, %c0_i32_0 : i32, i32
  }
  func.func @transform_2(%arg0: i32) -> (i32, i32) {
    %c0_i32 = arith.constant 0 : i32
    %c0_i32_0 = arith.constant 0 : i32
    %c0_i32_1 = arith.constant 0 : i32
    return %c0_i32, %c0_i32_0 : i32, i32
  }
  func.func @transform_3(%arg0: i32) -> (i32, i32) {
    %c0_i32 = arith.constant 0 : i32
    %c0_i32_0 = arith.constant 0 : i32
    %c0_i32_1 = arith.constant 0 : i32
    return %c0_i32, %c0_i32_0 : i32, i32
  }
  func.func @transform_4(%arg0: i32) -> (i32, i32) {
    %c0_i32 = arith.constant 0 : i32
    %c0_i32_0 = arith.constant 0 : i32
    %c0_i32_1 = arith.constant 0 : i32
    return %c0_i32, %c0_i32_0 : i32, i32
  }
  func.func @transform_5(%arg0: i32) -> (i32, i32) {
    %c0_i32 = arith.constant 0 : i32
    %c0_i32_0 = arith.constant 0 : i32
    %c0_i32_1 = arith.constant 0 : i32
    return %c0_i32, %c0_i32_0 : i32, i32
  }
  func.func @transform_6(%arg0: i32) -> (i32, i32) {
    %c0_i32 = arith.constant 0 : i32
    %c0_i32_0 = arith.constant 0 : i32
    %c0_i32_1 = arith.constant 0 : i32
    return %c0_i32, %c0_i32_0 : i32, i32
  }
  func.func @transform_7(%arg0: i32) -> (i32, i32, i32, i32) {
    %c0_i32 = arith.constant 0 : i32
    %c0_i32_0 = arith.constant 0 : i32
    %c0_i32_1 = arith.constant 0 : i32
    %c0_i32_2 = arith.constant 0 : i32
    %c0_i32_3 = arith.constant 0 : i32
    return %c0_i32, %c0_i32_0, %c0_i32_1, %c0_i32_2 : i32, i32, i32, i32
  }
  func.func @transform_8(%arg0: i32) -> (i32, i32, i32, i32) {
    %c0_i32 = arith.constant 0 : i32
    %c0_i32_0 = arith.constant 0 : i32
    %c0_i32_1 = arith.constant 0 : i32
    %c0_i32_2 = arith.constant 0 : i32
    %c0_i32_3 = arith.constant 0 : i32
    return %c0_i32, %c0_i32_0, %c0_i32_1, %c0_i32_2 : i32, i32, i32, i32
  }
  func.func @transform_9(%arg0: i32) -> (i32, i32, i32, i32) {
    %c0_i32 = arith.constant 0 : i32
    %c0_i32_0 = arith.constant 0 : i32
    %c0_i32_1 = arith.constant 0 : i32
    %c0_i32_2 = arith.constant 0 : i32
    %c0_i32_3 = arith.constant 0 : i32
    return %c0_i32, %c0_i32_0, %c0_i32_1, %c0_i32_2 : i32, i32, i32, i32
  }
  func.func @transform_10(%arg0: i32) -> (i32, i32, i32, i32) {
    %c0_i32 = arith.constant 0 : i32
    %c0_i32_0 = arith.constant 0 : i32
    %c0_i32_1 = arith.constant 0 : i32
    %c0_i32_2 = arith.constant 0 : i32
    %c0_i32_3 = arith.constant 0 : i32
    return %c0_i32, %c0_i32_0, %c0_i32_1, %c0_i32_2 : i32, i32, i32, i32
  }
  func.func @transform_11(%arg0: i32) -> (i32, i32, i32, i32) {
    %c0_i32 = arith.constant 0 : i32
    %c0_i32_0 = arith.constant 0 : i32
    %c0_i32_1 = arith.constant 0 : i32
    %c0_i32_2 = arith.constant 0 : i32
    %c0_i32_3 = arith.constant 0 : i32
    return %c0_i32, %c0_i32_0, %c0_i32_1, %c0_i32_2 : i32, i32, i32, i32
  }
  func.func @transform_12(%arg0: i32) -> (i32, i32, i32, i32) {
    %c0_i32 = arith.constant 0 : i32
    %c0_i32_0 = arith.constant 0 : i32
    %c0_i32_1 = arith.constant 0 : i32
    %c0_i32_2 = arith.constant 0 : i32
    %c0_i32_3 = arith.constant 0 : i32
    return %c0_i32, %c0_i32_0, %c0_i32_1, %c0_i32_2 : i32, i32, i32, i32
  }
  func.func @transform_13(%arg0: i32) -> (i32, i32, i32, i32) {
    %c0_i32 = arith.constant 0 : i32
    %c0_i32_0 = arith.constant 0 : i32
    %c0_i32_1 = arith.constant 0 : i32
    %c0_i32_2 = arith.constant 0 : i32
    %c0_i32_3 = arith.constant 0 : i32
    return %c0_i32, %c0_i32_0, %c0_i32_1, %c0_i32_2 : i32, i32, i32, i32
  }
  func.func @transform_14(%arg0: i32) -> (i32, i32, i32) {
    %c0_i32 = arith.constant 0 : i32
    %c0_i32_0 = arith.constant 0 : i32
    %c0_i32_1 = arith.constant 0 : i32
    %c0_i32_2 = arith.constant 0 : i32
    return %c0_i32, %c0_i32_0, %c0_i32_1 : i32, i32, i32
  }
  func.func @transform_15(%arg0: i32) -> (i32, i32, i32) {
    %c0_i32 = arith.constant 0 : i32
    %c0_i32_0 = arith.constant 0 : i32
    %c0_i32_1 = arith.constant 0 : i32
    %c0_i32_2 = arith.constant 0 : i32
    return %c0_i32, %c0_i32_0, %c0_i32_1 : i32, i32, i32
  }
  func.func @transform_16(%arg0: i32) -> (i32, i32, i32) {
    %c0_i32 = arith.constant 0 : i32
    %c0_i32_0 = arith.constant 0 : i32
    %c0_i32_1 = arith.constant 0 : i32
    %c0_i32_2 = arith.constant 0 : i32
    return %c0_i32, %c0_i32_0, %c0_i32_1 : i32, i32, i32
  }
  func.func @transform_17(%arg0: i32) -> (i32, i32, i32) {
    %c0_i32 = arith.constant 0 : i32
    %c0_i32_0 = arith.constant 0 : i32
    %c0_i32_1 = arith.constant 0 : i32
    %c0_i32_2 = arith.constant 0 : i32
    return %c0_i32, %c0_i32_0, %c0_i32_1 : i32, i32, i32
  }
  func.func @transform_18(%arg0: i32) -> (i32, i32, i32) {
    %c0_i32 = arith.constant 0 : i32
    %c0_i32_0 = arith.constant 0 : i32
    %c0_i32_1 = arith.constant 0 : i32
    %c0_i32_2 = arith.constant 0 : i32
    return %c0_i32, %c0_i32_0, %c0_i32_1 : i32, i32, i32
  }
  func.func @transform_19(%arg0: i32) -> (i32, i32, i32) {
    %c0_i32 = arith.constant 0 : i32
    %c0_i32_0 = arith.constant 0 : i32
    %c0_i32_1 = arith.constant 0 : i32
    %c0_i32_2 = arith.constant 0 : i32
    return %c0_i32, %c0_i32_0, %c0_i32_1 : i32, i32, i32
  }
  func.func @transform_20(%arg0: i32) -> (i32, i32, i32) {
    %c0_i32 = arith.constant 0 : i32
    %c0_i32_0 = arith.constant 0 : i32
    %c0_i32_1 = arith.constant 0 : i32
    %c0_i32_2 = arith.constant 0 : i32
    return %c0_i32, %c0_i32_0, %c0_i32_1 : i32, i32, i32
  }
  func.func @transform_21(%arg0: i32) -> (i32, i32, i32) {
    %c0_i32 = arith.constant 0 : i32
    %c0_i32_0 = arith.constant 0 : i32
    %c0_i32_1 = arith.constant 0 : i32
    %c0_i32_2 = arith.constant 0 : i32
    return %c0_i32, %c0_i32_0, %c0_i32_1 : i32, i32, i32
  }
  func.func @transform_22(%arg0: i32) -> (i32, i32, i32) {
    %c0_i32 = arith.constant 0 : i32
    %c0_i32_0 = arith.constant 0 : i32
    %c0_i32_1 = arith.constant 0 : i32
    %c0_i32_2 = arith.constant 0 : i32
    return %c0_i32, %c0_i32_0, %c0_i32_1 : i32, i32, i32
  }
  func.func @transform_23(%arg0: i32) -> (i32, i32) {
    %c0_i32 = arith.constant 0 : i32
    %c0_i32_0 = arith.constant 0 : i32
    %c0_i32_1 = arith.constant 0 : i32
    return %c0_i32, %c0_i32_0 : i32, i32
  }
  func.func @transform_24(%arg0: i32) -> (i32, i32) {
    %c0_i32 = arith.constant 0 : i32
    %c0_i32_0 = arith.constant 0 : i32
    %c0_i32_1 = arith.constant 0 : i32
    return %c0_i32, %c0_i32_0 : i32, i32
  }
  func.func @transform_25(%arg0: i32) -> (i32, i32) {
    %c0_i32 = arith.constant 0 : i32
    %c0_i32_0 = arith.constant 0 : i32
    %c0_i32_1 = arith.constant 0 : i32
    return %c0_i32, %c0_i32_0 : i32, i32
  }
  func.func @transform_26(%arg0: i32) -> (i32, i32) {
    %c0_i32 = arith.constant 0 : i32
    %c0_i32_0 = arith.constant 0 : i32
    %c0_i32_1 = arith.constant 0 : i32
    return %c0_i32, %c0_i32_0 : i32, i32
  }
  func.func @transform_27(%arg0: i32) -> (i32, i32) {
    %c0_i32 = arith.constant 0 : i32
    %c0_i32_0 = arith.constant 0 : i32
    %c0_i32_1 = arith.constant 0 : i32
    return %c0_i32, %c0_i32_0 : i32, i32
  }
}

</mosaic_0001>

<bundles_post_ra>
// kernel: _lambda_.1
= control target key start
LH: loop header
LB: loop body
LE: loop exit
PB: predicated region body
PF: predicated region fallthrough
CT: control target
= control target key end

     0   :  { %s7873_s0 = inlined_call_operand.vmem [shape: s32[16,1], index: 0, kind: input, shape index: {}]   ;;  %s7874_s1 = inlined_call_operand.vmem [shape: s32[2,8], index: 1, kind: input, shape index: {}]   ;;  %s7875_s2 = inlined_call_operand.vmem [shape: f32[64,32], index: 2, kind: input, shape index: {}]   ;;  %s7876_s3 = inlined_call_operand.vmem [shape: f32[16,32], index: 3, kind: input, shape index: {}]   ;;  %s7877_s4 = inlined_call_operand.vmem [shape: f32[2,32], index: 4, kind: input, shape index: {}]   ;;  %s7878_s5 = inlined_call_operand.vmem [shape: f32[1,32], index: 5, kind: input, shape index: {}]   ;;  %s7879_s6 = inlined_call_operand.vmem [shape: f32[1,32], index: 6, kind: input, shape index: {}]   ;;  %s7880_s7 = inlined_call_operand.vmem [shape: bf16[2,4,32,8], index: 7, kind: input, shape index: {}]   ;;  %s7881_s8 = inlined_call_operand.vmem [shape: f32[2,4,1,8], index: 8, kind: input, shape index: {}]   ;;  %s7882_s9 = inlined_call_operand.vmem [shape: bf16[2,4,32,8], index: 9, kind: input, shape index: {}]   ;;  %s7883_s10 = inlined_call_operand.vmem [shape: f32[2,4,1,8], index: 10, kind: input, shape index: {}]   ;;  %s7884_s11 = inlined_call_operand.vmem [shape: bf16[2,4,32,8], index: 11, kind: input, shape index: {}]   ;;  %s7885_s12 = inlined_call_operand.vmem [shape: f32[2,4,1,8], index: 12, kind: input, shape index: {}]   ;;  %s7886_s13 = inlined_call_operand.vmem [shape: bf16[2,4,8,32], index: 13, kind: input, shape index: {}]   ;;  %s7887_s14 = inlined_call_operand.vmem [shape: f32[2,1,32], index: 14, kind: input, shape index: {}]   ;;  %s7888_s15 = inlined_call_operand.vmem [shape: f32[2,1,32], index: 15, kind: input, shape index: {}]   ;;  %s7889_s16 = inlined_call_operand.vmem [shape: f32[2,1,32], index: 16, kind: input, shape index: {}]   ;;  %s7890_s17 = inlined_call_operand.vmem [shape: bf16[2,32,64], index: 17, kind: input, shape index: {}]   ;;  %s7891_s18 = inlined_call_operand.vmem [shape: f32[2,1,64], index: 18, kind: input, shape index: {}]   ;;  %s7892_s19 = inlined_call_operand.vmem [shape: bf16[2,64,32], index: 19, kind: input, shape index: {}]   ;;  %s7893_s20 = inlined_call_operand.vmem [shape: f32[2,1,32], index: 20, kind: input, shape index: {}]   ;;  %s7894_s21 = inlined_call_operand.vmem [shape: f32[2,1,32], index: 21, kind: input, shape index: {}]   ;;  %s7895_s22 = inlined_call_operand.vmem [shape: f32[2,1,32], index: 22, kind: input, shape index: {}]   ;;  %s7896_s23 = inlined_call_operand.vmem [shape: bf16[32,32], index: 23, kind: input, shape index: {}]   ;;  %s7897_s24 = inlined_call_operand.vmem [shape: f32[1,32], index: 24, kind: input, shape index: {}]   ;;  %s7898_s25 = inlined_call_operand.vmem [shape: bf16[32,128], index: 25, kind: input, shape index: {}]   ;;  %s7899_s26 = inlined_call_operand.vmem [shape: f32[1,128], index: 26, kind: input, shape index: {}]   ;;  %s7900_s27 = inlined_call_operand.hbm [shape: f32[2,128], index: 27, kind: output, shape index: {}]  }
   0x1   :  { %7909 = sst [smem:[#allocation5_spill]] %s7873_s0 }
   0x2   :  { %7910 = sst [smem:[#allocation6_spill]] %s7874_s1 }
   0x3   :  { %7911 = sst [smem:[#allocation7_spill]] %s7875_s2 }
   0x4   :  { %7912 = sst [smem:[#allocation8_spill]] %s7876_s3 }
   0x5   :  { %7913 = sst [smem:[#allocation9_spill]] %s7877_s4 }
   0x6   :  { %7914 = sst [smem:[#allocation10_spill]] %s7878_s5 }
   0x7   :  { %7915 = sst [smem:[#allocation11_spill]] %s7879_s6 }
   0x8   :  { %7916 = sst [smem:[#allocation12_spill]] %s7880_s7 }
   0x9   :  { %7917 = sst [smem:[#allocation13_spill]] %s7881_s8 }
   0xa   :  { %7918 = sst [smem:[#allocation14_spill]] %s7882_s9 }
   0xb   :  { %7919 = sst [smem:[#allocation15_spill]] %s7883_s10 }
   0xc   :  { %7920 = sst [smem:[#allocation16_spill]] %s7884_s11 }
   0xd   :  { %7921 = sst [smem:[#allocation17_spill]] %s7895_s22 }
   0xe   :  { %s7922_s8 = sld [smem:[#allocation5_spill]]  ;;  %s7923_s22 = sld [smem:[#allocation7_spill]]  ;;  %v6790_v2 = vmov 0   ;;  %v90_v6 = vlaneseq  ;;  %v6791_v15 = vmov 0.0  }
   0xf   :  { %6599 = vset.pattern.permute.xlu0 %v6790_v2  ;;  %s7924_s7 = sld [smem:[#allocation6_spill]]  ;;  %6123 = vmatprep.subr.bf16.mxu1 %v6791_v15 }
  0x10   :  { %v6961_v14 = vshrl.u32 %v90_v6, 7 }
  0x12   :  { %v614_v17 = vsub.s32 1, %v6961_v14 }
  0x14   :  { %v88_v0 = vld [vmem:[%s7922_s8] sm:$0xff]  ;;  %v105_v3 = vld [vmem:[%s7923_s22 + $0x8] sm:$0xff]  ;;  %v106_v4 = vld [vmem:[%s7923_s22 + $0x10] sm:$0xff] }
  0x15   :  { %v104_v1 = vld [vmem:[%s7923_s22] sm:$0xff]  ;;  %v107_v5 = vld [vmem:[%s7923_s22 + $0x18] sm:$0xff]  ;;  %93 = vperm.xlu0 %6599, %v88_v0   ;;  %v89_v7 = vld [vmem:[%s7922_s8 + $0x8] sm:$0xff] }
  0x16   :  { %v6579_v8 = vpack.c.bf16 %v105_v3, %v104_v1  ;;  %v6583_v9 = vpack.c.bf16 %v107_v5, %v106_v4  ;;  %v247_v10 = vld [vmem:[%s7924_s7] sm:$0x3]  ;;  %v109_v12 = vld [vmem:[%s7923_s22 + $0x28] sm:$0xff]  ;;  %v110_v18 = vld [vmem:[%s7923_s22 + $0x30] sm:$0xff] }
  0x17   :  { %v108_v11 = vld [vmem:[%s7923_s22 + $0x20] sm:$0xff]  ;;  %v248_v13 = vcvt.s32.f32 %v247_v10  ;;  %v111_v19 = vld [vmem:[%s7923_s22 + $0x38] sm:$0xff] }
  0x18   :  { %6580 = vmatprep.subr.bf16.mxu0 %v6579_v8  ;;  %v6587_v20 = vpack.c.bf16 %v109_v12, %v108_v11  ;;  %v6591_v23 = vpack.c.bf16 %v111_v19, %v110_v18 }
  0x19   :  { %6582 = vmatpush3.bf16.msra.mxu0 %v6579_v8  ;;  %v249_v16 = vsub.f32 1.0, %v248_v13  ;;  %96 = vperm.xlu0 %6599, %v89_v7  }
  0x1a   :  { %6584 = vmatprep.subr.bf16.mxu0 %v6583_v9 }
  0x1b   :  { %v6971_v21 = vmul.f32 -1e+09, %v249_v16 }
  0x1d   :  { %6586 = vmatpush3.bf16.msra.mxu0 %v6583_v9  ;;  %v6974_v22 = vrot.slane %v6971_v21, %v614_v17 }
  0x1e   :  { %6588 = vmatprep.subr.bf16.mxu0 %v6587_v20 }
  0x21   :  { %6590 = vmatpush3.bf16.msra.mxu0 %v6587_v20 }
  0x22   :  { %6592 = vmatprep.subr.bf16.mxu0 %v6591_v23 }
  0x25   :  { %6594 = vmatpush3.bf16.msra.mxu0 %v6591_v23 }
  0x26   :  { %6139 = vmatprep.subr.bf16.mxu0 %v6791_v15 }
  0x27   :  { %32 = vsyncpa [#allocation3], 0  ;;  %v91_v24 = vand.u32 127, %v90_v6  ;;  %vm119_vm0 = vcmask 523264   ;;  %s7925_s1 = sld [smem:[#allocation8_spill]]  ;;  %s7926_s2 = sld [smem:[#allocation9_spill]] }
  0x28   :  { %vm203_vm3 = vcmask 261120   ;;  %s7927_s4 = sld [smem:[#allocation12_spill]]  ;;  %s7928_s5 = sld [smem:[#allocation16_spill]]  ;;  %vm6792_vm4 = vmmov 0   ;;  %v5607_v18 = vld [vmem:[%s7885_s12] ss:$0 sm:$0xff] }
  0x29   :  { %6127 = vmatprep.mubr.msk.bf16.mxu1 %vm6792_vm4, %v6791_v15  ;;  %s7931_s30 = sld [smem:[#allocation14_spill]]  ;;  %s7932_s7 = sld [smem:[#allocation13_spill]]  ;;  %vm451_vm5 = vcmask 64512   ;;  %vm1302_vm6 = vcmask 1043456   ;;  %vm5440_vm11 = vcmask 1040384  }
  0x2a   :  { %s7933_s10 = sld [smem:[#allocation15_spill]]  ;;  %s7934_s22 = sld [smem:[#allocation17_spill]] }
  0x2d   :  { %v112_v29 = vld [vmem:[%s7925_s1] sm:$0xff]  ;;  %s7929_s1 = sld [smem:[#allocation10_spill]] }
  0x2e   :  { %v5594_v30 = vld [vmem:[%s7926_s2] ss:$0 sm:$0xff]  ;;  %v6602_v50 = vld [vmem:[%s7927_s4 + $0x8] sm:$0xff]   ;;  %s7930_s2 = sld [smem:[#allocation11_spill]]  ;;  %v6605_v5 = vld [vmem:[%s7927_s4 + $0x10] sm:$0xff]  }
  0x2f   :  { %v118_v31 = vadd.f32 %v5594_v30, %v112_v29  ;;  %v6600_v48 = vld [vmem:[%s7927_s4] sm:$0xff]   ;;  %v6603_v51 = vld [vmem:[%s7928_s5 + $0x8] sm:$0xff]   ;;  %v6607_v8 = vld [vmem:[%s7927_s4 + $0x18] sm:$0xff]  }
  0x30   :  { %v6601_v49 = vld [vmem:[%s7928_s5] sm:$0xff]   ;;  %6124 = vmatpush3.bf16.msra.mxu1 %v6600_v48  ;;  %v6606_v7 = vld [vmem:[%s7931_s30 + $0x8] sm:$0xff]   ;;  %v6608_v9 = vld [vmem:[%s7928_s5 + $0x10] sm:$0xff]  }
  0x31   :  { %6125 = vmatprep.subr.bf16.mxu1 %v6791_v15  ;;  %v6604_v4 = vld [vmem:[%s7931_s30] sm:$0xff]   ;;  %v6609_v10 = vld [vmem:[%s7928_s5 + $0x18] sm:$0xff]  }
  0x32   :  { %v5599_v17 = vld [vmem:[%s7932_s7] ss:$0 sm:$0xff] }
  0x33   :  { %v5597_v60 = vld [vmem:[%s7929_s1] ss:$0 sm:$0xff] }
  0x34   :  { %6126 = vmatpush3.bf16.msra.mxu1 %v6602_v50  ;;  %v5598_v0 = vld [vmem:[%s7930_s2] ss:$0 sm:$0xff] }
  0x35   :  { %6131 = vmatprep.subr.bf16.mxu1 %v6791_v15 }
  0x94   :  { %v94_v25 = vpop.permute.xlu0 %93 }
  0x95   :  { %vm98_vm1 = vcmp.eq.s32.totalorder %v94_v25, %v91_v24 }
  0x96   :  { %v5592_v26 = vsel %vm98_vm1, 1.0, %v6791_v15 }
  0x97   :  { %6120 = vmatprep.mubr.msk.f32.mxu0 %vm119_vm0, %v5592_v26 }
  0x98   :  { %v97_v27 = vpop.permute.xlu0 %96 }
  0x99   :  { %vm99_vm2 = vcmp.eq.s32.totalorder %v97_v27, %v91_v24  ;;  %v5603_v27 = vld [vmem:[%s7933_s10] ss:$0 sm:$0xff] }
  0x9a   :  { %v5593_v28 = vsel %vm99_vm2, 1.0, %v6791_v15 }
  0x9b   :  { %6121 = vmatmul.mubr.msk.f32.vlgmr.msra.gmra.mrb[0].mxu0 %vm119_vm0, %v5593_v28 }
  0x9c   :  { %6140 = vmatpush3.bf16.msra.mxu0 %v6601_v49  ;;  %6143 = vmatprep.mubr.msk.bf16.mxu0 %vm6792_vm4, %v6791_v15 }
  0x9d   :  { %6141 = vmatprep.subr.bf16.mxu0 %v6791_v15 }
  0xa0   :  { %6142 = vmatpush3.bf16.msra.mxu0 %v6603_v51 }
  0xa1   :  { %6167 = vmatprep.subr.bf16.mxu0 %v6791_v15 }
 0x16e   :  { %v6122_v32 = vpop.f32.mrb[0].mxu0 }
 0x16f   :  { %v192_v33 = vpop.f32.mrb[1].mxu0  ;;  %v198_v35 = vadd.f32 %v6122_v32, %v118_v31 }
 0x170   :  { %v193_v34 = vadd.f32 %v192_v33, %v118_v31 }
 0x171   :  { %v207_v37 = vsel %vm203_vm3, %v198_v35, 0.0 }
 0x172   :  { %v204_v36 = vsel %vm203_vm3, %v193_v34, 0.0 }
 0x173   :  { %205 = vadd.xlane.f32.xlu1 %v204_v36 }
 0x177   :  { %208 = vadd.xlane.f32.xlu1 %v207_v37 }
 0x200   :  { %v206_v38 = vpop.xlane.xlu1 %205 }
 0x201   :  { %v211_v39 = vmul.f32 0.03125, %v206_v38 }
 0x203   :  { %v213_v40 = vsub.f32 %v193_v34, %v211_v39 }
 0x204   :  { %v209_v41 = vpop.xlane.xlu1 %208 }
 0x205   :  { %v212_v42 = vmul.f32 0.03125, %v209_v41  ;;  %v215_v43 = vmul.f32 %v213_v40, %v213_v40 }
 0x207   :  { %v214_v44 = vsub.f32 %v198_v35, %v212_v42  ;;  %v217_v45 = vsel %vm203_vm3, %v215_v43, 0.0  ;;  %v7093_v42 = vld [vmem:[%s7885_s12 + $0x1] ss:$0 sm:$0xff] }
 0x208   :  { %218 = vadd.xlane.f32.xlu0 %v217_v45 }
 0x209   :  { %v216_v46 = vmul.f32 %v214_v44, %v214_v44 }
 0x20b   :  { %v220_v47 = vsel %vm203_vm3, %v216_v46, 0.0  ;;  %v449_v46 = vsub.s32 0, %v6961_v14 }
 0x20c   :  { %221 = vadd.xlane.f32.xlu1 %v220_v47 }
 0x20d   :  { %v7100_v47 = vrot.slane %v6971_v21, %v449_v46 }
 0x295   :  { %v219_v52 = vpop.xlane.xlu0 %218 }
 0x296   :  { %v223_v53 = vmul.f32 0.03125, %v219_v52 }
 0x298   :  { %v225_v54 = vadd.f32 1e-12, %v223_v53 }
 0x299   :  { %v222_v55 = vpop.xlane.xlu1 %221 }
 0x29a   :  { %6664 = vrsqrt.f32 %v225_v54  ;;  %v224_v56 = vmul.f32 0.03125, %v222_v55 }
 0x29c   :  { %v226_v57 = vadd.f32 1e-12, %v224_v56 }
 0x29e   :  { %6666 = vrsqrt.f32 %v226_v57 }
 0x2a4   :  { %v6665_v58 = vpop.eup %6664 }
 0x2a5   :  { %v229_v59 = vmul.f32 %v6665_v58, %v213_v40 }
 0x2a7   :  { %v237_v62 = vmul.f32 %v5597_v60, %v229_v59 }
 0x2a8   :  { %v6667_v61 = vpop.eup %6666 }
 0x2a9   :  { %v230_v63 = vmul.f32 %v6667_v61, %v214_v44  ;;  %v7017_v2 = vadd.f32 %v5598_v0, %v237_v62 }
 0x2ab   :  { %v238_v1 = vmul.f32 %v5597_v60, %v230_v63 }
 0x2ad   :  { %v7019_v3 = vadd.f32 %v5598_v0, %v238_v1 }
 0x2af   :  { %v7029_v6 = vpack.c.bf16 %v7019_v3, %v7017_v2 }
 0x2b1   :  { %6128 = vmatmul.mubr.msk.bf16.vlgmr.msra.gmra.mrb[0].mxu1 %vm203_vm3, %v7029_v6  ;;  %6144 = vmatmul.mubr.msk.bf16.vlgmr.msra.gmra.mrb[4].mxu0 %vm203_vm3, %v7029_v6 }
 0x2b2   :  { %6132 = vmatpush3.bf16.msra.mxu1 %v6604_v4  ;;  %6168 = vmatpush3.bf16.msra.mxu0 %v6605_v5 }
 0x2b3   :  { %6133 = vmatprep.subr.bf16.mxu1 %v6791_v15  ;;  %6169 = vmatprep.subr.bf16.mxu0 %v6791_v15 }
 0x2b4   :  { %6135 = vmatprep.mubr.msk.bf16.mxu1 %vm6792_vm4, %v6791_v15  ;;  %6171 = vmatprep.mubr.msk.bf16.mxu0 %vm6792_vm4, %v6791_v15 }
 0x2b6   :  { %6134 = vmatpush3.bf16.msra.mxu1 %v6606_v7  ;;  %6170 = vmatpush3.bf16.msra.mxu0 %v6607_v8 }
 0x2b7   :  { %6183 = vmatprep.subr.bf16.mxu0 %v6791_v15  ;;  %6147 = vmatprep.subr.mxu1 %v6791_v15 }
 0x2b9   :  { %6136 = vmatmul.mubr.msk.bf16.vlgmr.msra.gmra.mrb[4].mxu1 %vm203_vm3, %v7029_v6  ;;  %6172 = vmatmul.mubr.msk.bf16.vlgmr.msra.gmra.mrb[8].mxu0 %vm203_vm3, %v7029_v6 }
 0x2ba   :  { %6184 = vmatpush3.bf16.msra.mxu0 %v6608_v9  ;;  %6187 = vmatprep.mubr.msk.bf16.mxu0 %vm6792_vm4, %v6791_v15 }
 0x2bb   :  { %6185 = vmatprep.subr.bf16.mxu0 %v6791_v15  ;;  %6149 = vmatprep.mubr.msk.f32.mxu1 %vm6792_vm4, %v6791_v15 }
 0x2be   :  { %6186 = vmatpush3.bf16.msra.mxu0 %v6609_v10  ;;  %v6610_v10 = vld [vmem:[%s7931_s30 + $0x10] sm:$0xff]  }
 0x2bf   :  { %6201 = vmatprep.subr.mxu0 %v6791_v15 }
 0x2c1   :  { %6188 = vmatmul.mubr.msk.bf16.vlgmr.msra.gmra.mrb[12].mxu0 %vm203_vm3, %v7029_v6 }
 0x2c2   :  { %6203 = vmatprep.mubr.msk.f32.mxu0 %vm6792_vm4, %v6791_v15 }
 0x384   :  { %v312_v11 = vpop.f32.mrb[0].mxu1  ;;  %v440_v12 = vpop.f32.mrb[4].mxu0 }
 0x385   :  { %v6129_v13 = vpop.f32.mrb[1].mxu1  ;;  %v6145_v16 = vpop.f32.mrb[5].mxu0  ;;  %v313_v38 = vadd.f32 %v5599_v17, %v312_v11  ;;  %v441_v39 = vadd.f32 %v5607_v18, %v440_v12  ;;  %v6611_v12 = vld [vmem:[%s7931_s30 + $0x18] sm:$0xff]  }
 0x386   :  { %v315_v19 = vpop.f32.mrb[2].mxu1  ;;  %v443_v20 = vpop.f32.mrb[6].mxu0 }
 0x387   :  { %v316_v23 = vadd.f32 %v5599_v17, %v315_v19  ;;  %v444_v24 = vadd.f32 %v5607_v18, %v443_v20  ;;  %v6130_v25 = vpop.f32.mrb[3].mxu1  ;;  %v6146_v26 = vpop.f32.mrb[7].mxu0  ;;  %v5631_v18 = vld [vmem:[%s7933_s10 + $0x1] ss:$0 sm:$0xff] }
 0x388   :  { %v5622_v20 = vld [vmem:[%s7932_s7 + $0x1] ss:$0 sm:$0xff] }
 0x38c   :  { %v376_v28 = vpop.f32.mrb[4].mxu1  ;;  %v7078_v29 = vpop.f32.mrb[8].mxu0 }
 0x38d   :  { %v377_v30 = vadd.f32 %v5603_v27, %v376_v28  ;;  %v6137_v31 = vpop.f32.mrb[5].mxu1  ;;  %v6173_v32 = vpop.f32.mrb[9].mxu0  ;;  %v838_v28 = vadd.f32 %v5622_v20, %v7078_v29 }
 0x38e   :  { %v379_v33 = vpop.f32.mrb[6].mxu1  ;;  %v7080_v34 = vpop.f32.mrb[10].mxu0 }
 0x38f   :  { %v380_v35 = vadd.f32 %v5603_v27, %v379_v33  ;;  %v6138_v36 = vpop.f32.mrb[7].mxu1  ;;  %6148 = vmatpush3.xpose.msk.msra.mxu1 %vm451_vm5, %v377_v30  ;;  %v6174_v37 = vpop.f32.mrb[11].mxu0  ;;  %v841_v31 = vadd.f32 %v5622_v20, %v7080_v34 }
 0x390   :  { %6152 = vmatprep.subr.mxu1 %v6791_v15 }
 0x392   :  { %6150 = vmatmul.mubr.msk.f32.vlgmr.msra.gmra.mrb[8].mxu1 %vm451_vm5, %v313_v38 }
 0x393   :  { %6153 = vmatpush3.msra.mxu1 %v441_v39  ;;  %6154 = vmatprep.mubr.msk.f32.mxu1 %vm6792_vm4, %v6791_v15 }
 0x394   :  { %v7087_v40 = vpop.f32.mrb[12].mxu0  ;;  %6157 = vmatprep.subr.mxu1 %v6791_v15 }
 0x395   :  { %v6189_v41 = vpop.f32.mrb[13].mxu0  ;;  %v970_v30 = vadd.f32 %v7093_v42, %v7087_v40 }
 0x396   :  { %v972_v43 = vpop.f32.mrb[14].mxu0 }
 0x397   :  { %v7096_v44 = vadd.f32 %v7093_v42, %v972_v43  ;;  %v6190_v45 = vpop.f32.mrb[15].mxu0 }
 0x465   :  { %v524_v48 = vpop.f32.mrb[8].mxu1 }
 0x466   :  { %v525_v49 = vadd.f32 %v524_v48, %v7100_v47  ;;  %v6151_v50 = vpop.f32.mrb[9].mxu1 }
 0x468   :  { %v528_v51 = vsel %vm451_vm5, %v525_v49, -inf }
 0x469   :  { %529 = vmax.xlane.f32.xlu1 %v528_v51 }
 0x4f6   :  { %v530_v52 = vpop.xlane.xlu1 %529 }
 0x4f7   :  { %v531_v53 = vsub.f32 %v525_v49, %v530_v52 }
 0x4f9   :  { %v532_v54 = vmul.f32 1.442695, %v531_v53 }
 0x4fb   :  { %6668 = vpow2.f32 %v532_v54 }
 0x505   :  { %v6669_v55 = vpop.eup %6668 }
 0x506   :  { %v534_v56 = vsel %vm451_vm5, %v6669_v55, 0.0 }
 0x507   :  { %535 = vadd.xlane.f32.xlu1 %v534_v56 }
 0x594   :  { %v536_v57 = vpop.xlane.xlu1 %535 }
 0x595   :  { %6670 = vrcp.f32 %v536_v57 }
 0x59f   :  { %v6671_v14 = vpop.eup %6670 }
 0x5a0   :  { %v538_v21 = vmul.f32 %v6671_v14, %v6669_v55  ;;  %v777_v55 = vld [vmem:[%s7886_s13] sm:$0xf] }
 0x5a1   :  { %v1351_v14 = vsel %vm1302_vm6, %v777_v55, 0 }
 0x5a2   :  { %6155 = vmatmul.mubr.msk.f32.vlgmr.msra.gmra.mrb[10].mxu1 %vm451_vm5, %v538_v21  ;;  %v6612_v21 = vld [vmem:[%s7931_s30 + $0x20] sm:$0xff]  }
 0x5a3   :  { %6158 = vmatpush3.xpose.msk.msra.mxu1 %vm451_vm5, %v380_v35  ;;  %6159 = vmatprep.mubr.msk.f32.mxu1 %vm6792_vm4, %v6791_v15 }
 0x5a4   :  { %6162 = vmatprep.subr.mxu1 %v6791_v15 }
 0x5a6   :  { %6160 = vmatmul.mubr.msk.f32.vlgmr.msra.gmra.mrb[12].mxu1 %vm451_vm5, %v316_v23 }
 0x5a7   :  { %6163 = vmatpush3.msra.mxu1 %v444_v24  ;;  %6164 = vmatprep.mubr.msk.f32.mxu1 %vm6792_vm4, %v6791_v15 }
 0x5a8   :  { %6175 = vmatprep.subr.bf16.mxu1 %v6791_v15 }
 0x675   :  { %v7114_v58 = vpop.f32.mrb[10].mxu1 }
 0x676   :  { %v6156_v59 = vpop.f32.mrb[11].mxu1 }
 0x679   :  { %v688_v60 = vpop.f32.mrb[12].mxu1 }
 0x67a   :  { %v689_v61 = vadd.f32 %v688_v60, %v6974_v22  ;;  %v6161_v62 = vpop.f32.mrb[13].mxu1 }
 0x67c   :  { %v692_v63 = vsel %vm451_vm5, %v689_v61, -inf }
 0x67d   :  { %693 = vmax.xlane.f32.xlu1 %v692_v63  ;;  %v6614_v63 = vld [vmem:[%s7927_s4 + $0x20] sm:$0xff]  }
 0x70a   :  { %v694_v0 = vpop.xlane.xlu1 %693 }
 0x70b   :  { %v695_v1 = vsub.f32 %v689_v61, %v694_v0 }
 0x70d   :  { %v696_v4 = vmul.f32 1.442695, %v695_v1 }
 0x70f   :  { %6672 = vpow2.f32 %v696_v4 }
 0x719   :  { %v6673_v5 = vpop.eup %6672 }
 0x71a   :  { %v698_v7 = vsel %vm451_vm5, %v6673_v5, 0.0 }
 0x71b   :  { %699 = vadd.xlane.f32.xlu1 %v698_v7 }
 0x7a8   :  { %v700_v8 = vpop.xlane.xlu1 %699 }
 0x7a9   :  { %6674 = vrcp.f32 %v700_v8 }
 0x7b3   :  { %v6675_v9 = vpop.eup %6674 }
 0x7b4   :  { %v702_v11 = vmul.f32 %v6675_v9, %v6673_v5  ;;  %v6615_v5 = vld [vmem:[%s7927_s4 + $0x28] sm:$0xff]  }
 0x7b6   :  { %6165 = vmatmul.mubr.msk.f32.vlgmr.msra.gmra.mrb[14].mxu1 %vm451_vm5, %v702_v11  ;;  %v5667_v11 = vld [vmem:[%s7933_s10 + $0x2] ss:$0 sm:$0xff] }
 0x7b7   :  { %6176 = vmatpush3.bf16.msra.mxu1 %v6610_v10  ;;  %6179 = vmatprep.mubr.msk.bf16.mxu1 %vm6792_vm4, %v6791_v15  ;;  %v6616_v10 = vld [vmem:[%s7928_s5 + $0x20] sm:$0xff]  }
 0x7b8   :  { %6177 = vmatprep.subr.bf16.mxu1 %v6791_v15 }
 0x7bb   :  { %6178 = vmatpush3.bf16.msra.mxu1 %v6611_v12 }
 0x7bc   :  { %6191 = vmatprep.subr.mxu1 %v6791_v15 }
 0x7be   :  { %6180 = vmatmul.mubr.msk.bf16.vlgmr.msra.gmra.mrb[16].mxu1 %vm203_vm3, %v7029_v6 }
 0x7bf   :  { %6193 = vmatprep.mubr.msk.f32.mxu1 %vm6792_vm4, %v6791_v15 }
 0x889   :  { %v7134_v13 = vpop.f32.mrb[14].mxu1 }
 0x88a   :  { %v776_v16 = vpack.c.bf16 %v7134_v13, %v7114_v58  ;;  %v6166_v17 = vpop.f32.mrb[15].mxu1  ;;  %v5650_v58 = vld [vmem:[%s7886_s13 + $0x4] sm:$0xf]  ;;  %v6617_v13 = vld [vmem:[%s7928_s5 + $0x28] sm:$0xff]  }
 0x88b   :  { %v1304_v59 = vsel %vm1302_vm6, %v5650_v58, 0 }
 0x891   :  { %v903_v19 = vpop.f32.mrb[16].mxu1 }
 0x892   :  { %v904_v23 = vadd.f32 %v5631_v18, %v903_v19  ;;  %v6181_v24 = vpop.f32.mrb[17].mxu1 }
 0x893   :  { %v906_v25 = vpop.f32.mrb[18].mxu1 }
 0x894   :  { %v907_v26 = vadd.f32 %v5631_v18, %v906_v25  ;;  %v6182_v27 = vpop.f32.mrb[19].mxu1  ;;  %6192 = vmatpush3.xpose.msk.msra.mxu1 %vm451_vm5, %v904_v23 }
 0x895   :  { %6196 = vmatprep.subr.mxu1 %v6791_v15 }
 0x896   :  { %6202 = vmatpush3.xpose.msk.msra.mxu0 %vm451_vm5, %v907_v26 }
 0x897   :  { %6194 = vmatmul.mubr.msk.f32.vlgmr.msra.gmra.mrb[20].mxu1 %vm451_vm5, %v838_v28  ;;  %6211 = vmatprep.subr.bf16.mxu0 %v6791_v15 }
 0x898   :  { %6197 = vmatpush3.msra.mxu1 %v970_v30  ;;  %6198 = vmatprep.mubr.msk.f32.mxu1 %vm6792_vm4, %v6791_v15  ;;  %v5658_v30 = vld [vmem:[%s7932_s7 + $0x2] ss:$0 sm:$0xff] }
 0x899   :  { %6204 = vmatmul.mubr.msk.f32.vlgmr.msra.gmra.mrb[2].mxu0 %vm451_vm5, %v841_v31  ;;  %6206 = vmatprep.subr.mxu1 %v6791_v15 }
 0x89a   :  { %6213 = vmatprep.mubr.msk.bf16.mxu0 %vm6792_vm4, %v6791_v15  ;;  %6212 = vmatpush3.bf16.msra.mxu0 %v1304_v59 }
 0x89b   :  { %6223 = vmatprep.subr.bf16.mxu0 %v6791_v15 }
 0x96a   :  { %v1048_v29 = vpop.f32.mrb[20].mxu1 }
 0x96b   :  { %v1049_v32 = vadd.f32 %v1048_v29, %v7100_v47  ;;  %v6195_v33 = vpop.f32.mrb[21].mxu1 }
 0x96c   :  { %v1208_v34 = vpop.f32.mrb[2].mxu0 }
 0x96d   :  { %v1209_v35 = vadd.f32 %v1208_v34, %v6974_v22  ;;  %v6205_v36 = vpop.f32.mrb[3].mxu0  ;;  %v1052_v37 = vsel %vm451_vm5, %v1049_v32, -inf }
 0x96e   :  { %1053 = vmax.xlane.f32.xlu1 %v1052_v37  ;;  %v5676_v36 = vld [vmem:[%s7885_s12 + $0x2] ss:$0 sm:$0xff] }
 0x96f   :  { %v1212_v38 = vsel %vm451_vm5, %v1209_v35, -inf }
 0x972   :  { %1213 = vmax.xlane.f32.xlu1 %v1212_v38 }
 0x9fb   :  { %v1054_v39 = vpop.xlane.xlu1 %1053 }
 0x9fc   :  { %v1055_v40 = vsub.f32 %v1049_v32, %v1054_v39 }
 0x9fe   :  { %v1056_v41 = vmul.f32 1.442695, %v1055_v40 }
 0x9ff   :  { %v1214_v42 = vpop.xlane.xlu1 %1213 }
 0xa00   :  { %6676 = vpow2.f32 %v1056_v41  ;;  %v1215_v43 = vsub.f32 %v1209_v35, %v1214_v42 }
 0xa02   :  { %v1216_v45 = vmul.f32 1.442695, %v1215_v43 }
 0xa04   :  { %6678 = vpow2.f32 %v1216_v45 }
 0xa0a   :  { %v6677_v46 = vpop.eup %6676 }
 0xa0b   :  { %v1058_v48 = vsel %vm451_vm5, %v6677_v46, 0.0 }
 0xa0c   :  { %1059 = vadd.xlane.f32.xlu1 %v1058_v48 }
 0xa0e   :  { %v6679_v49 = vpop.eup %6678 }
 0xa0f   :  { %v1218_v50 = vsel %vm451_vm5, %v6679_v49, 0.0 }
 0xa10   :  { %1219 = vadd.xlane.f32.xlu0 %v1218_v50 }
 0xa99   :  { %v1060_v51 = vpop.xlane.xlu1 %1059 }
 0xa9a   :  { %6680 = vrcp.f32 %v1060_v51 }
 0xa9d   :  { %v1220_v52 = vpop.xlane.xlu0 %1219 }
 0xa9e   :  { %6682 = vrcp.f32 %v1220_v52 }
 0xaa4   :  { %v6681_v53 = vpop.eup %6680 }
 0xaa5   :  { %v1062_v54 = vmul.f32 %v6681_v53, %v6677_v46 }
 0xaa7   :  { %6199 = vmatmul.mubr.msk.f32.vlgmr.msra.gmra.mrb[22].mxu1 %vm451_vm5, %v1062_v54 }
 0xaa8   :  { %v6683_v56 = vpop.eup %6682  ;;  %6207 = vmatpush3.msra.mxu1 %v7096_v44  ;;  %6208 = vmatprep.mubr.msk.f32.mxu1 %vm6792_vm4, %v6791_v15  ;;  %v6613_v44 = vld [vmem:[%s7931_s30 + $0x28] sm:$0xff]  }
 0xaa9   :  { %v1222_v57 = vmul.f32 %v6683_v56, %v6679_v49  ;;  %6217 = vmatprep.subr.bf16.mxu1 %v6791_v15 }
 0xaab   :  { %6209 = vmatmul.mubr.msk.f32.vlgmr.msra.gmra.mrb[24].mxu1 %vm451_vm5, %v1222_v57 }
 0xaac   :  { %6218 = vmatpush3.bf16.msra.mxu1 %v1351_v14  ;;  %6219 = vmatprep.mubr.msk.bf16.mxu1 %vm6792_vm4, %v6791_v15 }
 0xaad   :  { %6231 = vmatprep.subr.bf16.mxu1 %v6791_v15 }
 0xaaf   :  { %6220 = vmatmul.mubr.msk.bf16.vlgmr.msra.gmra.mrb[28].mxu1 %vm451_vm5, %v776_v16 }
 0xab0   :  { %6232 = vmatpush3.bf16.msra.mxu1 %v6612_v21  ;;  %6235 = vmatprep.mubr.msk.bf16.mxu1 %vm6792_vm4, %v6791_v15 }
 0xab1   :  { %6233 = vmatprep.subr.bf16.mxu1 %v6791_v15 }
 0xab4   :  { %6234 = vmatpush3.bf16.msra.mxu1 %v6613_v44 }
 0xab5   :  { %6247 = vmatprep.subr.mxu1 %v6791_v15 }
 0xab7   :  { %6236 = vmatmul.mubr.msk.bf16.vlgmr.msra.gmra.mrb[32].mxu1 %vm203_vm3, %v7029_v6 }
 0xab8   :  { %6249 = vmatprep.mubr.msk.f32.mxu1 %vm6792_vm4, %v6791_v15 }
 0xb7a   :  { %v1132_v60 = vpop.f32.mrb[22].mxu1 }
 0xb7b   :  { %v6200_v61 = vpop.f32.mrb[23].mxu1 }
 0xb7e   :  { %v1292_v62 = vpop.f32.mrb[24].mxu1 }
 0xb7f   :  { %v1296_v0 = vpack.c.bf16 %v1292_v62, %v1132_v60  ;;  %v6210_v1 = vpop.f32.mrb[25].mxu1 }
 0xb80   :  { %v6618_v1 = vld [vmem:[%s7927_s4 + $0x30] sm:$0xff]  }
 0xb81   :  { %6214 = vmatmul.mubr.msk.bf16.vlgmr.msra.gmra.mrb[16].mxu0 %vm451_vm5, %v1296_v0 }
 0xb82   :  { %6224 = vmatpush3.bf16.msra.mxu0 %v6614_v63  ;;  %v1387_v4 = vpop.f32.mrb[28].mxu1  ;;  %6227 = vmatprep.mubr.msk.bf16.mxu0 %vm6792_vm4, %v6791_v15 }
 0xb83   :  { %v6221_v7 = vpop.f32.mrb[29].mxu1  ;;  %6225 = vmatprep.subr.bf16.mxu0 %v6791_v15 }
 0xb84   :  { %v1390_v8 = vpop.f32.mrb[30].mxu1  ;;  %v6620_v7 = vld [vmem:[%s7928_s5 + $0x30] sm:$0xff]  }
 0xb85   :  { %v6222_v9 = vpop.f32.mrb[31].mxu1 }
 0xb86   :  { %6226 = vmatpush3.bf16.msra.mxu0 %v6615_v5  ;;  %v6619_v5 = vld [vmem:[%s7927_s4 + $0x38] sm:$0xff]   ;;  %v5686_v9 = vld [vmem:[%s7886_s13 + $0x8] sm:$0xf] }
 0xb87   :  { %6239 = vmatprep.subr.bf16.mxu0 %v6791_v15 }
 0xb89   :  { %6228 = vmatmul.mubr.msk.bf16.vlgmr.msra.gmra.mrb[20].mxu0 %vm203_vm3, %v7029_v6 }
 0xb8a   :  { %6240 = vmatpush3.bf16.msra.mxu0 %v6616_v10  ;;  %v1519_v12 = vpop.f32.mrb[32].mxu1  ;;  %6243 = vmatprep.mubr.msk.bf16.mxu0 %vm6792_vm4, %v6791_v15  ;;  %v1919_v10 = vsel %vm1302_vm6, %v5686_v9, 0 }
 0xb8b   :  { %v1520_v16 = vadd.f32 %v5667_v11, %v1519_v12  ;;  %v6237_v17 = vpop.f32.mrb[33].mxu1  ;;  %6241 = vmatprep.subr.bf16.mxu0 %v6791_v15 }
 0xb8c   :  { %v1522_v18 = vpop.f32.mrb[34].mxu1 }
 0xb8d   :  { %v6238_v19 = vpop.f32.mrb[35].mxu1  ;;  %6248 = vmatpush3.xpose.msk.msra.mxu1 %vm451_vm5, %v1520_v16  ;;  %v1523_v20 = vadd.f32 %v5667_v11, %v1522_v18  ;;  %v6622_v16 = vld [vmem:[%s7931_s30 + $0x30] sm:$0xff]  }
 0xb8e   :  { %6242 = vmatpush3.bf16.msra.mxu0 %v6617_v13  ;;  %6252 = vmatprep.subr.mxu1 %v6791_v15  ;;  %v6623_v19 = vld [vmem:[%s7931_s30 + $0x38] sm:$0xff]  }
 0xb8f   :  { %6257 = vmatprep.subr.mxu0 %v6791_v15 }
 0xb91   :  { %6244 = vmatmul.mubr.msk.bf16.vlgmr.msra.gmra.mrb[24].mxu0 %vm203_vm3, %v7029_v6 }
 0xb92   :  { %6259 = vmatprep.mubr.msk.f32.mxu0 %vm6792_vm4, %v6791_v15 }
 0xb97   :  { %6258 = vmatpush3.xpose.msk.msra.mxu0 %vm451_vm5, %v1523_v20 }
 0xb98   :  { %6267 = vmatprep.subr.bf16.mxu0 %v6791_v15 }
 0xc54   :  { %v1340_v23 = vpop.f32.mrb[16].mxu0 }
 0xc55   :  { %v7235_v24 = vadd.f32 %v1387_v4, %v1340_v23  ;;  %v6215_v25 = vpop.f32.mrb[17].mxu0 }
 0xc56   :  { %v1343_v26 = vpop.f32.mrb[18].mxu0 }
 0xc57   :  { %v7237_v27 = vadd.f32 %v1390_v8, %v1343_v26  ;;  %v6216_v28 = vpop.f32.mrb[19].mxu0  ;;  %v6621_v8 = vld [vmem:[%s7928_s5 + $0x38] sm:$0xff]  }
 0xc5c   :  { %v1453_v31 = vpop.f32.mrb[20].mxu0 }
 0xc5d   :  { %v1454_v29 = vadd.f32 %v5658_v30, %v1453_v31  ;;  %v6229_v32 = vpop.f32.mrb[21].mxu0  ;;  %v5711_v31 = vld [vmem:[%s7885_s12 + $0x3] ss:$0 sm:$0xff] }
 0xc5e   :  { %v1456_v33 = vpop.f32.mrb[22].mxu0 }
 0xc5f   :  { %v1457_v34 = vadd.f32 %v5658_v30, %v1456_v33  ;;  %v6230_v35 = vpop.f32.mrb[23].mxu0  ;;  %6250 = vmatmul.mubr.msk.f32.vlgmr.msra.gmra.mrb[26].mxu1 %vm451_vm5, %v1454_v29 }
 0xc60   :  { %6254 = vmatprep.mubr.msk.f32.mxu1 %vm6792_vm4, %v6791_v15 }
 0xc61   :  { %6260 = vmatmul.mubr.msk.f32.vlgmr.msra.gmra.mrb[28].mxu0 %vm451_vm5, %v1457_v34 }
 0xc62   :  { %6269 = vmatprep.mubr.msk.bf16.mxu0 %vm6792_vm4, %v6791_v15  ;;  %6268 = vmatpush3.bf16.msra.mxu0 %v1919_v10  ;;  %v5721_v10 = vld [vmem:[%s7886_s13 + $0xc] sm:$0xf] }
 0xc63   :  { %6281 = vmatprep.subr.bf16.mxu0 %v6791_v15 }
 0xc64   :  { %v1585_v37 = vpop.f32.mrb[24].mxu0 }
 0xc65   :  { %v1586_v38 = vadd.f32 %v5676_v36, %v1585_v37  ;;  %v6245_v39 = vpop.f32.mrb[25].mxu0 }
 0xc66   :  { %v1588_v40 = vpop.f32.mrb[26].mxu0  ;;  %v5702_v39 = vld [vmem:[%s7933_s10 + $0x3] ss:$0 sm:$0xff] }
 0xc67   :  { %v1589_v41 = vadd.f32 %v5676_v36, %v1588_v40  ;;  %v6246_v42 = vpop.f32.mrb[27].mxu0  ;;  %6253 = vmatpush3.msra.mxu1 %v1586_v38 }
 0xc68   :  { %6262 = vmatprep.subr.mxu1 %v6791_v15 }
 0xd32   :  { %v1664_v43 = vpop.f32.mrb[26].mxu1 }
 0xd33   :  { %v1665_v45 = vadd.f32 %v1664_v43, %v7100_v47  ;;  %v6251_v46 = vpop.f32.mrb[27].mxu1 }
 0xd34   :  { %v1824_v48 = vpop.f32.mrb[28].mxu0 }
 0xd35   :  { %v1825_v49 = vadd.f32 %v1824_v48, %v6974_v22  ;;  %v6261_v50 = vpop.f32.mrb[29].mxu0  ;;  %v1668_v51 = vsel %vm451_vm5, %v1665_v45, -inf }
 0xd36   :  { %1669 = vmax.xlane.f32.xlu1 %v1668_v51 }
 0xd37   :  { %v1828_v52 = vsel %vm451_vm5, %v1825_v49, -inf }
 0xd38   :  { %1829 = vmax.xlane.f32.xlu0 %v1828_v52 }
 0xdc3   :  { %v1670_v53 = vpop.xlane.xlu1 %1669 }
 0xdc4   :  { %v1671_v54 = vsub.f32 %v1665_v45, %v1670_v53 }
 0xdc5   :  { %v1830_v55 = vpop.xlane.xlu0 %1829 }
 0xdc6   :  { %v1672_v56 = vmul.f32 1.442695, %v1671_v54  ;;  %v1831_v57 = vsub.f32 %v1825_v49, %v1830_v55 }
 0xdc8   :  { %6684 = vpow2.f32 %v1672_v56  ;;  %v1832_v14 = vmul.f32 1.442695, %v1831_v57 }
 0xdca   :  { %6686 = vpow2.f32 %v1832_v14 }
 0xdd2   :  { %v6685_v21 = vpop.eup %6684 }
 0xdd3   :  { %v1674_v44 = vsel %vm451_vm5, %v6685_v21, 0.0 }
 0xdd4   :  { %v6687_v58 = vpop.eup %6686  ;;  %1675 = vadd.xlane.f32.xlu1 %v1674_v44 }
 0xdd5   :  { %v1834_v59 = vsel %vm451_vm5, %v6687_v58, 0.0 }
 0xdd6   :  { %1835 = vadd.xlane.f32.xlu0 %v1834_v59 }
 0xe61   :  { %v1676_v60 = vpop.xlane.xlu1 %1675 }
 0xe62   :  { %6688 = vrcp.f32 %v1676_v60 }
 0xe63   :  { %v1836_v61 = vpop.xlane.xlu0 %1835 }
 0xe64   :  { %6690 = vrcp.f32 %v1836_v61 }
 0xe6c   :  { %v6689_v62 = vpop.eup %6688 }
 0xe6d   :  { %v1678_v63 = vmul.f32 %v6689_v62, %v6685_v21 }
 0xe6e   :  { %v6691_v0 = vpop.eup %6690 }
 0xe6f   :  { %6255 = vmatmul.mubr.msk.f32.vlgmr.msra.gmra.mrb[36].mxu1 %vm451_vm5, %v1678_v63  ;;  %v1838_v4 = vmul.f32 %v6691_v0, %v6687_v58 }
 0xe70   :  { %6263 = vmatpush3.msra.mxu1 %v1589_v41  ;;  %6264 = vmatprep.mubr.msk.f32.mxu1 %vm6792_vm4, %v6791_v15  ;;  %v5693_v41 = vld [vmem:[%s7932_s7 + $0x3] ss:$0 sm:$0xff] }
 0xe71   :  { %6273 = vmatprep.subr.bf16.mxu1 %v6791_v15 }
 0xe73   :  { %6265 = vmatmul.mubr.msk.f32.vlgmr.msra.gmra.mrb[38].mxu1 %vm451_vm5, %v1838_v4 }
 0xe74   :  { %6274 = vmatpush3.bf16.msra.mxu1 %v6618_v1  ;;  %6277 = vmatprep.mubr.msk.bf16.mxu1 %vm6792_vm4, %v6791_v15 }
 0xe75   :  { %6275 = vmatprep.subr.bf16.mxu1 %v6791_v15 }
 0xe78   :  { %6276 = vmatpush3.bf16.msra.mxu1 %v6619_v5 }
 0xe79   :  { %6289 = vmatprep.subr.bf16.mxu1 %v6791_v15 }
 0xe7b   :  { %6278 = vmatmul.mubr.msk.bf16.vlgmr.msra.gmra.mrb[40].mxu1 %vm203_vm3, %v7029_v6 }
 0xe7c   :  { %6290 = vmatpush3.bf16.msra.mxu1 %v6620_v7  ;;  %6293 = vmatprep.mubr.msk.bf16.mxu1 %vm6792_vm4, %v6791_v15 }
 0xe7d   :  { %6291 = vmatprep.subr.bf16.mxu1 %v6791_v15 }
 0xe80   :  { %6292 = vmatpush3.bf16.msra.mxu1 %v6621_v8 }
 0xe81   :  { %6307 = vmatprep.subr.mxu1 %v6791_v15 }
 0xe83   :  { %6294 = vmatmul.mubr.msk.bf16.vlgmr.msra.gmra.mrb[44].mxu1 %vm203_vm3, %v7029_v6 }
 0xe84   :  { %6309 = vmatprep.mubr.msk.f32.mxu1 %vm6792_vm4, %v6791_v15 }
 0xf42   :  { %v1748_v11 = vpop.f32.mrb[36].mxu1 }
 0xf43   :  { %v6256_v12 = vpop.f32.mrb[37].mxu1 }
 0xf46   :  { %v1908_v13 = vpop.f32.mrb[38].mxu1 }
 0xf47   :  { %v1912_v17 = vpack.c.bf16 %v1908_v13, %v1748_v11  ;;  %v6266_v18 = vpop.f32.mrb[39].mxu1  ;;  %v2489_v11 = vsel %vm1302_vm6, %v5721_v10, 0 }
 0xf49   :  { %6270 = vmatmul.mubr.msk.bf16.vlgmr.msra.gmra.mrb[32].mxu0 %vm451_vm5, %v1912_v17 }
 0xf4a   :  { %6282 = vmatpush3.bf16.msra.mxu0 %v6622_v16  ;;  %6285 = vmatprep.mubr.msk.bf16.mxu0 %vm6792_vm4, %v6791_v15 }
 0xf4b   :  { %6283 = vmatprep.subr.bf16.mxu0 %v6791_v15 }
 0xf4e   :  { %v2023_v20 = vpop.f32.mrb[40].mxu1  ;;  %6284 = vmatpush3.bf16.msra.mxu0 %v6623_v19 }
 0xf4f   :  { %v6279_v23 = vpop.f32.mrb[41].mxu1  ;;  %6297 = vmatprep.subr.mxu0 %v6791_v15  ;;  %v2024_v48 = vadd.f32 %v5693_v41, %v2023_v20 }
 0xf50   :  { %v2026_v25 = vpop.f32.mrb[42].mxu1 }
 0xf51   :  { %v6280_v26 = vpop.f32.mrb[43].mxu1  ;;  %6286 = vmatmul.mubr.msk.bf16.vlgmr.msra.gmra.mrb[36].mxu0 %vm203_vm3, %v7029_v6  ;;  %v2027_v49 = vadd.f32 %v5693_v41, %v2026_v25 }
 0xf52   :  { %6299 = vmatprep.mubr.msk.f32.mxu0 %vm6792_vm4, %v6791_v15  ;;  %v5723_v26 = vld [vmem:[%s7887_s14] ss:$0 sm:$0xff] }
 0xf56   :  { %v2155_v28 = vpop.f32.mrb[44].mxu1 }
 0xf57   :  { %v6295_v30 = vpop.f32.mrb[45].mxu1 }
 0xf58   :  { %v2158_v29 = vpop.f32.mrb[46].mxu1 }
 0xf59   :  { %v2159_v32 = vadd.f32 %v5711_v31, %v2158_v29  ;;  %v6296_v33 = vpop.f32.mrb[47].mxu1 }
0x101c   :  { %v1955_v34 = vpop.f32.mrb[32].mxu0 }
0x101d   :  { %v7313_v35 = vadd.f32 %v1955_v34, %v7235_v24  ;;  %v6271_v36 = vpop.f32.mrb[33].mxu0 }
0x101e   :  { %v1958_v37 = vpop.f32.mrb[34].mxu0 }
0x101f   :  { %v7316_v6 = vadd.f32 %v1958_v37, %v7237_v27  ;;  %v6272_v38 = vpop.f32.mrb[35].mxu0  ;;  %v2156_v27 = vadd.f32 %v5711_v31, %v2155_v28 }
0x1024   :  { %v2089_v40 = vpop.f32.mrb[36].mxu0 }
0x1025   :  { %v2090_v42 = vadd.f32 %v5702_v39, %v2089_v40  ;;  %v6287_v43 = vpop.f32.mrb[37].mxu0 }
0x1026   :  { %v2092_v45 = vpop.f32.mrb[38].mxu0  ;;  %v6624_v43 = vld [vmem:[%s7890_s17] sm:$0xff]  }
0x1027   :  { %v2093_v24 = vadd.f32 %v5702_v39, %v2092_v45  ;;  %v6288_v46 = vpop.f32.mrb[39].mxu0  ;;  %6298 = vmatpush3.xpose.msk.msra.mxu0 %vm451_vm5, %v2090_v42  ;;  %v6625_v45 = vld [vmem:[%s7890_s17 + $0x8] sm:$0xff]  }
0x1028   :  { %6302 = vmatprep.subr.mxu0 %v6791_v15 }
0x1029   :  { %6308 = vmatpush3.xpose.msk.msra.mxu1 %vm451_vm5, %v2093_v24 }
0x102a   :  { %6300 = vmatmul.mubr.msk.f32.vlgmr.msra.gmra.mrb[30].mxu0 %vm451_vm5, %v2024_v48  ;;  %6317 = vmatprep.subr.bf16.mxu1 %v6791_v15 }
0x102b   :  { %6303 = vmatpush3.msra.mxu0 %v2156_v27  ;;  %6304 = vmatprep.mubr.msk.f32.mxu0 %vm6792_vm4, %v6791_v15 }
0x102c   :  { %6310 = vmatmul.mubr.msk.f32.vlgmr.msra.gmra.mrb[48].mxu1 %vm451_vm5, %v2027_v49  ;;  %6312 = vmatprep.subr.mxu0 %v6791_v15 }
0x102d   :  { %6319 = vmatprep.mubr.msk.bf16.mxu1 %vm6792_vm4, %v6791_v15  ;;  %6318 = vmatpush3.bf16.msra.mxu1 %v2489_v11 }
0x102e   :  { %6331 = vmatprep.subr.bf16.mxu1 %v6791_v15 }
0x10fd   :  { %v2234_v50 = vpop.f32.mrb[30].mxu0 }
0x10fe   :  { %v2235_v51 = vadd.f32 %v2234_v50, %v7100_v47  ;;  %v6301_v52 = vpop.f32.mrb[31].mxu0 }
0x10ff   :  { %v2394_v53 = vpop.f32.mrb[48].mxu1  ;;  %v5724_v52 = vld [vmem:[%s7888_s15] ss:$0 sm:$0xff] }
0x1100   :  { %v2395_v54 = vadd.f32 %v2394_v53, %v6974_v22  ;;  %v6311_v55 = vpop.f32.mrb[49].mxu1  ;;  %v2238_v56 = vsel %vm451_vm5, %v2235_v51, -inf }
0x1101   :  { %2239 = vmax.xlane.f32.xlu1 %v2238_v56 }
0x1102   :  { %v2398_v57 = vsel %vm451_vm5, %v2395_v54, -inf }
0x1103   :  { %2399 = vmax.xlane.f32.xlu0 %v2398_v57  ;;  %v5725_v57 = vld [vmem:[%s7889_s16] ss:$0 sm:$0xff] }
0x118e   :  { %v2240_v14 = vpop.xlane.xlu1 %2239 }
0x118f   :  { %v2241_v21 = vsub.f32 %v2235_v51, %v2240_v14 }
0x1190   :  { %v2400_v44 = vpop.xlane.xlu0 %2399 }
0x1191   :  { %v2242_v58 = vmul.f32 1.442695, %v2241_v21  ;;  %v2401_v59 = vsub.f32 %v2395_v54, %v2400_v44 }
0x1193   :  { %6692 = vpow2.f32 %v2242_v58  ;;  %v2402_v60 = vmul.f32 1.442695, %v2401_v59  ;;  %v6626_v59 = vld [vmem:[%s7892_s19] sm:$0xff]  }
0x1195   :  { %6694 = vpow2.f32 %v2402_v60  ;;  %v6627_v60 = vld [vmem:[%s7892_s19 + $0x8] sm:$0xff]  }
0x119d   :  { %v6693_v61 = vpop.eup %6692 }
0x119e   :  { %v2244_v62 = vsel %vm451_vm5, %v6693_v61, 0.0 }
0x119f   :  { %v6695_v63 = vpop.eup %6694  ;;  %2245 = vadd.xlane.f32.xlu1 %v2244_v62  ;;  %v6629_v62 = vld [vmem:[%s7892_s19 + $0x18] sm:$0xff]  }
0x11a0   :  { %v2404_v0 = vsel %vm451_vm5, %v6695_v63, 0.0 }
0x11a1   :  { %2405 = vadd.xlane.f32.xlu0 %v2404_v0 }
0x122c   :  { %v2246_v1 = vpop.xlane.xlu1 %2245 }
0x122d   :  { %6696 = vrcp.f32 %v2246_v1 }
0x122e   :  { %v2406_v4 = vpop.xlane.xlu0 %2405 }
0x122f   :  { %6698 = vrcp.f32 %v2406_v4 }
0x1237   :  { %v6697_v5 = vpop.eup %6696 }
0x1238   :  { %v2248_v7 = vmul.f32 %v6697_v5, %v6693_v61  ;;  %v6628_v61 = vld [vmem:[%s7892_s19 + $0x10] sm:$0xff]  }
0x1239   :  { %v6699_v8 = vpop.eup %6698 }
0x123a   :  { %6305 = vmatmul.mubr.msk.f32.vlgmr.msra.gmra.mrb[40].mxu0 %vm451_vm5, %v2248_v7  ;;  %v2408_v9 = vmul.f32 %v6699_v8, %v6695_v63  ;;  %v5726_v63 = vld [vmem:[%s7891_s18] ss:$0 sm:$0xff] }
0x123b   :  { %6313 = vmatpush3.msra.mxu0 %v2159_v32  ;;  %6314 = vmatprep.mubr.msk.f32.mxu0 %vm6792_vm4, %v6791_v15 }
0x123c   :  { %6323 = vmatprep.subr.bf16.mxu0 %v6791_v15 }
0x123e   :  { %6315 = vmatmul.mubr.msk.f32.vlgmr.msra.gmra.mrb[42].mxu0 %vm451_vm5, %v2408_v9 }
0x123f   :  { %6327 = vmatprep.mubr.msk.bf16.mxu0 %vm6792_vm4, %v6791_v15  ;;  %6324 = vmatpush3.bf16.msra.mxu0 %v6624_v43 }
0x1240   :  { %6325 = vmatprep.subr.bf16.mxu0 %v6791_v15 }
0x1243   :  { %6326 = vmatpush3.bf16.msra.mxu0 %v6625_v45 }
0x1244   :  { %6343 = vmatprep.subr.bf16.mxu0 %v6791_v15 }
0x130d   :  { %v2318_v12 = vpop.f32.mrb[40].mxu0 }
0x130e   :  { %v6306_v13 = vpop.f32.mrb[41].mxu0 }
0x1311   :  { %v2478_v16 = vpop.f32.mrb[42].mxu0 }
0x1312   :  { %v2482_v17 = vpack.c.bf16 %v2478_v16, %v2318_v12  ;;  %v6316_v18 = vpop.f32.mrb[43].mxu0 }
0x1314   :  { %6320 = vmatmul.mubr.msk.bf16.vlgmr.msra.gmra.mrb[52].mxu1 %vm451_vm5, %v2482_v17 }
0x1315   :  { %6339 = vmatprep.mubr.msk.bf16.mxu1 %vm6792_vm4, %v6791_v15  ;;  %6332 = vmatpush3.bf16.msra.mxu1 %v6626_v59 }
0x1316   :  { %6333 = vmatprep.subr.bf16.mxu1 %v6791_v15 }
0x1319   :  { %6334 = vmatpush3.bf16.msra.mxu1 %v6627_v60 }
0x131a   :  { %6335 = vmatprep.subr.bf16.mxu1 %v6791_v15 }
0x131d   :  { %6336 = vmatpush3.bf16.msra.mxu1 %v6628_v61 }
0x131e   :  { %6337 = vmatprep.subr.bf16.mxu1 %v6791_v15 }
0x1321   :  { %6338 = vmatpush3.bf16.msra.mxu1 %v6629_v62  ;;  %v5730_v62 = vld [vmem:[%s7893_s20] ss:$0 sm:$0xff] }
0x1322   :  { %6359 = vmatprep.subr.bf16.mxu1 %v6791_v15 }
0x13e7   :  { %v2525_v19 = vpop.f32.mrb[52].mxu1 }
0x13e8   :  { %v2532_v20 = vadd.f32 %v2525_v19, %v7313_v35  ;;  %v6321_v23 = vpop.f32.mrb[53].mxu1 }
0x13e9   :  { %v2528_v25 = vpop.f32.mrb[54].mxu1 }
0x13ea   :  { %v2534_v28 = vadd.f32 %v2532_v20, %v7017_v2  ;;  %v2533_v30 = vadd.f32 %v2528_v25, %v7316_v6  ;;  %v6322_v31 = vpop.f32.mrb[55].mxu1 }
0x13ec   :  { %v2535_v29 = vadd.f32 %v2533_v30, %v7019_v3  ;;  %v2543_v32 = vadd.f32 %v5723_v26, %v2534_v28 }
0x13ee   :  { %v2547_v33 = vsel %vm203_vm3, %v2543_v32, 0.0  ;;  %v2544_v34 = vadd.f32 %v5723_v26, %v2535_v29 }
0x13ef   :  { %2548 = vadd.xlane.f32.xlu1 %v2547_v33 }
0x13f0   :  { %v2550_v35 = vsel %vm203_vm3, %v2544_v34, 0.0 }
0x13f1   :  { %2551 = vadd.xlane.f32.xlu0 %v2550_v35 }
0x147c   :  { %v2549_v36 = vpop.xlane.xlu1 %2548 }
0x147d   :  { %v2553_v37 = vmul.f32 0.03125, %v2549_v36 }
0x147e   :  { %v2552_v38 = vpop.xlane.xlu0 %2551 }
0x147f   :  { %v2555_v39 = vsub.f32 %v2543_v32, %v2553_v37  ;;  %v2554_v40 = vmul.f32 0.03125, %v2552_v38 }
0x1481   :  { %v2556_v41 = vsub.f32 %v2544_v34, %v2554_v40  ;;  %v2557_v2 = vmul.f32 %v2555_v39, %v2555_v39 }
0x1483   :  { %v2559_v6 = vsel %vm203_vm3, %v2557_v2, 0.0  ;;  %v2558_v42 = vmul.f32 %v2556_v41, %v2556_v41 }
0x1484   :  { %2560 = vadd.xlane.f32.xlu1 %v2559_v6 }
0x1485   :  { %v2562_v3 = vsel %vm203_vm3, %v2558_v42, 0.0 }
0x1486   :  { %2563 = vadd.xlane.f32.xlu0 %v2562_v3 }
0x1511   :  { %v2561_v24 = vpop.xlane.xlu1 %2560 }
0x1512   :  { %v2565_v46 = vmul.f32 0.03125, %v2561_v24 }
0x1513   :  { %v2564_v48 = vpop.xlane.xlu0 %2563 }
0x1514   :  { %v2567_v27 = vadd.f32 1e-12, %v2565_v46  ;;  %v2566_v49 = vmul.f32 0.03125, %v2564_v48 }
0x1516   :  { %6700 = vrsqrt.f32 %v2567_v27  ;;  %v2568_v50 = vadd.f32 1e-12, %v2566_v49 }
0x1518   :  { %6702 = vrsqrt.f32 %v2568_v50 }
0x1520   :  { %v6701_v51 = vpop.eup %6700 }
0x1521   :  { %v2571_v53 = vmul.f32 %v6701_v51, %v2555_v39 }
0x1522   :  { %v6703_v54 = vpop.eup %6702 }
0x1523   :  { %v2579_v55 = vmul.f32 %v5724_v52, %v2571_v53  ;;  %v2572_v56 = vmul.f32 %v6703_v54, %v2556_v41 }
0x1525   :  { %v2580_v14 = vmul.f32 %v5724_v52, %v2572_v56  ;;  %v7381_v21 = vadd.f32 %v5725_v57, %v2579_v55 }
0x1527   :  { %v7383_v44 = vadd.f32 %v5725_v57, %v2580_v14 }
0x1529   :  { %v2594_v58 = vpack.c.bf16 %v7383_v44, %v7381_v21 }
0x152b   :  { %6328 = vmatmul.mubr.msk.bf16.vlgmr.msra.gmra.mrb[44].mxu0 %vm203_vm3, %v2594_v58 }
0x152c   :  { %6347 = vmatprep.mubr.msk.bf16.mxu0 %vm6792_vm4, %v6791_v15 }
0x15fe   :  { %v2650_v0 = vpop.f32.mrb[44].mxu0 }
0x15ff   :  { %v2651_v1 = vadd.f32 %v5726_v63, %v2650_v0  ;;  %v6329_v4 = vpop.f32.mrb[45].mxu0 }
0x1600   :  { %v2653_v5 = vpop.f32.mrb[46].mxu0 }
0x1601   :  { %v2659_v7 = vmul.f32 0.70710677, %v2651_v1  ;;  %v2654_v8 = vadd.f32 %v5726_v63, %v2653_v5  ;;  %v6330_v9 = vpop.f32.mrb[47].mxu0  ;;  %v2657_v57 = vmul.f32 0.5, %v2651_v1 }
0x1603   :  { %v2661_v10 = vand.u32 2147483647, %v2659_v7  ;;  %v2660_v11 = vmul.f32 0.70710677, %v2654_v8  ;;  %vm2701_vm7 = vcmp.ge.f32.partialorder %v2659_v7, 0.0  ;;  %v2658_v14 = vmul.f32 0.5, %v2654_v8 }
0x1605   :  { %v2663_v12 = vmul.f32 0.3275911, %v2661_v10  ;;  %v2662_v13 = vand.u32 2147483647, %v2660_v11  ;;  %v2689_v19 = vsub.f32 0.0, %v2661_v10  ;;  %vm2702_vm8 = vcmp.ge.f32.partialorder %v2660_v11, 0.0 }
0x1607   :  { %v2665_v16 = vadd.f32 1.0, %v2663_v12  ;;  %v2664_v17 = vmul.f32 0.3275911, %v2662_v13  ;;  %v2690_v20 = vsub.f32 0.0, %v2662_v13  ;;  %v2691_v25 = vmul.f32 %v2689_v19, %v2661_v10 }
0x1609   :  { %6704 = vrcp.f32 %v2665_v16  ;;  %v2666_v18 = vadd.f32 1.0, %v2664_v17  ;;  %v2692_v31 = vmul.f32 %v2690_v20, %v2662_v13  ;;  %v2693_v29 = vmul.f32 1.442695, %v2691_v25 }
0x160b   :  { %6706 = vrcp.f32 %v2666_v18  ;;  %v2695_v36 = vmul.f32 1.442695, %v2692_v31 }
0x160c   :  { %6708 = vpow2.f32 %v2693_v29 }
0x160d   :  { %6710 = vpow2.f32 %v2695_v36 }
0x1613   :  { %v6705_v23 = vpop.eup %6704 }
0x1614   :  { %v2671_v26 = vmul.f32 1.0614054, %v6705_v23 }
0x1615   :  { %v6707_v28 = vpop.eup %6706 }
0x1616   :  { %v2673_v30 = vadd.f32 -1.4531521, %v2671_v26  ;;  %v2672_v32 = vmul.f32 1.0614054, %v6707_v28  ;;  %v6709_v45 = vpop.eup %6708  ;;  %v6631_v26 = vld [vmem:[%s7928_s5 + $0x40] sm:$0xff]  }
0x1617   :  { %v6711_v27 = vpop.eup %6710 }
0x1618   :  { %v2675_v33 = vmul.f32 %v6705_v23, %v2673_v30  ;;  %v2674_v34 = vadd.f32 -1.4531521, %v2672_v32  ;;  %v6633_v30 = vld [vmem:[%s7928_s5 + $0x48] sm:$0xff]  }
0x161a   :  { %v2677_v35 = vadd.f32 1.4214138, %v2675_v33  ;;  %v2676_v37 = vmul.f32 %v6707_v28, %v2674_v34 }
0x161c   :  { %v2679_v38 = vmul.f32 %v6705_v23, %v2677_v35  ;;  %v2678_v39 = vadd.f32 1.4214138, %v2676_v37  ;;  %v5736_v37 = vld [vmem:[%s7894_s21] ss:$0 sm:$0xff] }
0x161e   :  { %v2681_v40 = vadd.f32 -0.28449672, %v2679_v38  ;;  %v2680_v41 = vmul.f32 %v6707_v28, %v2678_v39 }
0x1620   :  { %v2683_v2 = vmul.f32 %v6705_v23, %v2681_v40  ;;  %v2682_v6 = vadd.f32 -0.28449672, %v2680_v41 }
0x1622   :  { %v2685_v42 = vadd.f32 0.2548296, %v2683_v2  ;;  %v2684_v3 = vmul.f32 %v6707_v28, %v2682_v6  ;;  %v5737_v2 = vld [vmem:[%s7934_s22] ss:$0 sm:$0xff] }
0x1624   :  { %v2687_v43 = vmul.f32 %v6705_v23, %v2685_v42  ;;  %v2686_v24 = vadd.f32 0.2548296, %v2684_v3 }
0x1626   :  { %v2697_v46 = vmul.f32 %v6709_v45, %v2687_v43  ;;  %v2688_v48 = vmul.f32 %v6707_v28, %v2686_v24  ;;  %v6632_v28 = vld [vmem:[%s7927_s4 + $0x48] sm:$0xff]   ;;  %v6634_v43 = vld [vmem:[%s7931_s30 + $0x40] sm:$0xff]  }
0x1627   :  { %v6635_v24 = vld [vmem:[%s7931_s30 + $0x48] sm:$0xff]  }
0x1628   :  { %v2699_v49 = vsub.f32 1.0, %v2697_v46  ;;  %v2698_v50 = vmul.f32 %v6711_v27, %v2688_v48  ;;  %v5761_v46 = vld [vmem:[%s7885_s12 + $0x4] ss:$0 sm:$0xff] }
0x162a   :  { %v2703_v51 = vsub.f32 0.0, %v2699_v49  ;;  %v2700_v52 = vsub.f32 1.0, %v2698_v50 }
0x162c   :  { %v2705_v53 = vsel %vm2701_vm7, %v2699_v49, %v2703_v51  ;;  %v2704_v54 = vsub.f32 0.0, %v2700_v52 }
0x162d   :  { %v2707_v55 = vadd.f32 1.0, %v2705_v53 }
0x162e   :  { %v2706_v56 = vsel %vm2702_vm8, %v2700_v52, %v2704_v54 }
0x162f   :  { %v2708_v58 = vadd.f32 1.0, %v2706_v56  ;;  %v2709_v59 = vmul.f32 %v2707_v55, %v2657_v57  ;;  %v5752_v57 = vld [vmem:[%s7933_s10 + $0x4] ss:$0 sm:$0xff] }
0x1631   :  { %v2710_v60 = vmul.f32 %v2708_v58, %v2658_v14  ;;  %v5743_v58 = vld [vmem:[%s7932_s7 + $0x4] ss:$0 sm:$0xff] }
0x1633   :  { %v2720_v61 = vpack.c.bf16 %v2710_v60, %v2709_v59 }
0x1635   :  { %6340 = vmatmul.mubr.msk.bf16.vlgmr.msra.gmra.mrb[56].mxu1 %vm119_vm0, %v2720_v61 }
0x1636   :  { %6363 = vmatprep.mubr.msk.bf16.mxu1 %vm6792_vm4, %v6791_v15  ;;  %6360 = vmatpush3.bf16.msra.mxu1 %v6631_v26  ;;  %v5795_v26 = vld [vmem:[%s7885_s12 + $0x5] ss:$0 sm:$0xff] }
0x1637   :  { %6361 = vmatprep.subr.bf16.mxu1 %v6791_v15 }
0x163a   :  { %6362 = vmatpush3.bf16.msra.mxu1 %v6633_v30 }
0x163b   :  { %6372 = vmatprep.subr.mxu1 %v6791_v15 }
0x1708   :  { %v2788_v63 = vpop.f32.mrb[56].mxu1 }
0x1709   :  { %v2789_v0 = vadd.f32 %v5730_v62, %v2788_v63  ;;  %v6341_v4 = vpop.f32.mrb[57].mxu1 }
0x170a   :  { %v2791_v5 = vpop.f32.mrb[58].mxu1  ;;  %v6636_v4 = vld [vmem:[%s7927_s4 + $0x50] sm:$0xff]  }
0x170b   :  { %v2792_v7 = vadd.f32 %v5730_v62, %v2791_v5  ;;  %v6342_v1 = vpop.f32.mrb[59].mxu1  ;;  %v2795_v8 = vadd.f32 %v2789_v0, %v7381_v21 }
0x170c   :  { %v6638_v1 = vld [vmem:[%s7928_s5 + $0x50] sm:$0xff]  }
0x170d   :  { %v2799_v9 = vsel %vm203_vm3, %v2795_v8, 0.0  ;;  %v2796_v10 = vadd.f32 %v2792_v7, %v7383_v44  ;;  %v6630_v44 = vld [vmem:[%s7927_s4 + $0x40] sm:$0xff]   ;;  %v6637_v7 = vld [vmem:[%s7927_s4 + $0x58] sm:$0xff]  }
0x170e   :  { %2800 = vadd.xlane.f32.xlu1 %v2799_v9  ;;  %6344 = vmatpush3.bf16.msra.mxu0 %v6630_v44 }
0x170f   :  { %v2802_v11 = vsel %vm203_vm3, %v2796_v10, 0.0  ;;  %6345 = vmatprep.subr.bf16.mxu0 %v6791_v15 }
0x1710   :  { %2803 = vadd.xlane.f32.xlu0 %v2802_v11 }
0x1712   :  { %6346 = vmatpush3.bf16.msra.mxu0 %v6632_v28 }
0x1713   :  { %6351 = vmatprep.subr.bf16.mxu0 %v6791_v15 }
0x179b   :  { %v2801_v12 = vpop.xlane.xlu1 %2800 }
0x179c   :  { %v2805_v13 = vmul.f32 0.03125, %v2801_v12 }
0x179d   :  { %v2804_v16 = vpop.xlane.xlu0 %2803 }
0x179e   :  { %v2807_v17 = vsub.f32 %v2795_v8, %v2805_v13  ;;  %v2806_v18 = vmul.f32 0.03125, %v2804_v16  ;;  %v6639_v8 = vld [vmem:[%s7928_s5 + $0x58] sm:$0xff]  }
0x17a0   :  { %v2808_v19 = vsub.f32 %v2796_v10, %v2806_v18  ;;  %v2809_v20 = vmul.f32 %v2807_v17, %v2807_v17 }
0x17a2   :  { %v2811_v23 = vsel %vm203_vm3, %v2809_v20, 0.0  ;;  %v2810_v25 = vmul.f32 %v2808_v19, %v2808_v19 }
0x17a3   :  { %2812 = vadd.xlane.f32.xlu1 %v2811_v23 }
0x17a4   :  { %v2814_v21 = vsel %vm203_vm3, %v2810_v25, 0.0 }
0x17a5   :  { %2815 = vadd.xlane.f32.xlu0 %v2814_v21 }
0x1830   :  { %v2813_v31 = vpop.xlane.xlu1 %2812 }
0x1831   :  { %v2817_v29 = vmul.f32 0.03125, %v2813_v31 }
0x1832   :  { %v2816_v32 = vpop.xlane.xlu0 %2815 }
0x1833   :  { %v2819_v33 = vadd.f32 1e-12, %v2817_v29  ;;  %v2818_v34 = vmul.f32 0.03125, %v2816_v32 }
0x1835   :  { %6712 = vrsqrt.f32 %v2819_v33  ;;  %v2820_v35 = vadd.f32 1e-12, %v2818_v34 }
0x1837   :  { %6714 = vrsqrt.f32 %v2820_v35 }
0x183f   :  { %v6713_v36 = vpop.eup %6712 }
0x1840   :  { %v2823_v38 = vmul.f32 %v6713_v36, %v2807_v17 }
0x1841   :  { %v6715_v39 = vpop.eup %6714 }
0x1842   :  { %v2831_v40 = vmul.f32 %v5736_v37, %v2823_v38  ;;  %v2824_v41 = vmul.f32 %v6715_v39, %v2808_v19 }
0x1844   :  { %v2832_v6 = vmul.f32 %v5736_v37, %v2824_v41  ;;  %v7443_v42 = vadd.f32 %v5737_v2, %v2831_v40 }
0x1846   :  { %v7445_v3 = vadd.f32 %v5737_v2, %v2832_v6 }
0x1848   :  { %v7452_v45 = vpack.c.bf16 %v7445_v3, %v7443_v42 }
0x184a   :  { %6348 = vmatmul.mubr.msk.bf16.vlgmr.msra.gmra.mrb[48].mxu0 %vm203_vm3, %v7452_v45  ;;  %6364 = vmatmul.mubr.msk.bf16.vlgmr.msra.gmra.mrb[60].mxu1 %vm203_vm3, %v7452_v45 }
0x184b   :  { %6352 = vmatpush3.bf16.msra.mxu0 %v6634_v43  ;;  %6355 = vmatprep.mubr.msk.bf16.mxu0 %vm6792_vm4, %v6791_v15 }
0x184c   :  { %6353 = vmatprep.subr.bf16.mxu0 %v6791_v15  ;;  %6374 = vmatprep.mubr.msk.f32.mxu1 %vm6792_vm4, %v6791_v15 }
0x184f   :  { %6354 = vmatpush3.bf16.msra.mxu0 %v6635_v24 }
0x1850   :  { %6367 = vmatprep.subr.mxu0 %v6791_v15 }
0x1852   :  { %6356 = vmatmul.mubr.msk.bf16.vlgmr.msra.gmra.mrb[52].mxu0 %vm203_vm3, %v7452_v45 }
0x1853   :  { %6369 = vmatprep.mubr.msk.f32.mxu0 %vm6792_vm4, %v6791_v15 }
0x191d   :  { %v2904_v48 = vpop.f32.mrb[48].mxu0  ;;  %v3036_v27 = vpop.f32.mrb[60].mxu1 }
0x191e   :  { %v3037_v49 = vadd.f32 %v5761_v46, %v3036_v27  ;;  %v6349_v50 = vpop.f32.mrb[49].mxu0  ;;  %v6365_v51 = vpop.f32.mrb[61].mxu1  ;;  %v2905_v63 = vadd.f32 %v5743_v58, %v2904_v48  ;;  %v6641_v27 = vld [vmem:[%s7931_s30 + $0x58] sm:$0xff]  }
0x191f   :  { %v2907_v52 = vpop.f32.mrb[50].mxu0  ;;  %v3039_v53 = vpop.f32.mrb[62].mxu1 }
0x1920   :  { %v7474_v54 = vadd.f32 %v5761_v46, %v3039_v53  ;;  %v6350_v55 = vpop.f32.mrb[51].mxu0  ;;  %v6366_v56 = vpop.f32.mrb[63].mxu1  ;;  %6373 = vmatpush3.msra.mxu1 %v3037_v49  ;;  %v2908_v5 = vadd.f32 %v5743_v58, %v2907_v52  ;;  %v6640_v46 = vld [vmem:[%s7931_s30 + $0x50] sm:$0xff]  }
0x1921   :  { %6382 = vmatprep.subr.mxu1 %v6791_v15  ;;  %v5777_v56 = vld [vmem:[%s7932_s7 + $0x5] ss:$0 sm:$0xff] }
0x1925   :  { %v2970_v14 = vpop.f32.mrb[52].mxu0 }
0x1926   :  { %v2971_v59 = vadd.f32 %v5752_v57, %v2970_v14  ;;  %v6357_v60 = vpop.f32.mrb[53].mxu0 }
0x1927   :  { %v2973_v61 = vpop.f32.mrb[54].mxu0 }
0x1928   :  { %v6358_v62 = vpop.f32.mrb[55].mxu0  ;;  %6368 = vmatpush3.xpose.msk.msra.mxu0 %vm451_vm5, %v2971_v59  ;;  %v2974_v0 = vadd.f32 %v5752_v57, %v2973_v61 }
0x1929   :  { %6377 = vmatprep.subr.mxu0 %v6791_v15 }
0x192b   :  { %6370 = vmatmul.mubr.msk.f32.vlgmr.msra.gmra.mrb[56].mxu0 %vm451_vm5, %v2905_v63 }
0x192c   :  { %6378 = vmatpush3.xpose.msk.msra.mxu0 %vm451_vm5, %v2974_v0  ;;  %6379 = vmatprep.mubr.msk.f32.mxu0 %vm6792_vm4, %v6791_v15 }
0x192d   :  { %6387 = vmatprep.subr.bf16.mxu0 %v6791_v15 }
0x192f   :  { %6380 = vmatmul.mubr.msk.f32.vlgmr.msra.gmra.mrb[58].mxu0 %vm451_vm5, %v2908_v5 }
0x1930   :  { %6388 = vmatpush3.bf16.msra.mxu0 %v6636_v4  ;;  %6391 = vmatprep.mubr.msk.bf16.mxu0 %vm6792_vm4, %v6791_v15 }
0x1931   :  { %6389 = vmatprep.subr.bf16.mxu0 %v6791_v15 }
0x1934   :  { %6390 = vmatpush3.bf16.msra.mxu0 %v6637_v7 }
0x1935   :  { %6403 = vmatprep.subr.bf16.mxu0 %v6791_v15 }
0x1937   :  { %6392 = vmatmul.mubr.msk.bf16.vlgmr.msra.gmra.mrb[60].mxu0 %vm203_vm3, %v7452_v45 }
0x1938   :  { %6404 = vmatpush3.bf16.msra.mxu0 %v6638_v1  ;;  %6407 = vmatprep.mubr.msk.bf16.mxu0 %vm6792_vm4, %v6791_v15 }
0x1939   :  { %6405 = vmatprep.subr.bf16.mxu0 %v6791_v15 }
0x193c   :  { %6406 = vmatpush3.bf16.msra.mxu0 %v6639_v8 }
0x193d   :  { %6421 = vmatprep.subr.mxu0 %v6791_v15 }
0x193f   :  { %6408 = vmatmul.mubr.msk.bf16.vlgmr.msra.gmra.mrb[64].mxu0 %vm203_vm3, %v7452_v45 }
0x1940   :  { %6423 = vmatprep.mubr.msk.f32.mxu0 %vm6792_vm4, %v6791_v15 }
0x19fe   :  { %v3115_v9 = vpop.f32.mrb[56].mxu0 }
0x19ff   :  { %v3116_v10 = vadd.f32 %v3115_v9, %v7100_v47  ;;  %v6371_v11 = vpop.f32.mrb[57].mxu0 }
0x1a01   :  { %v3119_v12 = vsel %vm451_vm5, %v3116_v10, -inf }
0x1a02   :  { %3120 = vmax.xlane.f32.xlu1 %v3119_v12  ;;  %v3275_v13 = vpop.f32.mrb[58].mxu0 }
0x1a03   :  { %v3276_v16 = vadd.f32 %v3275_v13, %v6974_v22  ;;  %v6381_v17 = vpop.f32.mrb[59].mxu0 }
0x1a05   :  { %v3279_v18 = vsel %vm451_vm5, %v3276_v16, -inf }
0x1a06   :  { %3280 = vmax.xlane.f32.xlu0 %v3279_v18 }
0x1a0a   :  { %v3425_v19 = vpop.f32.mrb[60].mxu0 }
0x1a0b   :  { %v6393_v20 = vpop.f32.mrb[61].mxu0  ;;  %v3426_v61 = vadd.f32 %v5777_v56, %v3425_v19 }
0x1a0c   :  { %v3428_v23 = vpop.f32.mrb[62].mxu0 }
0x1a0d   :  { %v6394_v25 = vpop.f32.mrb[63].mxu0  ;;  %v3429_v63 = vadd.f32 %v5777_v56, %v3428_v23 }
0x1a12   :  { %v3557_v21 = vpop.f32.mrb[64].mxu0 }
0x1a13   :  { %v6409_v44 = vpop.f32.mrb[65].mxu0  ;;  %v3558_v62 = vadd.f32 %v5795_v26, %v3557_v21 }
0x1a14   :  { %v3560_v28 = vpop.f32.mrb[66].mxu0 }
0x1a15   :  { %v7524_v30 = vadd.f32 %v5795_v26, %v3560_v28  ;;  %v6410_v31 = vpop.f32.mrb[67].mxu0 }
0x1a8f   :  { %v3121_v29 = vpop.xlane.xlu1 %3120 }
0x1a90   :  { %v3122_v32 = vsub.f32 %v3116_v10, %v3121_v29  ;;  %v5771_v29 = vld [vmem:[%s7886_s13 + $0x10] sm:$0xf] }
0x1a92   :  { %v3123_v33 = vmul.f32 1.442695, %v3122_v32 }
0x1a93   :  { %v3281_v34 = vpop.xlane.xlu0 %3280 }
0x1a94   :  { %6716 = vpow2.f32 %v3123_v33  ;;  %v3282_v35 = vsub.f32 %v3276_v16, %v3281_v34  ;;  %v3938_v33 = vsel %vm1302_vm6, %v5771_v29, 0  ;;  %v6642_v34 = vld [vmem:[%s7931_s30 + $0x60] sm:$0xff]  }
0x1a96   :  { %v3283_v36 = vmul.f32 1.442695, %v3282_v35  ;;  %v5805_v35 = vld [vmem:[%s7886_s13 + $0x14] sm:$0xf] }
0x1a98   :  { %6718 = vpow2.f32 %v3283_v36  ;;  %v3891_v36 = vsel %vm1302_vm6, %v5805_v35, 0 }
0x1a9e   :  { %v6717_v37 = vpop.eup %6716 }
0x1a9f   :  { %v3125_v38 = vsel %vm451_vm5, %v6717_v37, 0.0 }
0x1aa0   :  { %3126 = vadd.xlane.f32.xlu1 %v3125_v38 }
0x1aa2   :  { %v6719_v39 = vpop.eup %6718 }
0x1aa3   :  { %v3285_v40 = vsel %vm451_vm5, %v6719_v39, 0.0 }
0x1aa4   :  { %3286 = vadd.xlane.f32.xlu0 %v3285_v40  ;;  %v6644_v40 = vld [vmem:[%s7927_s4 + $0x60] sm:$0xff]  }
0x1b2d   :  { %v3127_v41 = vpop.xlane.xlu1 %3126 }
0x1b2e   :  { %6720 = vrcp.f32 %v3127_v41 }
0x1b31   :  { %v3287_v2 = vpop.xlane.xlu0 %3286 }
0x1b32   :  { %6722 = vrcp.f32 %v3287_v2 }
0x1b38   :  { %v6721_v6 = vpop.eup %6720 }
0x1b39   :  { %v3129_v43 = vmul.f32 %v6721_v6, %v6717_v37 }
0x1b3b   :  { %6375 = vmatmul.mubr.msk.f32.vlgmr.msra.gmra.mrb[50].mxu1 %vm451_vm5, %v3129_v43  ;;  %v6645_v43 = vld [vmem:[%s7927_s4 + $0x68] sm:$0xff]  }
0x1b3c   :  { %v6723_v24 = vpop.eup %6722  ;;  %6383 = vmatpush3.msra.mxu1 %v7474_v54  ;;  %6384 = vmatprep.mubr.msk.f32.mxu1 %vm6792_vm4, %v6791_v15  ;;  %v5786_v54 = vld [vmem:[%s7933_s10 + $0x5] ss:$0 sm:$0xff] }
0x1b3d   :  { %v3289_v48 = vmul.f32 %v6723_v24, %v6719_v39  ;;  %6395 = vmatprep.subr.bf16.mxu1 %v6791_v15 }
0x1b3f   :  { %6385 = vmatmul.mubr.msk.f32.vlgmr.msra.gmra.mrb[64].mxu1 %vm451_vm5, %v3289_v48 }
0x1b40   :  { %6396 = vmatpush3.bf16.msra.mxu1 %v6640_v46  ;;  %6399 = vmatprep.mubr.msk.bf16.mxu1 %vm6792_vm4, %v6791_v15 }
0x1b41   :  { %6397 = vmatprep.subr.bf16.mxu1 %v6791_v15 }
0x1b44   :  { %6398 = vmatpush3.bf16.msra.mxu1 %v6641_v27  ;;  %v6646_v27 = vld [vmem:[%s7928_s5 + $0x60] sm:$0xff]  }
0x1b45   :  { %6411 = vmatprep.subr.mxu1 %v6791_v15 }
0x1b47   :  { %6400 = vmatmul.mubr.msk.bf16.vlgmr.msra.gmra.mrb[68].mxu1 %vm203_vm3, %v7452_v45 }
0x1b48   :  { %6413 = vmatprep.mubr.msk.f32.mxu1 %vm6792_vm4, %v6791_v15 }
0x1c0e   :  { %v7548_v49 = vpop.f32.mrb[50].mxu1 }
0x1c0f   :  { %v6376_v50 = vpop.f32.mrb[51].mxu1 }
0x1c12   :  { %v7550_v51 = vpop.f32.mrb[64].mxu1 }
0x1c13   :  { %v3363_v52 = vpack.c.bf16 %v7550_v51, %v7548_v49  ;;  %v6386_v53 = vpop.f32.mrb[65].mxu1  ;;  %v5822_v49 = vld [vmem:[%s7933_s10 + $0x6] ss:$0 sm:$0xff]  ;;  %v6647_v51 = vld [vmem:[%s7928_s5 + $0x68] sm:$0xff]  }
0x1c1a   :  { %v3491_v55 = vpop.f32.mrb[68].mxu1 }
0x1c1b   :  { %v3492_v57 = vadd.f32 %v5786_v54, %v3491_v55  ;;  %v6401_v14 = vpop.f32.mrb[69].mxu1 }
0x1c1c   :  { %v3494_v58 = vpop.f32.mrb[70].mxu1 }
0x1c1d   :  { %v3495_v59 = vadd.f32 %v5786_v54, %v3494_v58  ;;  %v6402_v60 = vpop.f32.mrb[71].mxu1  ;;  %6412 = vmatpush3.xpose.msk.msra.mxu1 %vm451_vm5, %v3492_v57 }
0x1c1e   :  { %6416 = vmatprep.subr.mxu1 %v6791_v15 }
0x1c1f   :  { %6422 = vmatpush3.xpose.msk.msra.mxu0 %vm451_vm5, %v3495_v59 }
0x1c20   :  { %6414 = vmatmul.mubr.msk.f32.vlgmr.msra.gmra.mrb[66].mxu1 %vm451_vm5, %v3426_v61  ;;  %6431 = vmatprep.subr.bf16.mxu0 %v6791_v15 }
0x1c21   :  { %6417 = vmatpush3.msra.mxu1 %v3558_v62  ;;  %6418 = vmatprep.mubr.msk.f32.mxu1 %vm6792_vm4, %v6791_v15  ;;  %v5813_v62 = vld [vmem:[%s7932_s7 + $0x6] ss:$0 sm:$0xff] }
0x1c22   :  { %6424 = vmatmul.mubr.msk.f32.vlgmr.msra.gmra.mrb[68].mxu0 %vm451_vm5, %v3429_v63  ;;  %6426 = vmatprep.subr.mxu1 %v6791_v15 }
0x1c23   :  { %6433 = vmatprep.mubr.msk.bf16.mxu0 %vm6792_vm4, %v6791_v15  ;;  %6432 = vmatpush3.bf16.msra.mxu0 %v3891_v36 }
0x1c24   :  { %6443 = vmatprep.subr.bf16.mxu0 %v6791_v15 }
0x1cf3   :  { %v3636_v0 = vpop.f32.mrb[66].mxu1 }
0x1cf4   :  { %v3637_v4 = vadd.f32 %v3636_v0, %v7100_v47  ;;  %v6415_v5 = vpop.f32.mrb[67].mxu1 }
0x1cf5   :  { %v3796_v7 = vpop.f32.mrb[68].mxu0 }
0x1cf6   :  { %v3797_v1 = vadd.f32 %v3796_v7, %v6974_v22  ;;  %v6425_v8 = vpop.f32.mrb[69].mxu0  ;;  %v3640_v9 = vsel %vm451_vm5, %v3637_v4, -inf }
0x1cf7   :  { %3641 = vmax.xlane.f32.xlu1 %v3640_v9  ;;  %v5831_v8 = vld [vmem:[%s7885_s12 + $0x6] ss:$0 sm:$0xff] }
0x1cf8   :  { %v3800_v10 = vsel %vm451_vm5, %v3797_v1, -inf }
0x1cf9   :  { %3801 = vmax.xlane.f32.xlu0 %v3800_v10 }
0x1d84   :  { %v3642_v11 = vpop.xlane.xlu1 %3641 }
0x1d85   :  { %v3643_v12 = vsub.f32 %v3637_v4, %v3642_v11 }
0x1d86   :  { %v3802_v13 = vpop.xlane.xlu0 %3801 }
0x1d87   :  { %v3644_v16 = vmul.f32 1.442695, %v3643_v12  ;;  %v3803_v17 = vsub.f32 %v3797_v1, %v3802_v13 }
0x1d89   :  { %6724 = vpow2.f32 %v3644_v16  ;;  %v3804_v18 = vmul.f32 1.442695, %v3803_v17 }
0x1d8b   :  { %6726 = vpow2.f32 %v3804_v18 }
0x1d93   :  { %v6725_v19 = vpop.eup %6724 }
0x1d94   :  { %v3646_v20 = vsel %vm451_vm5, %v6725_v19, 0.0 }
0x1d95   :  { %v6727_v23 = vpop.eup %6726  ;;  %3647 = vadd.xlane.f32.xlu1 %v3646_v20 }
0x1d96   :  { %v3806_v25 = vsel %vm451_vm5, %v6727_v23, 0.0 }
0x1d97   :  { %3807 = vadd.xlane.f32.xlu0 %v3806_v25 }
0x1e22   :  { %v3648_v21 = vpop.xlane.xlu1 %3647 }
0x1e23   :  { %6728 = vrcp.f32 %v3648_v21 }
0x1e24   :  { %v3808_v44 = vpop.xlane.xlu0 %3807 }
0x1e25   :  { %6730 = vrcp.f32 %v3808_v44 }
0x1e2d   :  { %v6729_v26 = vpop.eup %6728 }
0x1e2e   :  { %v3650_v28 = vmul.f32 %v6729_v26, %v6725_v19 }
0x1e2f   :  { %v6731_v31 = vpop.eup %6730 }
0x1e30   :  { %6419 = vmatmul.mubr.msk.f32.vlgmr.msra.gmra.mrb[72].mxu1 %vm451_vm5, %v3650_v28  ;;  %v3810_v32 = vmul.f32 %v6731_v31, %v6727_v23 }
0x1e31   :  { %6427 = vmatpush3.msra.mxu1 %v7524_v30  ;;  %6428 = vmatprep.mubr.msk.f32.mxu1 %vm6792_vm4, %v6791_v15  ;;  %v6643_v30 = vld [vmem:[%s7931_s30 + $0x68] sm:$0xff]  }
0x1e32   :  { %6437 = vmatprep.subr.bf16.mxu1 %v6791_v15 }
0x1e34   :  { %6429 = vmatmul.mubr.msk.f32.vlgmr.msra.gmra.mrb[74].mxu1 %vm451_vm5, %v3810_v32 }
0x1e35   :  { %6438 = vmatpush3.bf16.msra.mxu1 %v3938_v33  ;;  %6439 = vmatprep.mubr.msk.bf16.mxu1 %vm6792_vm4, %v6791_v15 }
0x1e36   :  { %6451 = vmatprep.subr.bf16.mxu1 %v6791_v15 }
0x1e38   :  { %6440 = vmatmul.mubr.msk.bf16.vlgmr.msra.gmra.mrb[76].mxu1 %vm451_vm5, %v3363_v52 }
0x1e39   :  { %6452 = vmatpush3.bf16.msra.mxu1 %v6642_v34  ;;  %6455 = vmatprep.mubr.msk.bf16.mxu1 %vm6792_vm4, %v6791_v15 }
0x1e3a   :  { %6453 = vmatprep.subr.bf16.mxu1 %v6791_v15 }
0x1e3d   :  { %6454 = vmatpush3.bf16.msra.mxu1 %v6643_v30 }
0x1e3e   :  { %6467 = vmatprep.subr.mxu1 %v6791_v15 }
0x1e40   :  { %6456 = vmatmul.mubr.msk.bf16.vlgmr.msra.gmra.mrb[80].mxu1 %vm203_vm3, %v7452_v45 }
0x1e41   :  { %6469 = vmatprep.mubr.msk.f32.mxu1 %vm6792_vm4, %v6791_v15 }
0x1f03   :  { %v3720_v37 = vpop.f32.mrb[72].mxu1 }
0x1f04   :  { %v6420_v38 = vpop.f32.mrb[73].mxu1 }
0x1f07   :  { %v3880_v39 = vpop.f32.mrb[74].mxu1 }
0x1f08   :  { %v3884_v41 = vpack.c.bf16 %v3880_v39, %v3720_v37  ;;  %v6430_v2 = vpop.f32.mrb[75].mxu1 }
0x1f09   :  { %v6648_v2 = vld [vmem:[%s7927_s4 + $0x70] sm:$0xff]  }
0x1f0a   :  { %6434 = vmatmul.mubr.msk.bf16.vlgmr.msra.gmra.mrb[72].mxu0 %vm451_vm5, %v3884_v41 }
0x1f0b   :  { %6444 = vmatpush3.bf16.msra.mxu0 %v6644_v40  ;;  %v3974_v6 = vpop.f32.mrb[76].mxu1  ;;  %6447 = vmatprep.mubr.msk.bf16.mxu0 %vm6792_vm4, %v6791_v15 }
0x1f0c   :  { %v6441_v24 = vpop.f32.mrb[77].mxu1  ;;  %6445 = vmatprep.subr.bf16.mxu0 %v6791_v15 }
0x1f0d   :  { %v3977_v46 = vpop.f32.mrb[78].mxu1  ;;  %v6650_v24 = vld [vmem:[%s7928_s5 + $0x70] sm:$0xff]  }
0x1f0e   :  { %v6442_v48 = vpop.f32.mrb[79].mxu1 }
0x1f0f   :  { %6446 = vmatpush3.bf16.msra.mxu0 %v6645_v43  ;;  %v6649_v43 = vld [vmem:[%s7927_s4 + $0x78] sm:$0xff]  }
0x1f10   :  { %6459 = vmatprep.subr.bf16.mxu0 %v6791_v15  ;;  %v5841_v48 = vld [vmem:[%s7886_s13 + $0x18] sm:$0xf] }
0x1f12   :  { %6448 = vmatmul.mubr.msk.bf16.vlgmr.msra.gmra.mrb[76].mxu0 %vm203_vm3, %v7452_v45 }
0x1f13   :  { %6460 = vmatpush3.bf16.msra.mxu0 %v6646_v27  ;;  %v4106_v50 = vpop.f32.mrb[80].mxu1  ;;  %6463 = vmatprep.mubr.msk.bf16.mxu0 %vm6792_vm4, %v6791_v15  ;;  %v4506_v27 = vsel %vm1302_vm6, %v5841_v48, 0 }
0x1f14   :  { %v4107_v52 = vadd.f32 %v5822_v49, %v4106_v50  ;;  %v6457_v53 = vpop.f32.mrb[81].mxu1  ;;  %6461 = vmatprep.subr.bf16.mxu0 %v6791_v15 }
0x1f15   :  { %v4109_v54 = vpop.f32.mrb[82].mxu1 }
0x1f16   :  { %v6458_v55 = vpop.f32.mrb[83].mxu1  ;;  %6468 = vmatpush3.xpose.msk.msra.mxu1 %vm451_vm5, %v4107_v52  ;;  %v4110_v56 = vadd.f32 %v5822_v49, %v4109_v54  ;;  %v6652_v52 = vld [vmem:[%s7931_s30 + $0x70] sm:$0xff]  }
0x1f17   :  { %6462 = vmatpush3.bf16.msra.mxu0 %v6647_v51  ;;  %6472 = vmatprep.subr.mxu1 %v6791_v15  ;;  %v6653_v55 = vld [vmem:[%s7931_s30 + $0x78] sm:$0xff]  }
0x1f18   :  { %6477 = vmatprep.subr.mxu0 %v6791_v15 }
0x1f1a   :  { %6464 = vmatmul.mubr.msk.bf16.vlgmr.msra.gmra.mrb[80].mxu0 %vm203_vm3, %v7452_v45 }
0x1f1b   :  { %6479 = vmatprep.mubr.msk.f32.mxu0 %vm6792_vm4, %v6791_v15 }
0x1f20   :  { %6478 = vmatpush3.xpose.msk.msra.mxu0 %vm451_vm5, %v4110_v56 }
0x1f21   :  { %6487 = vmatprep.subr.bf16.mxu0 %v6791_v15 }
0x1fdd   :  { %v3927_v57 = vpop.f32.mrb[72].mxu0 }
0x1fde   :  { %v7647_v14 = vadd.f32 %v3974_v6, %v3927_v57  ;;  %v6435_v58 = vpop.f32.mrb[73].mxu0 }
0x1fdf   :  { %v3930_v59 = vpop.f32.mrb[74].mxu0 }
0x1fe0   :  { %v7649_v60 = vadd.f32 %v3977_v46, %v3930_v59  ;;  %v6436_v61 = vpop.f32.mrb[75].mxu0  ;;  %v6651_v46 = vld [vmem:[%s7928_s5 + $0x78] sm:$0xff]  }
0x1fe5   :  { %v4040_v63 = vpop.f32.mrb[76].mxu0 }
0x1fe6   :  { %v4041_v0 = vadd.f32 %v5813_v62, %v4040_v63  ;;  %v6449_v4 = vpop.f32.mrb[77].mxu0  ;;  %v5866_v63 = vld [vmem:[%s7885_s12 + $0x7] ss:$0 sm:$0xff] }
0x1fe7   :  { %v4043_v5 = vpop.f32.mrb[78].mxu0 }
0x1fe8   :  { %v4044_v7 = vadd.f32 %v5813_v62, %v4043_v5  ;;  %v6450_v1 = vpop.f32.mrb[79].mxu0  ;;  %6470 = vmatmul.mubr.msk.f32.vlgmr.msra.gmra.mrb[84].mxu1 %vm451_vm5, %v4041_v0 }
0x1fe9   :  { %6474 = vmatprep.mubr.msk.f32.mxu1 %vm6792_vm4, %v6791_v15 }
0x1fea   :  { %6480 = vmatmul.mubr.msk.f32.vlgmr.msra.gmra.mrb[70].mxu0 %vm451_vm5, %v4044_v7 }
0x1feb   :  { %6489 = vmatprep.mubr.msk.bf16.mxu0 %vm6792_vm4, %v6791_v15  ;;  %6488 = vmatpush3.bf16.msra.mxu0 %v4506_v27 }
0x1fec   :  { %6501 = vmatprep.subr.bf16.mxu0 %v6791_v15 }
0x1fed   :  { %v4172_v9 = vpop.f32.mrb[80].mxu0 }
0x1fee   :  { %v4173_v10 = vadd.f32 %v5831_v8, %v4172_v9  ;;  %v6465_v11 = vpop.f32.mrb[81].mxu0 }
0x1fef   :  { %v4175_v12 = vpop.f32.mrb[82].mxu0  ;;  %v5857_v11 = vld [vmem:[%s7933_s10 + $0x7] ss:$0 sm:$0xff] }
0x1ff0   :  { %v4176_v13 = vadd.f32 %v5831_v8, %v4175_v12  ;;  %v6466_v16 = vpop.f32.mrb[83].mxu0  ;;  %6473 = vmatpush3.msra.mxu1 %v4173_v10 }
0x1ff1   :  { %6482 = vmatprep.subr.mxu1 %v6791_v15 }
0x20bb   :  { %v4251_v17 = vpop.f32.mrb[84].mxu1 }
0x20bc   :  { %v4252_v18 = vadd.f32 %v4251_v17, %v7100_v47  ;;  %v6471_v19 = vpop.f32.mrb[85].mxu1 }
0x20bd   :  { %v4411_v20 = vpop.f32.mrb[70].mxu0 }
0x20be   :  { %v4412_v23 = vadd.f32 %v4411_v20, %v6974_v22  ;;  %v6481_v25 = vpop.f32.mrb[71].mxu0  ;;  %v4255_v21 = vsel %vm451_vm5, %v4252_v18, -inf }
0x20bf   :  { %4256 = vmax.xlane.f32.xlu1 %v4255_v21 }
0x20c0   :  { %v4415_v44 = vsel %vm451_vm5, %v4412_v23, -inf }
0x20c1   :  { %4416 = vmax.xlane.f32.xlu0 %v4415_v44 }
0x214c   :  { %v4257_v26 = vpop.xlane.xlu1 %4256 }
0x214d   :  { %v4258_v28 = vsub.f32 %v4252_v18, %v4257_v26 }
0x214e   :  { %v4417_v31 = vpop.xlane.xlu0 %4416 }
0x214f   :  { %v4259_v29 = vmul.f32 1.442695, %v4258_v28  ;;  %v4418_v32 = vsub.f32 %v4412_v23, %v4417_v31 }
0x2151   :  { %6732 = vpow2.f32 %v4259_v29  ;;  %v4419_v33 = vmul.f32 1.442695, %v4418_v32 }
0x2153   :  { %6734 = vpow2.f32 %v4419_v33 }
0x215b   :  { %v6733_v34 = vpop.eup %6732 }
0x215c   :  { %v4261_v30 = vsel %vm451_vm5, %v6733_v34, 0.0 }
0x215d   :  { %v6735_v35 = vpop.eup %6734  ;;  %4262 = vadd.xlane.f32.xlu1 %v4261_v30 }
0x215e   :  { %v4421_v36 = vsel %vm451_vm5, %v6735_v35, 0.0 }
0x215f   :  { %4422 = vadd.xlane.f32.xlu0 %v4421_v36 }
0x21ea   :  { %v4263_v37 = vpop.xlane.xlu1 %4262 }
0x21eb   :  { %6736 = vrcp.f32 %v4263_v37 }
0x21ec   :  { %v4423_v38 = vpop.xlane.xlu0 %4422 }
0x21ed   :  { %6738 = vrcp.f32 %v4423_v38 }
0x21f5   :  { %v6737_v39 = vpop.eup %6736 }
0x21f6   :  { %v4265_v40 = vmul.f32 %v6737_v39, %v6733_v34 }
0x21f7   :  { %v6739_v41 = vpop.eup %6738 }
0x21f8   :  { %6475 = vmatmul.mubr.msk.f32.vlgmr.msra.gmra.mrb[86].mxu1 %vm451_vm5, %v4265_v40  ;;  %v4425_v6 = vmul.f32 %v6739_v41, %v6735_v35 }
0x21f9   :  { %6483 = vmatpush3.msra.mxu1 %v4176_v13  ;;  %6484 = vmatprep.mubr.msk.f32.mxu1 %vm6792_vm4, %v6791_v15  ;;  %v5848_v13 = vld [vmem:[%s7932_s7 + $0x7] ss:$0 sm:$0xff] }
0x21fa   :  { %6493 = vmatprep.subr.bf16.mxu1 %v6791_v15 }
0x21fc   :  { %6485 = vmatmul.mubr.msk.f32.vlgmr.msra.gmra.mrb[88].mxu1 %vm451_vm5, %v4425_v6 }
0x21fd   :  { %6494 = vmatpush3.bf16.msra.mxu1 %v6648_v2  ;;  %6497 = vmatprep.mubr.msk.bf16.mxu1 %vm6792_vm4, %v6791_v15 }
0x21fe   :  { %6495 = vmatprep.subr.bf16.mxu1 %v6791_v15 }
0x2201   :  { %6496 = vmatpush3.bf16.msra.mxu1 %v6649_v43 }
0x2202   :  { %6509 = vmatprep.subr.bf16.mxu1 %v6791_v15 }
0x2204   :  { %6498 = vmatmul.mubr.msk.bf16.vlgmr.msra.gmra.mrb[92].mxu1 %vm203_vm3, %v7452_v45 }
0x2205   :  { %6510 = vmatpush3.bf16.msra.mxu1 %v6650_v24  ;;  %6513 = vmatprep.mubr.msk.bf16.mxu1 %vm6792_vm4, %v6791_v15 }
0x2206   :  { %6511 = vmatprep.subr.bf16.mxu1 %v6791_v15 }
0x2209   :  { %6512 = vmatpush3.bf16.msra.mxu1 %v6651_v46  ;;  %v5876_v46 = vld [vmem:[%s7886_s13 + $0x1c] sm:$0xf] }
0x220a   :  { %6527 = vmatprep.subr.mxu1 %v6791_v15  ;;  %v5076_v48 = vsel %vm1302_vm6, %v5876_v46, 0 }
0x220c   :  { %6514 = vmatmul.mubr.msk.bf16.vlgmr.msra.gmra.mrb[96].mxu1 %vm203_vm3, %v7452_v45 }
0x220d   :  { %6529 = vmatprep.mubr.msk.f32.mxu1 %vm6792_vm4, %v6791_v15 }
0x22cb   :  { %v4335_v49 = vpop.f32.mrb[86].mxu1 }
0x22cc   :  { %v6476_v50 = vpop.f32.mrb[87].mxu1 }
0x22cf   :  { %v4495_v51 = vpop.f32.mrb[88].mxu1 }
0x22d0   :  { %v4499_v53 = vpack.c.bf16 %v4495_v51, %v4335_v49  ;;  %v6486_v54 = vpop.f32.mrb[89].mxu1 }
0x22d2   :  { %6490 = vmatmul.mubr.msk.bf16.vlgmr.msra.gmra.mrb[84].mxu0 %vm451_vm5, %v4499_v53 }
0x22d3   :  { %6502 = vmatpush3.bf16.msra.mxu0 %v6652_v52  ;;  %6505 = vmatprep.mubr.msk.bf16.mxu0 %vm6792_vm4, %v6791_v15 }
0x22d4   :  { %6503 = vmatprep.subr.bf16.mxu0 %v6791_v15 }
0x22d7   :  { %v4610_v56 = vpop.f32.mrb[92].mxu1  ;;  %6504 = vmatpush3.bf16.msra.mxu0 %v6653_v55 }
0x22d8   :  { %v6499_v57 = vpop.f32.mrb[93].mxu1  ;;  %6517 = vmatprep.subr.mxu0 %v6791_v15  ;;  %v4611_v20 = vadd.f32 %v5848_v13, %v4610_v56 }
0x22d9   :  { %v4613_v58 = vpop.f32.mrb[94].mxu1  ;;  %v5879_v57 = vld [vmem:[%s7887_s14 + $0x1] ss:$0 sm:$0xff] }
0x22da   :  { %v6500_v59 = vpop.f32.mrb[95].mxu1  ;;  %6506 = vmatmul.mubr.msk.bf16.vlgmr.msra.gmra.mrb[88].mxu0 %vm203_vm3, %v7452_v45  ;;  %v4614_v23 = vadd.f32 %v5848_v13, %v4613_v58  ;;  %v6654_v13 = vld [vmem:[%s7890_s17 + $0x10] sm:$0xff]  }
0x22db   :  { %6519 = vmatprep.mubr.msk.f32.mxu0 %vm6792_vm4, %v6791_v15 }
0x22df   :  { %v4742_v61 = vpop.f32.mrb[96].mxu1 }
0x22e0   :  { %v6515_v62 = vpop.f32.mrb[97].mxu1 }
0x22e1   :  { %v4745_v0 = vpop.f32.mrb[98].mxu1 }
0x22e2   :  { %v4746_v4 = vadd.f32 %v5866_v63, %v4745_v0  ;;  %v6516_v5 = vpop.f32.mrb[99].mxu1 }
0x23a5   :  { %v4542_v7 = vpop.f32.mrb[84].mxu0 }
0x23a6   :  { %v7725_v1 = vadd.f32 %v4542_v7, %v7647_v14  ;;  %v6491_v8 = vpop.f32.mrb[85].mxu0 }
0x23a7   :  { %v4545_v9 = vpop.f32.mrb[86].mxu0 }
0x23a8   :  { %v7728_v45 = vadd.f32 %v4545_v9, %v7649_v60  ;;  %v6492_v10 = vpop.f32.mrb[87].mxu0  ;;  %v4743_v60 = vadd.f32 %v5866_v63, %v4742_v61 }
0x23ad   :  { %v4676_v12 = vpop.f32.mrb[88].mxu0 }
0x23ae   :  { %v4677_v16 = vadd.f32 %v5857_v11, %v4676_v12  ;;  %v6507_v17 = vpop.f32.mrb[89].mxu0 }
0x23af   :  { %v4679_v18 = vpop.f32.mrb[90].mxu0 }
0x23b0   :  { %v4680_v14 = vadd.f32 %v5857_v11, %v4679_v18  ;;  %v6508_v19 = vpop.f32.mrb[91].mxu0  ;;  %6518 = vmatpush3.xpose.msk.msra.mxu0 %vm451_vm5, %v4677_v16  ;;  %v6655_v16 = vld [vmem:[%s7890_s17 + $0x18] sm:$0xff]  }
0x23b1   :  { %6522 = vmatprep.subr.mxu0 %v6791_v15 }
0x23b2   :  { %6528 = vmatpush3.xpose.msk.msra.mxu1 %vm451_vm5, %v4680_v14 }
0x23b3   :  { %6520 = vmatmul.mubr.msk.f32.vlgmr.msra.gmra.mrb[92].mxu0 %vm451_vm5, %v4611_v20  ;;  %6537 = vmatprep.subr.bf16.mxu1 %v6791_v15 }
0x23b4   :  { %6523 = vmatpush3.msra.mxu0 %v4743_v60  ;;  %6524 = vmatprep.mubr.msk.f32.mxu0 %vm6792_vm4, %v6791_v15 }
0x23b5   :  { %6530 = vmatmul.mubr.msk.f32.vlgmr.msra.gmra.mrb[90].mxu1 %vm451_vm5, %v4614_v23  ;;  %6532 = vmatprep.subr.mxu0 %v6791_v15 }
0x23b6   :  { %6539 = vmatprep.mubr.msk.bf16.mxu1 %vm6792_vm4, %v6791_v15  ;;  %6538 = vmatpush3.bf16.msra.mxu1 %v5076_v48 }
0x23b7   :  { %6551 = vmatprep.subr.bf16.mxu1 %v6791_v15 }
0x2486   :  { %v4821_v25 = vpop.f32.mrb[92].mxu0 }
0x2487   :  { %v4822_v21 = vadd.f32 %v4821_v25, %v7100_v47  ;;  %v6521_v44 = vpop.f32.mrb[93].mxu0  ;;  %v5882_v25 = vld [vmem:[%s7888_s15 + $0x1] ss:$0 sm:$0xff] }
0x2488   :  { %v4981_v26 = vpop.f32.mrb[90].mxu1 }
0x2489   :  { %v4982_v28 = vadd.f32 %v4981_v26, %v6974_v22  ;;  %v6531_v31 = vpop.f32.mrb[91].mxu1  ;;  %v4825_v29 = vsel %vm451_vm5, %v4822_v21, -inf }
0x248a   :  { %4826 = vmax.xlane.f32.xlu1 %v4825_v29  ;;  %v5883_v31 = vld [vmem:[%s7889_s16 + $0x1] ss:$0 sm:$0xff] }
0x248b   :  { %v4985_v32 = vsel %vm451_vm5, %v4982_v28, -inf }
0x248c   :  { %4986 = vmax.xlane.f32.xlu0 %v4985_v32 }
0x2517   :  { %v4827_v33 = vpop.xlane.xlu1 %4826 }
0x2518   :  { %v4828_v34 = vsub.f32 %v4822_v21, %v4827_v33 }
0x2519   :  { %v4987_v30 = vpop.xlane.xlu0 %4986 }
0x251a   :  { %v4829_v35 = vmul.f32 1.442695, %v4828_v34  ;;  %v4988_v36 = vsub.f32 %v4982_v28, %v4987_v30  ;;  %v6656_v30 = vld [vmem:[%s7892_s19 + $0x20] sm:$0xff]  }
0x251c   :  { %6740 = vpow2.f32 %v4829_v35  ;;  %v4989_v37 = vmul.f32 1.442695, %v4988_v36  ;;  %v6657_v35 = vld [vmem:[%s7892_s19 + $0x28] sm:$0xff]   ;;  %v6658_v36 = vld [vmem:[%s7892_s19 + $0x30] sm:$0xff]  }
0x251e   :  { %6742 = vpow2.f32 %v4989_v37  ;;  %v6659_v37 = vld [vmem:[%s7892_s19 + $0x38] sm:$0xff]  }
0x2526   :  { %v6741_v47 = vpop.eup %6740 }
0x2527   :  { %v4831_v38 = vsel %vm451_vm5, %v6741_v47, 0.0 }
0x2528   :  { %v6743_v39 = vpop.eup %6742  ;;  %4832 = vadd.xlane.f32.xlu1 %v4831_v38 }
0x2529   :  { %v4991_v22 = vsel %vm451_vm5, %v6743_v39, 0.0 }
0x252a   :  { %4992 = vadd.xlane.f32.xlu0 %v4991_v22 }
0x25b5   :  { %v4833_v40 = vpop.xlane.xlu1 %4832 }
0x25b6   :  { %6744 = vrcp.f32 %v4833_v40 }
0x25b7   :  { %v4993_v41 = vpop.xlane.xlu0 %4992 }
0x25b8   :  { %6746 = vrcp.f32 %v4993_v41 }
0x25c0   :  { %v6745_v2 = vpop.eup %6744 }
0x25c1   :  { %v4835_v6 = vmul.f32 %v6745_v2, %v6741_v47  ;;  %v5889_v47 = vld [vmem:[%s7891_s18 + $0x1] ss:$0 sm:$0xff] }
0x25c2   :  { %v6747_v43 = vpop.eup %6746 }
0x25c3   :  { %6525 = vmatmul.mubr.msk.f32.vlgmr.msra.gmra.mrb[94].mxu0 %vm451_vm5, %v4835_v6  ;;  %v4995_v24 = vmul.f32 %v6747_v43, %v6743_v39 }
0x25c4   :  { %6533 = vmatpush3.msra.mxu0 %v4746_v4  ;;  %6534 = vmatprep.mubr.msk.f32.mxu0 %vm6792_vm4, %v6791_v15 }
0x25c5   :  { %6543 = vmatprep.subr.bf16.mxu0 %v6791_v15 }
0x25c7   :  { %6535 = vmatmul.mubr.msk.f32.vlgmr.msra.gmra.mrb[96].mxu0 %vm451_vm5, %v4995_v24 }
0x25c8   :  { %6547 = vmatprep.mubr.msk.bf16.mxu0 %vm6792_vm4, %v6791_v15  ;;  %6544 = vmatpush3.bf16.msra.mxu0 %v6654_v13 }
0x25c9   :  { %6545 = vmatprep.subr.bf16.mxu0 %v6791_v15 }
0x25cc   :  { %6546 = vmatpush3.bf16.msra.mxu0 %v6655_v16 }
0x25cd   :  { %6563 = vmatprep.subr.bf16.mxu0 %v6791_v15 }
0x2696   :  { %v4905_v27 = vpop.f32.mrb[94].mxu0 }
0x2697   :  { %v6526_v49 = vpop.f32.mrb[95].mxu0 }
0x269a   :  { %v5065_v50 = vpop.f32.mrb[96].mxu0 }
0x269b   :  { %v5069_v51 = vpack.c.bf16 %v5065_v50, %v4905_v27  ;;  %v6536_v52 = vpop.f32.mrb[97].mxu0 }
0x269d   :  { %6540 = vmatmul.mubr.msk.bf16.vlgmr.msra.gmra.mrb[100].mxu1 %vm451_vm5, %v5069_v51 }
0x269e   :  { %6559 = vmatprep.mubr.msk.bf16.mxu1 %vm6792_vm4, %v6791_v15  ;;  %6552 = vmatpush3.bf16.msra.mxu1 %v6656_v30 }
0x269f   :  { %6553 = vmatprep.subr.bf16.mxu1 %v6791_v15 }
0x26a2   :  { %6554 = vmatpush3.bf16.msra.mxu1 %v6657_v35  ;;  %v5902_v35 = vld [vmem:[%s7893_s20 + $0x1] ss:$0 sm:$0xff] }
0x26a3   :  { %6555 = vmatprep.subr.bf16.mxu1 %v6791_v15 }
0x26a6   :  { %6556 = vmatpush3.bf16.msra.mxu1 %v6658_v36 }
0x26a7   :  { %6557 = vmatprep.subr.bf16.mxu1 %v6791_v15 }
0x26aa   :  { %6558 = vmatpush3.bf16.msra.mxu1 %v6659_v37 }
0x2770   :  { %v5112_v53 = vpop.f32.mrb[100].mxu1 }
0x2771   :  { %v5119_v54 = vadd.f32 %v5112_v53, %v7725_v1  ;;  %v6541_v55 = vpop.f32.mrb[101].mxu1 }
0x2772   :  { %v5115_v56 = vpop.f32.mrb[102].mxu1 }
0x2773   :  { %v5121_v58 = vadd.f32 %v5119_v54, %v7443_v42  ;;  %v5120_v59 = vadd.f32 %v5115_v56, %v7728_v45  ;;  %v6542_v61 = vpop.f32.mrb[103].mxu1 }
0x2775   :  { %v5122_v62 = vadd.f32 %v5120_v59, %v7445_v3  ;;  %v5131_v63 = vadd.f32 %v5879_v57, %v5121_v58 }
0x2777   :  { %v5137_v0 = vsel %vm203_vm3, %v5131_v63, 0.0  ;;  %v5132_v4 = vadd.f32 %v5879_v57, %v5122_v62 }
0x2778   :  { %5138 = vadd.xlane.f32.xlu1 %v5137_v0 }
0x2779   :  { %v5140_v5 = vsel %vm203_vm3, %v5132_v4, 0.0 }
0x277a   :  { %5141 = vadd.xlane.f32.xlu0 %v5140_v5 }
0x2805   :  { %v5139_v7 = vpop.xlane.xlu1 %5138 }
0x2806   :  { %v5143_v1 = vmul.f32 0.03125, %v5139_v7 }
0x2807   :  { %v5142_v8 = vpop.xlane.xlu0 %5141 }
0x2808   :  { %v5145_v9 = vsub.f32 %v5131_v63, %v5143_v1  ;;  %v5144_v10 = vmul.f32 0.03125, %v5142_v8 }
0x280a   :  { %v5146_v11 = vsub.f32 %v5132_v4, %v5144_v10  ;;  %v5147_v42 = vmul.f32 %v5145_v9, %v5145_v9 }
0x280c   :  { %v5149_v45 = vsel %vm203_vm3, %v5147_v42, 0.0  ;;  %v5148_v12 = vmul.f32 %v5146_v11, %v5146_v11 }
0x280d   :  { %5150 = vadd.xlane.f32.xlu1 %v5149_v45 }
0x280e   :  { %v5152_v3 = vsel %vm203_vm3, %v5148_v12, 0.0 }
0x280f   :  { %5153 = vadd.xlane.f32.xlu0 %v5152_v3 }
0x289a   :  { %v5151_v17 = vpop.xlane.xlu1 %5150 }
0x289b   :  { %v5155_v18 = vmul.f32 0.03125, %v5151_v17 }
0x289c   :  { %v5154_v14 = vpop.xlane.xlu0 %5153 }
0x289d   :  { %v5157_v19 = vadd.f32 1e-12, %v5155_v18  ;;  %v5156_v20 = vmul.f32 0.03125, %v5154_v14 }
0x289f   :  { %6748 = vrsqrt.f32 %v5157_v19  ;;  %v5158_v60 = vadd.f32 1e-12, %v5156_v20 }
0x28a1   :  { %6750 = vrsqrt.f32 %v5158_v60 }
0x28a9   :  { %v6749_v23 = vpop.eup %6748 }
0x28aa   :  { %v5161_v21 = vmul.f32 %v6749_v23, %v5145_v9 }
0x28ab   :  { %v6751_v44 = vpop.eup %6750 }
0x28ac   :  { %v5169_v26 = vmul.f32 %v5882_v25, %v5161_v21  ;;  %v5162_v28 = vmul.f32 %v6751_v44, %v5146_v11 }
0x28ae   :  { %v5170_v29 = vmul.f32 %v5882_v25, %v5162_v28  ;;  %v7793_v32 = vadd.f32 %v5883_v31, %v5169_v26 }
0x28b0   :  { %v7795_v33 = vadd.f32 %v5883_v31, %v5170_v29 }
0x28b2   :  { %v5186_v34 = vpack.c.bf16 %v7795_v33, %v7793_v32 }
0x28b4   :  { %6548 = vmatmul.mubr.msk.bf16.vlgmr.msra.gmra.mrb[100].mxu0 %vm203_vm3, %v5186_v34 }
0x28b5   :  { %6567 = vmatprep.mubr.msk.bf16.mxu0 %vm6792_vm4, %v6791_v15 }
0x2987   :  { %v5242_v38 = vpop.f32.mrb[100].mxu0 }
0x2988   :  { %v5243_v39 = vadd.f32 %v5889_v47, %v5242_v38  ;;  %v6549_v22 = vpop.f32.mrb[101].mxu0 }
0x2989   :  { %v5245_v40 = vpop.f32.mrb[102].mxu0 }
0x298a   :  { %v5251_v41 = vmul.f32 0.70710677, %v5243_v39  ;;  %v5246_v2 = vadd.f32 %v5889_v47, %v5245_v40  ;;  %v6550_v6 = vpop.f32.mrb[103].mxu0  ;;  %v5249_v26 = vmul.f32 0.5, %v5243_v39 }
0x298c   :  { %v5253_v43 = vand.u32 2147483647, %v5251_v41  ;;  %v5252_v24 = vmul.f32 0.70710677, %v5246_v2  ;;  %vm5293_vm9 = vcmp.ge.f32.partialorder %v5251_v41, 0.0  ;;  %v5250_v28 = vmul.f32 0.5, %v5246_v2 }
0x298e   :  { %v5255_v46 = vmul.f32 0.3275911, %v5253_v43  ;;  %v5254_v48 = vand.u32 2147483647, %v5252_v24  ;;  %v5281_v51 = vsub.f32 0.0, %v5253_v43  ;;  %vm5294_vm10 = vcmp.ge.f32.partialorder %v5252_v24, 0.0 }
0x2990   :  { %v5257_v27 = vadd.f32 1.0, %v5255_v46  ;;  %v5256_v49 = vmul.f32 0.3275911, %v5254_v48  ;;  %v5282_v52 = vsub.f32 0.0, %v5254_v48  ;;  %v5283_v54 = vmul.f32 %v5281_v51, %v5253_v43 }
0x2992   :  { %6752 = vrcp.f32 %v5257_v27  ;;  %v5258_v50 = vadd.f32 1.0, %v5256_v49  ;;  %v5284_v58 = vmul.f32 %v5282_v52, %v5254_v48  ;;  %v5285_v59 = vmul.f32 1.442695, %v5283_v54 }
0x2994   :  { %6754 = vrcp.f32 %v5258_v50  ;;  %v5287_v4 = vmul.f32 1.442695, %v5284_v58 }
0x2995   :  { %6756 = vpow2.f32 %v5285_v59 }
0x2996   :  { %6758 = vpow2.f32 %v5287_v4 }
0x299c   :  { %v6753_v53 = vpop.eup %6752 }
0x299d   :  { %v5263_v55 = vmul.f32 1.0614054, %v6753_v53 }
0x299e   :  { %v6755_v56 = vpop.eup %6754 }
0x299f   :  { %v5265_v57 = vadd.f32 -1.4531521, %v5263_v55  ;;  %v5264_v61 = vmul.f32 1.0614054, %v6755_v56  ;;  %v6757_v3 = vpop.eup %6756 }
0x29a0   :  { %v6759_v18 = vpop.eup %6758 }
0x29a1   :  { %v5267_v62 = vmul.f32 %v6753_v53, %v5265_v57  ;;  %v5266_v63 = vadd.f32 -1.4531521, %v5264_v61 }
0x29a3   :  { %v5269_v0 = vadd.f32 1.4214138, %v5267_v62  ;;  %v5268_v5 = vmul.f32 %v6755_v56, %v5266_v63 }
0x29a5   :  { %v5271_v7 = vmul.f32 %v6753_v53, %v5269_v0  ;;  %v5270_v1 = vadd.f32 1.4214138, %v5268_v5  ;;  %v5910_v0 = vld [vmem:[%s7894_s21 + $0x1] ss:$0 sm:$0xff] }
0x29a7   :  { %v5273_v8 = vadd.f32 -0.28449672, %v5271_v7  ;;  %v5272_v9 = vmul.f32 %v6755_v56, %v5270_v1  ;;  %v5911_v1 = vld [vmem:[%s7934_s22 + $0x1] ss:$0 sm:$0xff] }
0x29a9   :  { %v5275_v10 = vmul.f32 %v6753_v53, %v5273_v8  ;;  %v5274_v11 = vadd.f32 -0.28449672, %v5272_v9 }
0x29ab   :  { %v5277_v42 = vadd.f32 0.2548296, %v5275_v10  ;;  %v5276_v45 = vmul.f32 %v6755_v56, %v5274_v11 }
0x29ad   :  { %v5279_v12 = vmul.f32 %v6753_v53, %v5277_v42  ;;  %v5278_v13 = vadd.f32 0.2548296, %v5276_v45  ;;  %v6661_v53 = vld [vmem:[%s7896_s23 + $0x8] sm:$0xff]   ;;  %v6662_v45 = vld [vmem:[%s7898_s25] sm:$0xff]  }
0x29af   :  { %v5289_v16 = vmul.f32 %v6757_v3, %v5279_v12  ;;  %v5280_v17 = vmul.f32 %v6755_v56, %v5278_v13  ;;  %v6663_v12 = vld [vmem:[%s7898_s25 + $0x8] sm:$0xff]   ;;  %v5912_v3 = vld [vmem:[%s7897_s24] ss:$0 sm:$0xff]  ;;  %s6793_s25 = smov [#allocation2]  }
0x29b0   :  { %s5584_s1 = sshll.u32 %s6793_s25, 4  ;;  %s5585_s1 = int_to_ptr.vmem [resolvable:$true] %s5584_s1 }
0x29b1   :  { %v5291_v14 = vsub.f32 1.0, %v5289_v16  ;;  %v5290_v19 = vmul.f32 %v6759_v18, %v5280_v17  ;;  %s6766_s24 = scalar_lea.vmem %s5585_s1, 32  ;;  %p6771_p1 = scmp.lt.s32.totalorder %s5585_s1, %s5585_s1 }
0x29b2   :  { %p6767_p0 = scmp.ne.s32.totalorder %s5585_s1, %s6766_s24  ;;  %p6772_p2 = scmp.lt.s32.totalorder %s6766_s24, %s6766_s24 }
0x29b3   :  { %v5295_v20 = vsub.f32 0.0, %v5291_v14  ;;  %v5292_v60 = vsub.f32 1.0, %v5290_v19 }
0x29b4   :  { %p6773_p3 = por %p6772_p2, %p6771_p1 }
0x29b5   :  { %v5297_v23 = vsel %vm5293_vm9, %v5291_v14, %v5295_v20  ;;  %v5296_v25 = vsub.f32 0.0, %v5292_v60 }
0x29b6   :  { %v5299_v21 = vadd.f32 1.0, %v5297_v23  ;;  %p6774_p4 = pnand %p6773_p3, %p6767_p0 }
0x29b7   :  { %v5298_v44 = vsel %vm5294_vm10, %v5292_v60, %v5296_v25 }
0x29b8   :  { %v5300_v31 = vadd.f32 1.0, %v5298_v44  ;;  %v5301_v29 = vmul.f32 %v5299_v21, %v5249_v26 }
0x29ba   :  { %v5302_v34 = vmul.f32 %v5300_v31, %v5250_v28 }
0x29bc   :  { %v5314_v30 = vpack.c.bf16 %v5302_v34, %v5301_v29 }
0x29be   :  { %6560 = vmatmul.mubr.msk.bf16.vlgmr.msra.gmra.mrb[104].mxu1 %vm119_vm0, %v5314_v30 }
0x2a91   :  { %v5382_v36 = vpop.f32.mrb[104].mxu1 }
0x2a92   :  { %v5383_v37 = vadd.f32 %v5902_v35, %v5382_v36  ;;  %v6561_v47 = vpop.f32.mrb[105].mxu1 }
0x2a93   :  { %v5385_v38 = vpop.f32.mrb[106].mxu1 }
0x2a94   :  { %v5386_v22 = vadd.f32 %v5902_v35, %v5385_v38  ;;  %v6562_v40 = vpop.f32.mrb[107].mxu1  ;;  %v5389_v41 = vadd.f32 %v5383_v37, %v7793_v32 }
0x2a96   :  { %v5395_v39 = vsel %vm203_vm3, %v5389_v41, 0.0  ;;  %v5390_v2 = vadd.f32 %v5386_v22, %v7795_v33  ;;  %v6660_v33 = vld [vmem:[%s7896_s23] sm:$0xff]  }
0x2a97   :  { %5396 = vadd.xlane.f32.xlu0 %v5395_v39  ;;  %6564 = vmatpush3.bf16.msra.mxu0 %v6660_v33 }
0x2a98   :  { %v5398_v6 = vsel %vm203_vm3, %v5390_v2, 0.0  ;;  %6565 = vmatprep.subr.bf16.mxu0 %v6791_v15 }
0x2a99   :  { %5399 = vadd.xlane.f32.xlu1 %v5398_v6 }
0x2a9b   :  { %6566 = vmatpush3.bf16.msra.mxu0 %v6661_v53 }
0x2a9c   :  { %6571 = vmatprep.subr.bf16.mxu0 %v6791_v15 }
0x2b24   :  { %v5397_v43 = vpop.xlane.xlu0 %5396 }
0x2b25   :  { %v5401_v24 = vmul.f32 0.03125, %v5397_v43 }
0x2b26   :  { %v5400_v46 = vpop.xlane.xlu1 %5399 }
0x2b27   :  { %v5403_v48 = vsub.f32 %v5389_v41, %v5401_v24  ;;  %v5402_v27 = vmul.f32 0.03125, %v5400_v46 }
0x2b29   :  { %v5404_v49 = vsub.f32 %v5390_v2, %v5402_v27  ;;  %v5405_v50 = vmul.f32 %v5403_v48, %v5403_v48 }
0x2b2b   :  { %v5407_v51 = vsel %vm203_vm3, %v5405_v50, 0.0  ;;  %v5406_v52 = vmul.f32 %v5404_v49, %v5404_v49 }
0x2b2c   :  { %5408 = vadd.xlane.f32.xlu0 %v5407_v51 }
0x2b2d   :  { %v5410_v32 = vsel %vm203_vm3, %v5406_v52, 0.0 }
0x2b2e   :  { %5411 = vadd.xlane.f32.xlu1 %v5410_v32 }
0x2bb9   :  { %v5409_v54 = vpop.xlane.xlu0 %5408 }
0x2bba   :  { %v5413_v55 = vmul.f32 0.03125, %v5409_v54 }
0x2bbb   :  { %v5412_v56 = vpop.xlane.xlu1 %5411 }
0x2bbc   :  { %v5415_v57 = vadd.f32 1e-12, %v5413_v55  ;;  %v5414_v58 = vmul.f32 0.03125, %v5412_v56 }
0x2bbe   :  { %6760 = vrsqrt.f32 %v5415_v57  ;;  %v5416_v59 = vadd.f32 1e-12, %v5414_v58 }
0x2bc0   :  { %6762 = vrsqrt.f32 %v5416_v59 }
0x2bc8   :  { %v6761_v61 = vpop.eup %6760 }
0x2bc9   :  { %v5419_v62 = vmul.f32 %v6761_v61, %v5403_v48 }
0x2bca   :  { %v6763_v63 = vpop.eup %6762 }
0x2bcb   :  { %v5420_v4 = vmul.f32 %v6763_v63, %v5404_v49  ;;  %v5427_v5 = vmul.f32 %v5910_v0, %v5419_v62 }
0x2bcd   :  { %v5428_v7 = vmul.f32 %v5910_v0, %v5420_v4  ;;  %v5435_v9 = vadd.f32 %v5911_v1, %v5427_v5 }
0x2bcf   :  { %v5436_v8 = vadd.f32 %v5911_v1, %v5428_v7 }
0x2bd1   :  { %v5438_v10 = vrot.slane %v5436_v8, 7 }
0x2bd3   :  { %v5441_v11 = vsel %vm5440_vm11, %v5435_v9, %v5438_v10 }
0x2bd4   :  { %v5447_v42 = vpack.c.bf16 %v5441_v11, %v5441_v11 }
0x2bd6   :  { %6568 = vmatmul.mubr.msk.bf16.vlgmr.msra.gmra.mrb[104].mxu0 %vm203_vm3, %v5447_v42 }
0x2bd7   :  { %6575 = vmatprep.mubr.msk.bf16.mxu0 %vm6792_vm4, %v6791_v15  ;;  %6572 = vmatpush3.bf16.msra.mxu0 %v6662_v45 }
0x2bd8   :  { %6573 = vmatprep.subr.bf16.mxu0 %v6791_v15  ;;  %v5916_v15 = vld [vmem:[%s7899_s26] ss:$0 sm:$0xff] }
0x2bdb   :  { %6574 = vmatpush3.bf16.msra.mxu0 %v6663_v12 }
0x2ca9   :  { %v5503_v13 = vpop.f32.mrb[104].mxu0 }
0x2caa   :  { %v5504_v16 = vadd.f32 %v5912_v3, %v5503_v13  ;;  %v6569_v17 = vpop.f32.mrb[105].mxu0 }
0x2cab   :  { %v5506_v18 = vpop.f32.mrb[106].mxu0 }
0x2cac   :  { %6764 = vtanh.f32 %v5504_v16  ;;  %v6570_v14 = vpop.f32.mrb[107].mxu0 }
0x2cb6   :  { %v6765_v19 = vpop.eup %6764 }
0x2cb7   :  { %v5515_v20 = vpack.c.bf16 %v6765_v19, %v6765_v19 }
0x2cb9   :  { %6576 = vmatmul.mubr.msk.bf16.vlgmr.msra.gmra.mrb[108].mxu0 %vm203_vm3, %v5515_v20 }
0x2d8c   :  { %v5571_v60 = vpop.f32.mrb[108].mxu0 }
0x2d8d   :  { %v5572_v23 = vadd.f32 %v5916_v15, %v5571_v60  ;;  %v6577_v25 = vpop.f32.mrb[109].mxu0 }
0x2d8e   :  { %v5574_v21 = vpop.f32.mrb[110].mxu0 }
0x2d8f   :  { %5577 = vst [vmem:[#allocation2] sm:$0x3] %v5572_v23  ;;  %v6578_v44 = vpop.f32.mrb[111].mxu0 }
0x2d90   :  { %6777 = shalt.err (!%p6774_p4)
}
0x2d91   :  { %s6778_s26 = scalar_lea.hbm %s7900_s27, 32 }
0x2d92   :  { %p6779_p5 = scmp.ne.s32.totalorder %s7900_s27, %s6778_s26  ;;  %p6782_p6 = scmp.lt.u32.totalorder %s6778_s26, %s7900_s27 }
0x2d94   :  { %p6784_p7 = pnand %p6782_p6, %p6779_p5 }
0x2d96   :  { %6787 = shalt.err (!%p6784_p7)
}
0x2d97   :  { %5587 = dma.vmem_to_hbm [thread:$0]  %s5585_s1, 32, %s7900_s27, [#allocation3]  }
0x2d98   :  { %6788 = dma.done.wait [#allocation3], 32  }
0x2d99   :  { %6789 = vsyncadd [#allocation3], 4294967264 }
0x2d9a   :  { %5591 = vsyncpa [#allocation3], 1 }

</bundles_post_ra>
